<compile_context>
chip_gen: v5e
topology: v5e:2x2
jax: 0.10.0
libtpu: 0.0.40
codegen_flags: <defaults>
</compile_context>

<pallas_src>
import jax
import jax.numpy as jnp
from jax import lax
from jax.experimental import pallas as pl
from jax.experimental.pallas import tpu as pltpu

# ----- hyper-parameters (undeclared globals of the reference file, chosen small) -----
M = 4                     # state dim m
N = 4                     # observation dim n (reference implicitly requires m == n)
D_MODEL = 2 * N           # d_model_enc == d_model_dec == 2n == 2m
NHEAD = 2
DH = D_MODEL // NHEAD
D_HID = 32                # encoder dim_feedforward
DIM_FF_DEC = 32           # decoder dim_feedforward
NLAYERS = 2
MAX_MEM_LEN = 12          # max_mem_len global (head Linear is 6*max_mem_len wide)
MEM_T = 12                # deque capacity (InitSequence mem_t default)
SEQ_PAD = 16              # in-kernel memory buffer rows (>= MEM_T, multiple of 8)
LN_EPS = 1e-5
OUT_ROWS, OUT_LANES = 8, 128

assert M == N, "reference stacks 2n-wide and 2m-wide rows into the same transformer"
assert D_MODEL >= 6, "decoder_output.T[-6:, :] needs at least 6 features"
assert MEM_T <= MAX_MEM_LEN and MEM_T <= SEQ_PAD


# ============================ weight slab packing =============================

class _SlabBuilder:
    """Packs many small f32 parameter arrays into one (rows, 128) slab with static offsets."""

    def __init__(self, lanes=OUT_LANES):
        self.lanes = lanes
        self.chunks = []
        self.offsets = {}
        self.cur = 0

    def add(self, name, arr, align=1):
        arr = jnp.asarray(arr, jnp.float32)
        if arr.ndim == 1:
            arr = arr[None, :]
        r, c = arr.shape
        assert c <= self.lanes, name
        pad = (-self.cur) % align
        if pad:
            self.chunks.append(jnp.zeros((pad, self.lanes), jnp.float32))
            self.cur += pad
        padded = jnp.zeros((r, self.lanes), jnp.float32).at[:, :c].set(arr)
        self.chunks.append(padded)
        self.offsets[name] = (self.cur, r, c)
        self.cur += r

    def finalize(self):
        pad = (-self.cur) % 8
        if pad:
            self.chunks.append(jnp.zeros((pad, self.lanes), jnp.float32))
            self.cur += pad
        return jnp.concatenate(self.chunks, axis=0), dict(self.offsets)


def sinusoidal_pe(seq, d_model):
    pos = jnp.arange(seq, dtype=jnp.float32)[:, None]
    i = jnp.arange(0, d_model, 2, dtype=jnp.float32)
    div = jnp.exp(-jnp.log(10000.0) * i / d_model)
    pe = jnp.zeros((seq, d_model), jnp.float32)
    pe = pe.at[:, 0::2].set(jnp.sin(pos * div))
    pe = pe.at[:, 1::2].set(jnp.cos(pos * div))
    return pe
# TODO(synk): the PositionalEncoding class is not defined in the reference file; the
# standard sinusoidal PE (added along the sequence axis, dropout disabled) is assumed.


def init_params(key):
    keys = iter(jax.random.split(key, 128))

    def dense(shape, scale=0.1):
        return (scale * jax.random.normal(next(keys), shape)).astype(jnp.float32)

    def attn(e):
        # NOTE: weights stored as (in, out); porting a PyTorch checkpoint needs a transpose.
        return dict(wq=dense((e, e)), bq=dense((1, e)),
                    wk=dense((e, e)), bk=dense((1, e)),
                    wv=dense((e, e)), bv=dense((1, e)),
                    wo=dense((e, e)), bo=dense((1, e)))

    ones = lambda e: jnp.ones((1, e), jnp.float32)
    zeros = lambda e: jnp.zeros((1, e), jnp.float32)

    enc = [dict(sa=attn(D_MODEL),
                ln1_g=ones(D_MODEL), ln1_b=zeros(D_MODEL),
                ln2_g=ones(D_MODEL), ln2_b=zeros(D_MODEL),
                w1=dense((D_MODEL, D_HID)), b1=dense((1, D_HID)),
                w2=dense((D_HID, D_MODEL)), b2=dense((1, D_MODEL)))
           for _ in range(NLAYERS)]
    dec = [dict(sa=attn(D_MODEL), ca=attn(D_MODEL),
                ln1_g=ones(D_MODEL), ln1_b=zeros(D_MODEL),
                ln2_g=ones(D_MODEL), ln2_b=zeros(D_MODEL),
                ln3_g=ones(D_MODEL), ln3_b=zeros(D_MODEL),
                w1=dense((D_MODEL, DIM_FF_DEC)), b1=dense((1, DIM_FF_DEC)),
                w2=dense((DIM_FF_DEC, D_MODEL)), b2=dense((1, D_MODEL)))
           for _ in range(NLAYERS)]
    head = dict(w1=dense((6 * MAX_MEM_LEN, 32)), b1=dense((1, 32)),
                w2=dense((32, M * N)), b2=dense((1, M * N)))

    f_mat = jnp.eye(M, dtype=jnp.float32) + dense((M, M), 0.05)     # state transition f
    h_mat = jnp.eye(N, M, dtype=jnp.float32) + dense((N, M), 0.05)  # observation h
    return dict(enc=enc, dec=dec, head=head, F=f_mat, H=h_mat)


def pack_params(p):
    sb = _SlabBuilder()

    # self-attention modules in order: enc0, enc1, dec0, dec1 (q|k|v fused per module)
    sa_mods = [p["enc"][L]["sa"] for L in range(NLAYERS)] + \
              [p["dec"][L]["sa"] for L in range(NLAYERS)]
    for a, mod in enumerate(sa_mods):
        sb.add(f"sa{a}_win", jnp.concatenate([mod["wq"], mod["wk"], mod["wv"]], axis=1), 8)
        sb.add(f"sa{a}_bin", jnp.concatenate([mod["bq"], mod["bk"], mod["bv"]], axis=1), 1)
        sb.add(f"sa{a}_wo", mod["wo"], 8)
        sb.add(f"sa{a}_bo", mod["bo"], 1)

    # cross-attention: per-layer q/o, K/V of BOTH layers fused into one slab (hoisted in-kernel)
    wkv_parts, bkv_parts = [], []
    for L in range(NLAYERS):
        ca = p["dec"][L]["ca"]
        sb.add(f"ca{L}_wq", ca["wq"], 8)
        sb.add(f"ca{L}_bq", ca["bq"], 1)
        sb.add(f"ca{L}_wo", ca["wo"], 8)
        sb.add(f"ca{L}_bo", ca["bo"], 1)
        wkv_parts += [ca["wk"], ca["wv"]]
        bkv_parts += [ca["bk"], ca["bv"]]
    sb.add("ca_wkv", jnp.concatenate(wkv_parts, axis=1), 8)   # (E, 2*NLAYERS*E)
    sb.add("ca_bkv", jnp.concatenate(bkv_parts, axis=1), 1)

    for L in range(NLAYERS):
        e = p["enc"][L]
        sb.add(f"enc{L}_ln1_g", e["ln1_g"], 1); sb.add(f"enc{L}_ln1_b", e["ln1_b"], 1)
        sb.add(f"enc{L}_ln2_g", e["ln2_g"], 1); sb.add(f"enc{L}_ln2_b", e["ln2_b"], 1)
        sb.add(f"enc{L}_ffn_w1", e["w1"], 8); sb.add(f"enc{L}_ffn_b1", e["b1"], 1)
        sb.add(f"enc{L}_ffn_w2", e["w2"], 8); sb.add(f"enc{L}_ffn_b2", e["b2"], 1)
    for L in range(NLAYERS):
        d = p["dec"][L]
        for nm in ("ln1", "ln2", "ln3"):
            sb.add(f"dec{L}_{nm}_g", d[nm + "_g"], 1); sb.add(f"dec{L}_{nm}_b", d[nm + "_b"], 1)
        sb.add(f"dec{L}_ffn_w1", d["w1"], 8); sb.add(f"dec{L}_ffn_b1", d["b1"], 1)
        sb.add(f"dec{L}_ffn_w2", d["w2"], 8); sb.add(f"dec{L}_ffn_b2", d["b2"], 1)

    # head: fold  dec.T[-6:,:]  +  pad(seq -> MAX_MEM_LEN)  +  Flatten  into per-feature
    # (SEQ_PAD, 32) blocks:  hidden = b1 + sum_d sum_j dec[j, d] * head_w1_d[j, :]
    w1 = p["head"]["w1"]                                    # (6*MAX_MEM_LEN, 32)
    for d in range(D_MODEL - 6, D_MODEL):
        i = d - (D_MODEL - 6)
        blk_d = jnp.zeros((SEQ_PAD, 32), jnp.float32)
        blk_d = blk_d.at[:MEM_T, :].set(w1[i * MAX_MEM_LEN:i * MAX_MEM_LEN + MEM_T, :])
        sb.add(f"head_w1_{d}", blk_d, 8)
    sb.add("head_b1", p["head"]["b1"], 1)
    sb.add("head_w2", p["head"]["w2"], 8)
    sb.add("head_b2", p["head"]["b2"], 1)

    # segment-sum selector: (KGain_flat * tiled dy) @ segsum  ==  KGain @ dy  (row form)
    seg = jnp.zeros((M * N, M), jnp.float32)
    for i in range(M):
        for j in range(N):
            seg = seg.at[i * N + j, i].set(1.0)
    sb.add("segsum", seg, 8)

    sb.add("F", p["F"], 8)
    sb.add("H", p["H"], 8)
    sb.add("pe", sinusoidal_pe(SEQ_PAD, D_MODEL), 8)
    return sb.finalize()


# ============================ fused recurrent kernel ==========================

def build_forward(offsets):
    f32 = jnp.float32
    E = D_MODEL

    def kernel(y_ref, init_ref, w_ref, out_ref, st_ref, mem_in_ref, mem_out_ref):
        t = pl.program_id(0)

        def blk(name):
            r0, nr, nc = offsets[name]
            return w_ref[r0:r0 + nr, 0:nc]

        def dot(a, b):
            return jnp.dot(a, b, preferred_element_type=f32)

        def dot_nt(a, b):  # a (p,k), b (q,k) -> a @ b.T without an XLU transpose
            return lax.dot_general(a, b, (((1,), (1,)), ((), ())),
                                   preferred_element_type=f32)

        # ---------------- InitSequence (first grid step only) ----------------
        @pl.when(t == 0)
        def _():
            st_ref[...] = init_ref[...]
            mem_in_ref[...] = jnp.zeros_like(mem_in_ref)
            mem_out_ref[...] = jnp.zeros_like(mem_out_ref)

        # deque length after this step's append: 1 zero entry + steps 0..t, capped at MEM_T
        seq_len = jnp.minimum(t + 2, MEM_T)
        key_valid = lax.broadcasted_iota(jnp.int32, (1, SEQ_PAD), 1) < seq_len
        row_valid = lax.broadcasted_iota(jnp.int32, (SEQ_PAD, 1), 0) < seq_len
        row_ids = lax.broadcasted_iota(jnp.int32, (SEQ_PAD, 1), 0)

        def layer_norm(x, name):
            mu = jnp.sum(x, axis=-1, keepdims=True) * (1.0 / E)
            xc = x - mu
            var = jnp.sum(xc * xc, axis=-1, keepdims=True) * (1.0 / E)
            return xc * lax.rsqrt(var + LN_EPS) * blk(name + "_g") + blk(name + "_b")

        def softmax_masked(s):
            s = jnp.where(key_valid, s, -1e30)
            s = s - jnp.max(s, axis=-1, keepdims=True)
            p = jnp.exp(s)
            return p * pl.reciprocal(jnp.sum(p, axis=-1, keepdims=True), approx=True)

        inv_sqrt_dh = 1.0 / (DH ** 0.5)

        def attend(q, k, v):
            ctxs = []
            for h in range(NHEAD):
                qh = q[:, h * DH:(h + 1) * DH]
                kh = k[:, h * DH:(h + 1) * DH]
                vh = v[:, h * DH:(h + 1) * DH]
                p = softmax_masked(dot_nt(qh, kh) * inv_sqrt_dh)
                ctxs.append(dot(p, vh))
            return jnp.concatenate(ctxs, axis=-1)                       # (S, E)

        def self_attn(x, a):
            qkv = dot(x, blk(f"sa{a}_win")) + blk(f"sa{a}_bin")         # fused q|k|v matmul
            q, k, v = qkv[:, 0:E], qkv[:, E:2 * E], qkv[:, 2 * E:3 * E]
            return dot(attend(q, k, v), blk(f"sa{a}_wo")) + blk(f"sa{a}_bo")

        def ffn(x, name):
            h1 = jnp.maximum(dot(x, blk(name + "_w1")) + blk(name + "_b1"), 0.0)  # relu
            return dot(h1, blk(name + "_w2")) + blk(name + "_b2")

        def l2norm(v):  # func.normalize(v, p=2, dim=0, eps=1e-12) on a row vector
            ss = jnp.sum(v * v, axis=-1, keepdims=True)
            return v * lax.rsqrt(jnp.maximum(ss, 1e-24))

        # ---------------- step_prior ----------------
        y_row = y_ref[0:1, 0:N]
        m1x_post = st_ref[0:1, 0:M]
        m1x_post_prev = st_ref[1:2, 0:M]
        m1x_prior_prev = st_ref[2:3, 0:M]
        y_prev = st_ref[3:4, 0:N]

        m1x_prior = dot_nt(m1x_post, blk("F"))        # row form of F @ m1x_posterior
        m1y = dot_nt(m1x_prior, blk("H"))             # row form of H @ m1x_prior

        # ---------------- step_KGain_est features ----------------
        obs_diff = l2norm(y_row - y_prev)
        obs_innov_diff = l2norm(y_row - m1y)
        fw_evol_diff = l2norm(m1x_post - m1x_post_prev)
        fw_update_diff = l2norm(m1x_post - m1x_prior_prev)

        in_row = jnp.concatenate([obs_diff, obs_innov_diff], axis=-1)      # (1, 2n)
        out_row = jnp.concatenate([fw_evol_diff, fw_update_diff], axis=-1)  # (1, 2m)

        # ---------------- deque push (shift left when full, write at min(t+1, MEM_T-1)) ----
        shift_now = t + 2 > MEM_T
        widx = jnp.minimum(t + 1, MEM_T - 1)

        def push(mem_ref, new_row):
            old = mem_ref[...]
            shifted = jnp.concatenate([old[1:], old[0:1]], axis=0)
            base = jnp.where(shift_now, shifted, old)
            new = jnp.where(row_ids == widx, new_row, base)
            mem_ref[...] = new
            return new

        pe = blk("pe")                                                      # (SEQ_PAD, E)
        src = push(mem_in_ref, in_row) + pe
        tgt = push(mem_out_ref, out_row) + pe

        # ---------------- TransformerEncoder (post-norm, relu) ----------------
        enc = src
        for L in range(NLAYERS):
            enc = layer_norm(enc + self_attn(enc, L), f"enc{L}_ln1")
            enc = layer_norm(enc + ffn(enc, f"enc{L}_ffn"), f"enc{L}_ln2")

        # cross-attention K/V for BOTH decoder layers hoisted into one matmul
        kv_all = dot(enc, blk("ca_wkv")) + blk("ca_bkv")                    # (S, 2*NLAYERS*E)

        # ---------------- TransformerDecoder (post-norm, no tgt mask) ----------------
        dec = tgt
        for L in range(NLAYERS):
            dec = layer_norm(dec + self_attn(dec, NLAYERS + L), f"dec{L}_ln1")
            q = dot(dec, blk(f"ca{L}_wq")) + blk(f"ca{L}_bq")
            k = kv_all[:, 2 * E * L:2 * E * L + E]
            v = kv_all[:, 2 * E * L + E:2 * E * (L + 1)]
            ca = dot(attend(q, k, v), blk(f"ca{L}_wo")) + blk(f"ca{L}_bo")
            dec = layer_norm(dec + ca, f"dec{L}_ln2")
            dec = layer_norm(dec + ffn(dec, f"dec{L}_ffn"), f"dec{L}_ln3")

        # ---------------- head: last-6 features / pad / flatten folded into weights -------
        dec_masked = jnp.where(row_valid, dec, 0.0)
        acc = jnp.zeros((SEQ_PAD, 32), f32)
        for d in range(E - 6, E):                       # only the last 6 features contribute
            acc = acc + dec_masked[:, d:d + 1] * blk(f"head_w1_{d}")
        hh = jnp.sum(acc, axis=0, keepdims=True) + blk("head_b1")           # (1, 32)
        hh = jnp.where(hh > 0, hh, jnp.exp(jnp.minimum(hh, 0.0)) - 1.0)      # ELU(alpha=1)
        kg_flat = dot(hh, blk("head_w2")) + blk("head_b2")                   # (1, m*n)

        # ---------------- KNet_step posterior update ----------------
        dy = y_row - m1y                                                     # (1, n)
        dy_rep = jnp.concatenate([dy] * M, axis=-1)                          # (1, m*n)
        inov = dot(kg_flat * dy_rep, blk("segsum"))                          # (1, m) = KGain @ dy
        posterior = m1x_prior + inov

        # ---------------- carry filter state to the next grid step ----------------
        def pad_row(row, w):
            return jnp.concatenate([row, jnp.zeros((1, OUT_LANES - w), f32)], axis=-1)

        st_ref[...] = jnp.concatenate(
            [pad_row(posterior, M), pad_row(m1x_post, M),
             pad_row(m1x_prior, M), pad_row(y_row, N),
             jnp.zeros((OUT_ROWS - 4, OUT_LANES), f32)], axis=0)

        # ---------------- lane-dense (8,128) per-step output block ----------------
        out_ref[...] = jnp.concatenate(
            [pad_row(posterior, M), pad_row(kg_flat, M * N),
             jnp.zeros((OUT_ROWS - 2, OUT_LANES), f32)], axis=0)

    def forward(y_pack, init_slab, wslab):
        T = y_pack.shape[0]
        n_rows = wslab.shape[0]
        out = pl.pallas_call(
            kernel,
            out_shape=jax.ShapeDtypeStruct((T, OUT_ROWS, OUT_LANES), jnp.float32),
            grid_spec=pltpu.PrefetchScalarGridSpec(
                num_scalar_prefetch=0,
                grid=(T,),
                in_specs=[
                    pl.BlockSpec((None, OUT_ROWS, OUT_LANES), lambda t: (t, 0, 0)),  # y_t
                    pl.BlockSpec((OUT_ROWS, OUT_LANES), lambda t: (0, 0)),           # init state
                    pl.BlockSpec((n_rows, OUT_LANES), lambda t: (0, 0)),             # weight slab
                ],
                out_specs=pl.BlockSpec((None, OUT_ROWS, OUT_LANES), lambda t: (t, 0, 0)),
                scratch_shapes=[
                    pltpu.VMEM((OUT_ROWS, OUT_LANES), jnp.float32),   # filter state
                    pltpu.VMEM((SEQ_PAD, D_MODEL), jnp.float32),      # mem_in deque
                    pltpu.VMEM((SEQ_PAD, D_MODEL), jnp.float32),      # mem_out deque
                ]),
            compiler_params=pltpu.CompilerParams(
                dimension_semantics=("arbitrary",)),                   # sequential recurrence
        )(y_pack, init_slab, wslab)
        x_out = out[:, 0, :M].T                         # (m, T) like the reference x_out buffer
        kgain = out[:, 1, :M * N].reshape(T, M, N)      # KGain_array
        return x_out, kgain

    return jax.jit(forward)


# ============================ host-side helpers ===============================

def make_init_slab(m1_0, h_mat):
    x0 = m1_0.reshape(-1)
    y_prev = (h_mat @ m1_0).reshape(-1)                 # InitSequence: y_previous = h(M1_0)
    s = jnp.zeros((OUT_ROWS, OUT_LANES), jnp.float32)
    s = s.at[0, :M].set(x0).at[1, :M].set(x0).at[2, :M].set(x0).at[3, :N].set(y_prev)
    return s


def pack_observations(y_seq):                           # (T, n) -> lane-dense (T, 8, 128)
    T = y_seq.shape[0]
    y = jnp.zeros((T, OUT_ROWS, OUT_LANES), jnp.float32)
    return y.at[:, 0, :N].set(y_seq.astype(jnp.float32))


# ================================= main ======================================

if __name__ == "__main__":
    key = jax.random.PRNGKey(0)
    kp, km, ky = jax.random.split(key, 3)

    params = init_params(kp)
    wslab, offsets = pack_params(params)
    forward = build_forward(offsets)

    T = 16                                               # exercises growth AND the sliding phase
    m1_0 = jax.random.normal(km, (M, 1), dtype=jnp.float32)      # M1_0
    y_seq = jax.random.normal(ky, (T, N), dtype=jnp.float32)     # observation sequence

    init_slab = make_init_slab(m1_0, params["H"])
    y_pack = pack_observations(y_seq)

    x_out, kgain = forward(y_pack, init_slab, wslab)
    jax.block_until_ready(x_out)

    assert x_out.shape == (M, T) and kgain.shape == (T, M, N)
    assert bool(jnp.all(jnp.isfinite(x_out))) and bool(jnp.all(jnp.isfinite(kgain)))
    print("KERNEL_OK")
</pallas_src>

<mosaic_0001>
module attributes {stable_mosaic.version = 11 : i64} {
  func.func @kernel(%arg0: i32, %arg1: memref<1x8x128xf32, #tpu.memory_space<vmem>>, %arg2: memref<8x128xf32, #tpu.memory_space<vmem>>, %arg3: memref<624x128xf32, #tpu.memory_space<vmem>>, %arg4: memref<1x8x128xf32, #tpu.memory_space<vmem>>, %arg5: memref<8x128xf32, #tpu.memory_space<vmem>>, %arg6: memref<16x8xf32, #tpu.memory_space<vmem>>, %arg7: memref<16x8xf32, #tpu.memory_space<vmem>>) attributes {dimension_semantics = [#tpu.dimension_semantics<arbitrary>], iteration_bounds = array<i64: 16>, scalar_prefetch = 0 : i64, scratch_operands = 3 : i64, tpu.core_type = #tpu.core_type<tc>, window_params = [{transform_indices = @transform_0, window_bounds = array<i64: 1, 8, 128>}, {pipeline_mode = #tpu.pipeline_mode<synchronous>, transform_indices = @transform_1, window_bounds = array<i64: 8, 128>}, {pipeline_mode = #tpu.pipeline_mode<synchronous>, transform_indices = @transform_2, window_bounds = array<i64: 624, 128>}, {transform_indices = @transform_3, window_bounds = array<i64: 1, 8, 128>}]} {
    %c0_i32 = arith.constant 0 : i32
    %0 = arith.cmpi eq, %arg0, %c0_i32 : i32
    %1 = arith.extui %0 : i1 to i32
    %c0_i32_0 = arith.constant 0 : i32
    %2 = arith.cmpi ne, %1, %c0_i32_0 : i32
    scf.if %2 {
      %c0_271 = arith.constant 0 : index
      %c0_272 = arith.constant 0 : index
      %787 = vector.load %arg2[%c0_271, %c0_272] : memref<8x128xf32, #tpu.memory_space<vmem>>, vector<8x128xf32>
      %c0_273 = arith.constant 0 : index
      %c0_274 = arith.constant 0 : index
      %788 = vector.load %arg5[%c0_273, %c0_274] : memref<8x128xf32, #tpu.memory_space<vmem>>, vector<8x128xf32>
      tpu.vector_store %arg5[%c0_273, %c0_274], %787 {strides = array<i32>} : memref<8x128xf32, #tpu.memory_space<vmem>>, vector<8x128xf32>,
      %cst_275 = arith.constant 0.000000e+00 : f32
      %789 = vector.broadcast %cst_275 : f32 to vector<16x8xf32>
      %c0_276 = arith.constant 0 : index
      %c0_277 = arith.constant 0 : index
      %790 = vector.load %arg6[%c0_276, %c0_277] : memref<16x8xf32, #tpu.memory_space<vmem>>, vector<16x8xf32>
      tpu.vector_store %arg6[%c0_276, %c0_277], %789 {strides = array<i32>} : memref<16x8xf32, #tpu.memory_space<vmem>>, vector<16x8xf32>,
      %cst_278 = arith.constant 0.000000e+00 : f32
      %791 = vector.broadcast %cst_278 : f32 to vector<16x8xf32>
      %c0_279 = arith.constant 0 : index
      %c0_280 = arith.constant 0 : index
      %792 = vector.load %arg7[%c0_279, %c0_280] : memref<16x8xf32, #tpu.memory_space<vmem>>, vector<16x8xf32>
      tpu.vector_store %arg7[%c0_279, %c0_280], %791 {strides = array<i32>} : memref<16x8xf32, #tpu.memory_space<vmem>>, vector<16x8xf32>,
    } else {
    }
    %c2_i32 = arith.constant 2 : i32
    %3 = arith.addi %arg0, %c2_i32 : i32
    %c12_i32 = arith.constant 12 : i32
    %4 = arith.minsi %3, %c12_i32 : i32
    %5 = tpu.iota {dimensions = array<i32: 1>} : vector<1x16xi32>
    %6 = vector.broadcast %4 : i32 to vector<1x16xi32>
    %7 = arith.cmpi slt, %5, %6 : vector<1x16xi32>
    %8 = tpu.iota {dimensions = array<i32: 0>} : vector<16x1xi32>
    %9 = vector.broadcast %4 : i32 to vector<16x1xi32>
    %10 = arith.cmpi slt, %8, %9 : vector<16x1xi32>
    %11 = tpu.iota {dimensions = array<i32: 0>} : vector<16x1xi32>
    %c0 = arith.constant 0 : index
    %c0_1 = arith.constant 0 : index
    %c0_2 = arith.constant 0 : index
    %12 = vector.load %arg1[%c0, %c0_1, %c0_2] : memref<1x8x128xf32, #tpu.memory_space<vmem>>, vector<1x1x4xf32>
    %13 = vector.shape_cast %12 : vector<1x1x4xf32> to vector<1x4xf32>
    %c0_3 = arith.constant 0 : index
    %c0_4 = arith.constant 0 : index
    %14 = vector.load %arg5[%c0_3, %c0_4] : memref<8x128xf32, #tpu.memory_space<vmem>>, vector<1x4xf32>
    %c1 = arith.constant 1 : index
    %c0_5 = arith.constant 0 : index
    %15 = vector.load %arg5[%c1, %c0_5] : memref<8x128xf32, #tpu.memory_space<vmem>>, vector<1x4xf32>
    %c2 = arith.constant 2 : index
    %c0_6 = arith.constant 0 : index
    %16 = vector.load %arg5[%c2, %c0_6] : memref<8x128xf32, #tpu.memory_space<vmem>>, vector<1x4xf32>
    %c3 = arith.constant 3 : index
    %c0_7 = arith.constant 0 : index
    %17 = vector.load %arg5[%c3, %c0_7] : memref<8x128xf32, #tpu.memory_space<vmem>>, vector<1x4xf32>
    %c592 = arith.constant 592 : index
    %c0_8 = arith.constant 0 : index
    %18 = vector.load %arg3[%c592, %c0_8] : memref<624x128xf32, #tpu.memory_space<vmem>>, vector<4x4xf32>
    %cst = arith.constant dense<0.000000e+00> : vector<1x4xf32>
    %19 = tpu.matmul %14, %18, %cst {dimension_numbers = #tpu.dot_dimension_numbers<[1], [1], [0], [0], [0, 0, 1, 0], [], []>} : vector<1x4xf32>, vector<4x4xf32>, vector<1x4xf32> -> vector<1x4xf32>
    %c600 = arith.constant 600 : index
    %c0_9 = arith.constant 0 : index
    %20 = vector.load %arg3[%c600, %c0_9] : memref<624x128xf32, #tpu.memory_space<vmem>>, vector<4x4xf32>
    %cst_10 = arith.constant dense<0.000000e+00> : vector<1x4xf32>
    %21 = tpu.matmul %19, %20, %cst_10 {dimension_numbers = #tpu.dot_dimension_numbers<[1], [1], [0], [0], [0, 0, 1, 0], [], []>} : vector<1x4xf32>, vector<4x4xf32>, vector<1x4xf32> -> vector<1x4xf32>
    %22 = arith.subf %13, %17 : vector<1x4xf32>
    %23 = arith.mulf %22, %22 : vector<1x4xf32>
    %cst_11 = arith.constant dense<0.000000e+00> : vector<1xf32>
    %24 = vector.multi_reduction <add>, %23, %cst_11 [1] : vector<1x4xf32> to vector<1xf32>
    %25 = vector.shape_cast %24 : vector<1xf32> to vector<1x1xf32>
    %cst_12 = arith.constant 1.000000e-24 : f32
    %26 = vector.broadcast %cst_12 : f32 to vector<1x1xf32>
    %27 = arith.maximumf %25, %26 : vector<1x1xf32>
    %28 = math.rsqrt %27 : vector<1x1xf32>
    %29 = vector.broadcast %28 : vector<1x1xf32> to vector<1x4xf32>
    %30 = arith.mulf %22, %29 : vector<1x4xf32>
    %31 = arith.subf %13, %21 : vector<1x4xf32>
    %32 = arith.mulf %31, %31 : vector<1x4xf32>
    %cst_13 = arith.constant dense<0.000000e+00> : vector<1xf32>
    %33 = vector.multi_reduction <add>, %32, %cst_13 [1] : vector<1x4xf32> to vector<1xf32>
    %34 = vector.shape_cast %33 : vector<1xf32> to vector<1x1xf32>
    %cst_14 = arith.constant 1.000000e-24 : f32
    %35 = vector.broadcast %cst_14 : f32 to vector<1x1xf32>
    %36 = arith.maximumf %34, %35 : vector<1x1xf32>
    %37 = math.rsqrt %36 : vector<1x1xf32>
    %38 = vector.broadcast %37 : vector<1x1xf32> to vector<1x4xf32>
    %39 = arith.mulf %31, %38 : vector<1x4xf32>
    %40 = arith.subf %14, %15 : vector<1x4xf32>
    %41 = arith.mulf %40, %40 : vector<1x4xf32>
    %cst_15 = arith.constant dense<0.000000e+00> : vector<1xf32>
    %42 = vector.multi_reduction <add>, %41, %cst_15 [1] : vector<1x4xf32> to vector<1xf32>
    %43 = vector.shape_cast %42 : vector<1xf32> to vector<1x1xf32>
    %cst_16 = arith.constant 1.000000e-24 : f32
    %44 = vector.broadcast %cst_16 : f32 to vector<1x1xf32>
    %45 = arith.maximumf %43, %44 : vector<1x1xf32>
    %46 = math.rsqrt %45 : vector<1x1xf32>
    %47 = vector.broadcast %46 : vector<1x1xf32> to vector<1x4xf32>
    %48 = arith.mulf %40, %47 : vector<1x4xf32>
    %49 = arith.subf %14, %16 : vector<1x4xf32>
    %50 = arith.mulf %49, %49 : vector<1x4xf32>
    %cst_17 = arith.constant dense<0.000000e+00> : vector<1xf32>
    %51 = vector.multi_reduction <add>, %50, %cst_17 [1] : vector<1x4xf32> to vector<1xf32>
    %52 = vector.shape_cast %51 : vector<1xf32> to vector<1x1xf32>
    %cst_18 = arith.constant 1.000000e-24 : f32
    %53 = vector.broadcast %cst_18 : f32 to vector<1x1xf32>
    %54 = arith.maximumf %52, %53 : vector<1x1xf32>
    %55 = math.rsqrt %54 : vector<1x1xf32>
    %56 = vector.broadcast %55 : vector<1x1xf32> to vector<1x4xf32>
    %57 = arith.mulf %49, %56 : vector<1x4xf32>
    %58 = tpu.concatenate %30, %39 in 1 : vector<1x4xf32>, vector<1x4xf32> -> vector<1x8xf32>
    %59 = tpu.concatenate %48, %57 in 1 : vector<1x4xf32>, vector<1x4xf32> -> vector<1x8xf32>
    %c2_i32_19 = arith.constant 2 : i32
    %60 = arith.addi %arg0, %c2_i32_19 : i32
    %c12_i32_20 = arith.constant 12 : i32
    %61 = arith.cmpi sgt, %60, %c12_i32_20 : i32
    %c1_i32 = arith.constant 1 : i32
    %62 = arith.addi %arg0, %c1_i32 : i32
    %c11_i32 = arith.constant 11 : i32
    %63 = arith.minsi %62, %c11_i32 : i32
    %c608 = arith.constant 608 : index
    %c0_21 = arith.constant 0 : index
    %64 = vector.load %arg3[%c608, %c0_21] : memref<624x128xf32, #tpu.memory_space<vmem>>, vector<16x8xf32>
    %c0_22 = arith.constant 0 : index
    %c0_23 = arith.constant 0 : index
    %65 = vector.load %arg6[%c0_22, %c0_23] : memref<16x8xf32, #tpu.memory_space<vmem>>, vector<16x8xf32>
    %66 = vector.extract_strided_slice %65 {offsets = [1, 0], sizes = [15, 8], strides = [1, 1]} : vector<16x8xf32> to vector<15x8xf32>
    %67 = vector.extract_strided_slice %65 {offsets = [0, 0], sizes = [1, 8], strides = [1, 1]} : vector<16x8xf32> to vector<1x8xf32>
    %68 = tpu.concatenate %66, %67 in 0 : vector<15x8xf32>, vector<1x8xf32> -> vector<16x8xf32>
    %69 = arith.select %61, %68, %65 : vector<16x8xf32>
    %70 = vector.broadcast %63 : i32 to vector<16x1xi32>
    %71 = arith.cmpi eq, %11, %70 : vector<16x1xi32>
    %72 = vector.shape_cast %71 : vector<16x1xi1> to vector<16x1xi1>
    %73 = vector.broadcast %72 : vector<16x1xi1> to vector<16x8xi1>
    %74 = vector.shape_cast %58 : vector<1x8xf32> to vector<1x8xf32>
    %75 = vector.broadcast %74 : vector<1x8xf32> to vector<16x8xf32>
    %76 = arith.select %73, %75, %69 : vector<16x8xi1>, vector<16x8xf32>
    %c0_24 = arith.constant 0 : index
    %c0_25 = arith.constant 0 : index
    %77 = vector.load %arg6[%c0_24, %c0_25] : memref<16x8xf32, #tpu.memory_space<vmem>>, vector<16x8xf32>
    tpu.vector_store %arg6[%c0_24, %c0_25], %76 {strides = array<i32>} : memref<16x8xf32, #tpu.memory_space<vmem>>, vector<16x8xf32>,
    %78 = arith.addf %76, %64 : vector<16x8xf32>
    %c0_26 = arith.constant 0 : index
    %c0_27 = arith.constant 0 : index
    %79 = vector.load %arg7[%c0_26, %c0_27] : memref<16x8xf32, #tpu.memory_space<vmem>>, vector<16x8xf32>
    %80 = vector.extract_strided_slice %79 {offsets = [1, 0], sizes = [15, 8], strides = [1, 1]} : vector<16x8xf32> to vector<15x8xf32>
    %81 = vector.extract_strided_slice %79 {offsets = [0, 0], sizes = [1, 8], strides = [1, 1]} : vector<16x8xf32> to vector<1x8xf32>
    %82 = tpu.concatenate %80, %81 in 0 : vector<15x8xf32>, vector<1x8xf32> -> vector<16x8xf32>
    %83 = arith.select %61, %82, %79 : vector<16x8xf32>
    %84 = vector.broadcast %63 : i32 to vector<16x1xi32>
    %85 = arith.cmpi eq, %11, %84 : vector<16x1xi32>
    %86 = vector.shape_cast %85 : vector<16x1xi1> to vector<16x1xi1>
    %87 = vector.broadcast %86 : vector<16x1xi1> to vector<16x8xi1>
    %88 = vector.shape_cast %59 : vector<1x8xf32> to vector<1x8xf32>
    %89 = vector.broadcast %88 : vector<1x8xf32> to vector<16x8xf32>
    %90 = arith.select %87, %89, %83 : vector<16x8xi1>, vector<16x8xf32>
    %c0_28 = arith.constant 0 : index
    %c0_29 = arith.constant 0 : index
    %91 = vector.load %arg7[%c0_28, %c0_29] : memref<16x8xf32, #tpu.memory_space<vmem>>, vector<16x8xf32>
    tpu.vector_store %arg7[%c0_28, %c0_29], %90 {strides = array<i32>} : memref<16x8xf32, #tpu.memory_space<vmem>>, vector<16x8xf32>,
    %92 = arith.addf %90, %64 : vector<16x8xf32>
    %c0_30 = arith.constant 0 : index
    %c0_31 = arith.constant 0 : index
    %93 = vector.load %arg3[%c0_30, %c0_31] : memref<624x128xf32, #tpu.memory_space<vmem>>, vector<8x24xf32>
    %cst_32 = arith.constant dense<0.000000e+00> : vector<16x24xf32>
    %94 = tpu.matmul %78, %93, %cst_32 {dimension_numbers = #tpu.dot_dimension_numbers<[1], [0], [0], [1], [0, 0, 1, 1], [], []>} : vector<16x8xf32>, vector<8x24xf32>, vector<16x24xf32> -> vector<16x24xf32>
    %c8 = arith.constant 8 : index
    %c0_33 = arith.constant 0 : index
    %95 = vector.load %arg3[%c8, %c0_33] : memref<624x128xf32, #tpu.memory_space<vmem>>, vector<1x24xf32>
    %96 = vector.broadcast %95 : vector<1x24xf32> to vector<16x24xf32>
    %97 = arith.addf %94, %96 : vector<16x24xf32>
    %98 = vector.extract_strided_slice %97 {offsets = [0, 0], sizes = [16, 8], strides = [1, 1]} : vector<16x24xf32> to vector<16x8xf32>
    %99 = vector.extract_strided_slice %97 {offsets = [0, 8], sizes = [16, 8], strides = [1, 1]} : vector<16x24xf32> to vector<16x8xf32>
    %100 = vector.extract_strided_slice %97 {offsets = [0, 16], sizes = [16, 8], strides = [1, 1]} : vector<16x24xf32> to vector<16x8xf32>
    %101 = vector.extract_strided_slice %98 {offsets = [0, 0], sizes = [16, 4], strides = [1, 1]} : vector<16x8xf32> to vector<16x4xf32>
    %102 = vector.extract_strided_slice %99 {offsets = [0, 0], sizes = [16, 4], strides = [1, 1]} : vector<16x8xf32> to vector<16x4xf32>
    %103 = vector.extract_strided_slice %100 {offsets = [0, 0], sizes = [16, 4], strides = [1, 1]} : vector<16x8xf32> to vector<16x4xf32>
    %cst_34 = arith.constant dense<0.000000e+00> : vector<16x16xf32>
    %104 = tpu.matmul %101, %102, %cst_34 {dimension_numbers = #tpu.dot_dimension_numbers<[1], [1], [0], [0], [0, 0, 1, 0], [], []>} : vector<16x4xf32>, vector<16x4xf32>, vector<16x16xf32> -> vector<16x16xf32>
    %cst_35 = arith.constant 5.000000e-01 : f32
    %105 = vector.broadcast %cst_35 : f32 to vector<16x16xf32>
    %106 = arith.mulf %104, %105 : vector<16x16xf32>
    %cst_36 = arith.constant -1.000000e+30 : f32
    %107 = vector.shape_cast %7 : vector<1x16xi1> to vector<1x16xi1>
    %108 = vector.broadcast %107 : vector<1x16xi1> to vector<16x16xi1>
    %109 = vector.broadcast %cst_36 : f32 to vector<16x16xf32>
    %110 = arith.select %108, %106, %109 : vector<16x16xi1>, vector<16x16xf32>
    %cst_37 = arith.constant dense<0xFF800000> : vector<16xf32>
    %111 = vector.multi_reduction <maximumf>, %110, %cst_37 [1] : vector<16x16xf32> to vector<16xf32>
    %112 = vector.shape_cast %111 : vector<16xf32> to vector<16x1xf32>
    %113 = vector.broadcast %112 : vector<16x1xf32> to vector<16x16xf32>
    %114 = arith.subf %110, %113 : vector<16x16xf32>
    %115 = math.exp %114 : vector<16x16xf32>
    %cst_38 = arith.constant dense<0.000000e+00> : vector<16xf32>
    %116 = vector.multi_reduction <add>, %115, %cst_38 [1] : vector<16x16xf32> to vector<16xf32>
    %117 = vector.shape_cast %116 : vector<16xf32> to vector<16x1xf32>
    %118 = tpu.reciprocal %117 {approx = true} : vector<16x1xf32> -> vector<16x1xf32>
    %119 = vector.broadcast %118 : vector<16x1xf32> to vector<16x16xf32>
    %120 = arith.mulf %115, %119 : vector<16x16xf32>
    %cst_39 = arith.constant dense<0.000000e+00> : vector<16x4xf32>
    %121 = tpu.matmul %120, %103, %cst_39 {dimension_numbers = #tpu.dot_dimension_numbers<[1], [0], [0], [1], [0, 0, 1, 1], [], []>} : vector<16x16xf32>, vector<16x4xf32>, vector<16x4xf32> -> vector<16x4xf32>
    %122 = vector.extract_strided_slice %98 {offsets = [0, 4], sizes = [16, 4], strides = [1, 1]} : vector<16x8xf32> to vector<16x4xf32>
    %123 = vector.extract_strided_slice %99 {offsets = [0, 4], sizes = [16, 4], strides = [1, 1]} : vector<16x8xf32> to vector<16x4xf32>
    %124 = vector.extract_strided_slice %100 {offsets = [0, 4], sizes = [16, 4], strides = [1, 1]} : vector<16x8xf32> to vector<16x4xf32>
    %cst_40 = arith.constant dense<0.000000e+00> : vector<16x16xf32>
    %125 = tpu.matmul %122, %123, %cst_40 {dimension_numbers = #tpu.dot_dimension_numbers<[1], [1], [0], [0], [0, 0, 1, 0], [], []>} : vector<16x4xf32>, vector<16x4xf32>, vector<16x16xf32> -> vector<16x16xf32>
    %cst_41 = arith.constant 5.000000e-01 : f32
    %126 = vector.broadcast %cst_41 : f32 to vector<16x16xf32>
    %127 = arith.mulf %125, %126 : vector<16x16xf32>
    %cst_42 = arith.constant -1.000000e+30 : f32
    %128 = vector.shape_cast %7 : vector<1x16xi1> to vector<1x16xi1>
    %129 = vector.broadcast %128 : vector<1x16xi1> to vector<16x16xi1>
    %130 = vector.broadcast %cst_42 : f32 to vector<16x16xf32>
    %131 = arith.select %129, %127, %130 : vector<16x16xi1>, vector<16x16xf32>
    %cst_43 = arith.constant dense<0xFF800000> : vector<16xf32>
    %132 = vector.multi_reduction <maximumf>, %131, %cst_43 [1] : vector<16x16xf32> to vector<16xf32>
    %133 = vector.shape_cast %132 : vector<16xf32> to vector<16x1xf32>
    %134 = vector.broadcast %133 : vector<16x1xf32> to vector<16x16xf32>
    %135 = arith.subf %131, %134 : vector<16x16xf32>
    %136 = math.exp %135 : vector<16x16xf32>
    %cst_44 = arith.constant dense<0.000000e+00> : vector<16xf32>
    %137 = vector.multi_reduction <add>, %136, %cst_44 [1] : vector<16x16xf32> to vector<16xf32>
    %138 = vector.shape_cast %137 : vector<16xf32> to vector<16x1xf32>
    %139 = tpu.reciprocal %138 {approx = true} : vector<16x1xf32> -> vector<16x1xf32>
    %140 = vector.broadcast %139 : vector<16x1xf32> to vector<16x16xf32>
    %141 = arith.mulf %136, %140 : vector<16x16xf32>
    %cst_45 = arith.constant dense<0.000000e+00> : vector<16x4xf32>
    %142 = tpu.matmul %141, %124, %cst_45 {dimension_numbers = #tpu.dot_dimension_numbers<[1], [0], [0], [1], [0, 0, 1, 1], [], []>} : vector<16x16xf32>, vector<16x4xf32>, vector<16x4xf32> -> vector<16x4xf32>
    %143 = tpu.concatenate %121, %142 in 1 : vector<16x4xf32>, vector<16x4xf32> -> vector<16x8xf32>
    %c16 = arith.constant 16 : index
    %c0_46 = arith.constant 0 : index
    %144 = vector.load %arg3[%c16, %c0_46] : memref<624x128xf32, #tpu.memory_space<vmem>>, vector<8x8xf32>
    %cst_47 = arith.constant dense<0.000000e+00> : vector<16x8xf32>
    %145 = tpu.matmul %143, %144, %cst_47 {dimension_numbers = #tpu.dot_dimension_numbers<[1], [0], [0], [1], [0, 0, 1, 1], [], []>} : vector<16x8xf32>, vector<8x8xf32>, vector<16x8xf32> -> vector<16x8xf32>
    %c24 = arith.constant 24 : index
    %c0_48 = arith.constant 0 : index
    %146 = vector.load %arg3[%c24, %c0_48] : memref<624x128xf32, #tpu.memory_space<vmem>>, vector<1x8xf32>
    %147 = vector.broadcast %146 : vector<1x8xf32> to vector<16x8xf32>
    %148 = arith.addf %145, %147 : vector<16x8xf32>
    %149 = arith.addf %78, %148 : vector<16x8xf32>
    %cst_49 = arith.constant dense<0.000000e+00> : vector<16xf32>
    %150 = vector.multi_reduction <add>, %149, %cst_49 [1] : vector<16x8xf32> to vector<16xf32>
    %151 = vector.shape_cast %150 : vector<16xf32> to vector<16x1xf32>
    %cst_50 = arith.constant 1.250000e-01 : f32
    %152 = vector.broadcast %cst_50 : f32 to vector<16x1xf32>
    %153 = arith.mulf %151, %152 : vector<16x1xf32>
    %154 = vector.broadcast %153 : vector<16x1xf32> to vector<16x8xf32>
    %155 = arith.subf %149, %154 : vector<16x8xf32>
    %156 = arith.mulf %155, %155 : vector<16x8xf32>
    %cst_51 = arith.constant dense<0.000000e+00> : vector<16xf32>
    %157 = vector.multi_reduction <add>, %156, %cst_51 [1] : vector<16x8xf32> to vector<16xf32>
    %158 = vector.shape_cast %157 : vector<16xf32> to vector<16x1xf32>
    %cst_52 = arith.constant 1.250000e-01 : f32
    %159 = vector.broadcast %cst_52 : f32 to vector<16x1xf32>
    %160 = arith.mulf %158, %159 : vector<16x1xf32>
    %cst_53 = arith.constant 9.99999974E-6 : f32
    %161 = vector.broadcast %cst_53 : f32 to vector<16x1xf32>
    %162 = arith.addf %160, %161 : vector<16x1xf32>
    %163 = math.rsqrt %162 : vector<16x1xf32>
    %164 = vector.broadcast %163 : vector<16x1xf32> to vector<16x8xf32>
    %165 = arith.mulf %155, %164 : vector<16x8xf32>
    %c201 = arith.constant 201 : index
    %c0_54 = arith.constant 0 : index
    %166 = vector.load %arg3[%c201, %c0_54] : memref<624x128xf32, #tpu.memory_space<vmem>>, vector<1x8xf32>
    %167 = vector.broadcast %166 : vector<1x8xf32> to vector<16x8xf32>
    %168 = arith.mulf %165, %167 : vector<16x8xf32>
    %c202 = arith.constant 202 : index
    %c0_55 = arith.constant 0 : index
    %169 = vector.load %arg3[%c202, %c0_55] : memref<624x128xf32, #tpu.memory_space<vmem>>, vector<1x8xf32>
    %170 = vector.broadcast %169 : vector<1x8xf32> to vector<16x8xf32>
    %171 = arith.addf %168, %170 : vector<16x8xf32>
    %c208 = arith.constant 208 : index
    %c0_56 = arith.constant 0 : index
    %172 = vector.load %arg3[%c208, %c0_56] : memref<624x128xf32, #tpu.memory_space<vmem>>, vector<8x32xf32>
    %cst_57 = arith.constant dense<0.000000e+00> : vector<16x32xf32>
    %173 = tpu.matmul %171, %172, %cst_57 {dimension_numbers = #tpu.dot_dimension_numbers<[1], [0], [0], [1], [0, 0, 1, 1], [], []>} : vector<16x8xf32>, vector<8x32xf32>, vector<16x32xf32> -> vector<16x32xf32>
    %c216 = arith.constant 216 : index
    %c0_58 = arith.constant 0 : index
    %174 = vector.load %arg3[%c216, %c0_58] : memref<624x128xf32, #tpu.memory_space<vmem>>, vector<1x32xf32>
    %175 = vector.broadcast %174 : vector<1x32xf32> to vector<16x32xf32>
    %176 = arith.addf %173, %175 : vector<16x32xf32>
    %cst_59 = arith.constant 0.000000e+00 : f32
    %177 = vector.broadcast %cst_59 : f32 to vector<16x32xf32>
    %178 = arith.maximumf %176, %177 : vector<16x32xf32>
    %c224 = arith.constant 224 : index
    %c0_60 = arith.constant 0 : index
    %179 = vector.load %arg3[%c224, %c0_60] : memref<624x128xf32, #tpu.memory_space<vmem>>, vector<32x8xf32>
    %cst_61 = arith.constant dense<0.000000e+00> : vector<16x8xf32>
    %180 = tpu.matmul %178, %179, %cst_61 {dimension_numbers = #tpu.dot_dimension_numbers<[1], [0], [0], [1], [0, 0, 1, 1], [], []>} : vector<16x32xf32>, vector<32x8xf32>, vector<16x8xf32> -> vector<16x8xf32>
    %c256 = arith.constant 256 : index
    %c0_62 = arith.constant 0 : index
    %181 = vector.load %arg3[%c256, %c0_62] : memref<624x128xf32, #tpu.memory_space<vmem>>, vector<1x8xf32>
    %182 = vector.broadcast %181 : vector<1x8xf32> to vector<16x8xf32>
    %183 = arith.addf %180, %182 : vector<16x8xf32>
    %184 = arith.addf %171, %183 : vector<16x8xf32>
    %cst_63 = arith.constant dense<0.000000e+00> : vector<16xf32>
    %185 = vector.multi_reduction <add>, %184, %cst_63 [1] : vector<16x8xf32> to vector<16xf32>
    %186 = vector.shape_cast %185 : vector<16xf32> to vector<16x1xf32>
    %cst_64 = arith.constant 1.250000e-01 : f32
    %187 = vector.broadcast %cst_64 : f32 to vector<16x1xf32>
    %188 = arith.mulf %186, %187 : vector<16x1xf32>
    %189 = vector.broadcast %188 : vector<16x1xf32> to vector<16x8xf32>
    %190 = arith.subf %184, %189 : vector<16x8xf32>
    %191 = arith.mulf %190, %190 : vector<16x8xf32>
    %cst_65 = arith.constant dense<0.000000e+00> : vector<16xf32>
    %192 = vector.multi_reduction <add>, %191, %cst_65 [1] : vector<16x8xf32> to vector<16xf32>
    %193 = vector.shape_cast %192 : vector<16xf32> to vector<16x1xf32>
    %cst_66 = arith.constant 1.250000e-01 : f32
    %194 = vector.broadcast %cst_66 : f32 to vector<16x1xf32>
    %195 = arith.mulf %193, %194 : vector<16x1xf32>
    %cst_67 = arith.constant 9.99999974E-6 : f32
    %196 = vector.broadcast %cst_67 : f32 to vector<16x1xf32>
    %197 = arith.addf %195, %196 : vector<16x1xf32>
    %198 = math.rsqrt %197 : vector<16x1xf32>
    %199 = vector.broadcast %198 : vector<16x1xf32> to vector<16x8xf32>
    %200 = arith.mulf %190, %199 : vector<16x8xf32>
    %c203 = arith.constant 203 : index
    %c0_68 = arith.constant 0 : index
    %201 = vector.load %arg3[%c203, %c0_68] : memref<624x128xf32, #tpu.memory_space<vmem>>, vector<1x8xf32>
    %202 = vector.broadcast %201 : vector<1x8xf32> to vector<16x8xf32>
    %203 = arith.mulf %200, %202 : vector<16x8xf32>
    %c204 = arith.constant 204 : index
    %c0_69 = arith.constant 0 : index
    %204 = vector.load %arg3[%c204, %c0_69] : memref<624x128xf32, #tpu.memory_space<vmem>>, vector<1x8xf32>
    %205 = vector.broadcast %204 : vector<1x8xf32> to vector<16x8xf32>
    %206 = arith.addf %203, %205 : vector<16x8xf32>
    %c32 = arith.constant 32 : index
    %c0_70 = arith.constant 0 : index
    %207 = vector.load %arg3[%c32, %c0_70] : memref<624x128xf32, #tpu.memory_space<vmem>>, vector<8x24xf32>
    %cst_71 = arith.constant dense<0.000000e+00> : vector<16x24xf32>
    %208 = tpu.matmul %206, %207, %cst_71 {dimension_numbers = #tpu.dot_dimension_numbers<[1], [0], [0], [1], [0, 0, 1, 1], [], []>} : vector<16x8xf32>, vector<8x24xf32>, vector<16x24xf32> -> vector<16x24xf32>
    %c40 = arith.constant 40 : index
    %c0_72 = arith.constant 0 : index
    %209 = vector.load %arg3[%c40, %c0_72] : memref<624x128xf32, #tpu.memory_space<vmem>>, vector<1x24xf32>
    %210 = vector.broadcast %209 : vector<1x24xf32> to vector<16x24xf32>
    %211 = arith.addf %208, %210 : vector<16x24xf32>
    %212 = vector.extract_strided_slice %211 {offsets = [0, 0], sizes = [16, 8], strides = [1, 1]} : vector<16x24xf32> to vector<16x8xf32>
    %213 = vector.extract_strided_slice %211 {offsets = [0, 8], sizes = [16, 8], strides = [1, 1]} : vector<16x24xf32> to vector<16x8xf32>
    %214 = vector.extract_strided_slice %211 {offsets = [0, 16], sizes = [16, 8], strides = [1, 1]} : vector<16x24xf32> to vector<16x8xf32>
    %215 = vector.extract_strided_slice %212 {offsets = [0, 0], sizes = [16, 4], strides = [1, 1]} : vector<16x8xf32> to vector<16x4xf32>
    %216 = vector.extract_strided_slice %213 {offsets = [0, 0], sizes = [16, 4], strides = [1, 1]} : vector<16x8xf32> to vector<16x4xf32>
    %217 = vector.extract_strided_slice %214 {offsets = [0, 0], sizes = [16, 4], strides = [1, 1]} : vector<16x8xf32> to vector<16x4xf32>
    %cst_73 = arith.constant dense<0.000000e+00> : vector<16x16xf32>
    %218 = tpu.matmul %215, %216, %cst_73 {dimension_numbers = #tpu.dot_dimension_numbers<[1], [1], [0], [0], [0, 0, 1, 0], [], []>} : vector<16x4xf32>, vector<16x4xf32>, vector<16x16xf32> -> vector<16x16xf32>
    %cst_74 = arith.constant 5.000000e-01 : f32
    %219 = vector.broadcast %cst_74 : f32 to vector<16x16xf32>
    %220 = arith.mulf %218, %219 : vector<16x16xf32>
    %cst_75 = arith.constant -1.000000e+30 : f32
    %221 = vector.shape_cast %7 : vector<1x16xi1> to vector<1x16xi1>
    %222 = vector.broadcast %221 : vector<1x16xi1> to vector<16x16xi1>
    %223 = vector.broadcast %cst_75 : f32 to vector<16x16xf32>
    %224 = arith.select %222, %220, %223 : vector<16x16xi1>, vector<16x16xf32>
    %cst_76 = arith.constant dense<0xFF800000> : vector<16xf32>
    %225 = vector.multi_reduction <maximumf>, %224, %cst_76 [1] : vector<16x16xf32> to vector<16xf32>
    %226 = vector.shape_cast %225 : vector<16xf32> to vector<16x1xf32>
    %227 = vector.broadcast %226 : vector<16x1xf32> to vector<16x16xf32>
    %228 = arith.subf %224, %227 : vector<16x16xf32>
    %229 = math.exp %228 : vector<16x16xf32>
    %cst_77 = arith.constant dense<0.000000e+00> : vector<16xf32>
    %230 = vector.multi_reduction <add>, %229, %cst_77 [1] : vector<16x16xf32> to vector<16xf32>
    %231 = vector.shape_cast %230 : vector<16xf32> to vector<16x1xf32>
    %232 = tpu.reciprocal %231 {approx = true} : vector<16x1xf32> -> vector<16x1xf32>
    %233 = vector.broadcast %232 : vector<16x1xf32> to vector<16x16xf32>
    %234 = arith.mulf %229, %233 : vector<16x16xf32>
    %cst_78 = arith.constant dense<0.000000e+00> : vector<16x4xf32>
    %235 = tpu.matmul %234, %217, %cst_78 {dimension_numbers = #tpu.dot_dimension_numbers<[1], [0], [0], [1], [0, 0, 1, 1], [], []>} : vector<16x16xf32>, vector<16x4xf32>, vector<16x4xf32> -> vector<16x4xf32>
    %236 = vector.extract_strided_slice %212 {offsets = [0, 4], sizes = [16, 4], strides = [1, 1]} : vector<16x8xf32> to vector<16x4xf32>
    %237 = vector.extract_strided_slice %213 {offsets = [0, 4], sizes = [16, 4], strides = [1, 1]} : vector<16x8xf32> to vector<16x4xf32>
    %238 = vector.extract_strided_slice %214 {offsets = [0, 4], sizes = [16, 4], strides = [1, 1]} : vector<16x8xf32> to vector<16x4xf32>
    %cst_79 = arith.constant dense<0.000000e+00> : vector<16x16xf32>
    %239 = tpu.matmul %236, %237, %cst_79 {dimension_numbers = #tpu.dot_dimension_numbers<[1], [1], [0], [0], [0, 0, 1, 0], [], []>} : vector<16x4xf32>, vector<16x4xf32>, vector<16x16xf32> -> vector<16x16xf32>
    %cst_80 = arith.constant 5.000000e-01 : f32
    %240 = vector.broadcast %cst_80 : f32 to vector<16x16xf32>
    %241 = arith.mulf %239, %240 : vector<16x16xf32>
    %cst_81 = arith.constant -1.000000e+30 : f32
    %242 = vector.shape_cast %7 : vector<1x16xi1> to vector<1x16xi1>
    %243 = vector.broadcast %242 : vector<1x16xi1> to vector<16x16xi1>
    %244 = vector.broadcast %cst_81 : f32 to vector<16x16xf32>
    %245 = arith.select %243, %241, %244 : vector<16x16xi1>, vector<16x16xf32>
    %cst_82 = arith.constant dense<0xFF800000> : vector<16xf32>
    %246 = vector.multi_reduction <maximumf>, %245, %cst_82 [1] : vector<16x16xf32> to vector<16xf32>
    %247 = vector.shape_cast %246 : vector<16xf32> to vector<16x1xf32>
    %248 = vector.broadcast %247 : vector<16x1xf32> to vector<16x16xf32>
    %249 = arith.subf %245, %248 : vector<16x16xf32>
    %250 = math.exp %249 : vector<16x16xf32>
    %cst_83 = arith.constant dense<0.000000e+00> : vector<16xf32>
    %251 = vector.multi_reduction <add>, %250, %cst_83 [1] : vector<16x16xf32> to vector<16xf32>
    %252 = vector.shape_cast %251 : vector<16xf32> to vector<16x1xf32>
    %253 = tpu.reciprocal %252 {approx = true} : vector<16x1xf32> -> vector<16x1xf32>
    %254 = vector.broadcast %253 : vector<16x1xf32> to vector<16x16xf32>
    %255 = arith.mulf %250, %254 : vector<16x16xf32>
    %cst_84 = arith.constant dense<0.000000e+00> : vector<16x4xf32>
    %256 = tpu.matmul %255, %238, %cst_84 {dimension_numbers = #tpu.dot_dimension_numbers<[1], [0], [0], [1], [0, 0, 1, 1], [], []>} : vector<16x16xf32>, vector<16x4xf32>, vector<16x4xf32> -> vector<16x4xf32>
    %257 = tpu.concatenate %235, %256 in 1 : vector<16x4xf32>, vector<16x4xf32> -> vector<16x8xf32>
    %c48 = arith.constant 48 : index
    %c0_85 = arith.constant 0 : index
    %258 = vector.load %arg3[%c48, %c0_85] : memref<624x128xf32, #tpu.memory_space<vmem>>, vector<8x8xf32>
    %cst_86 = arith.constant dense<0.000000e+00> : vector<16x8xf32>
    %259 = tpu.matmul %257, %258, %cst_86 {dimension_numbers = #tpu.dot_dimension_numbers<[1], [0], [0], [1], [0, 0, 1, 1], [], []>} : vector<16x8xf32>, vector<8x8xf32>, vector<16x8xf32> -> vector<16x8xf32>
    %c56 = arith.constant 56 : index
    %c0_87 = arith.constant 0 : index
    %260 = vector.load %arg3[%c56, %c0_87] : memref<624x128xf32, #tpu.memory_space<vmem>>, vector<1x8xf32>
    %261 = vector.broadcast %260 : vector<1x8xf32> to vector<16x8xf32>
    %262 = arith.addf %259, %261 : vector<16x8xf32>
    %263 = arith.addf %206, %262 : vector<16x8xf32>
    %cst_88 = arith.constant dense<0.000000e+00> : vector<16xf32>
    %264 = vector.multi_reduction <add>, %263, %cst_88 [1] : vector<16x8xf32> to vector<16xf32>
    %265 = vector.shape_cast %264 : vector<16xf32> to vector<16x1xf32>
    %cst_89 = arith.constant 1.250000e-01 : f32
    %266 = vector.broadcast %cst_89 : f32 to vector<16x1xf32>
    %267 = arith.mulf %265, %266 : vector<16x1xf32>
    %268 = vector.broadcast %267 : vector<16x1xf32> to vector<16x8xf32>
    %269 = arith.subf %263, %268 : vector<16x8xf32>
    %270 = arith.mulf %269, %269 : vector<16x8xf32>
    %cst_90 = arith.constant dense<0.000000e+00> : vector<16xf32>
    %271 = vector.multi_reduction <add>, %270, %cst_90 [1] : vector<16x8xf32> to vector<16xf32>
    %272 = vector.shape_cast %271 : vector<16xf32> to vector<16x1xf32>
    %cst_91 = arith.constant 1.250000e-01 : f32
    %273 = vector.broadcast %cst_91 : f32 to vector<16x1xf32>
    %274 = arith.mulf %272, %273 : vector<16x1xf32>
    %cst_92 = arith.constant 9.99999974E-6 : f32
    %275 = vector.broadcast %cst_92 : f32 to vector<16x1xf32>
    %276 = arith.addf %274, %275 : vector<16x1xf32>
    %277 = math.rsqrt %276 : vector<16x1xf32>
    %278 = vector.broadcast %277 : vector<16x1xf32> to vector<16x8xf32>
    %279 = arith.mulf %269, %278 : vector<16x8xf32>
    %c257 = arith.constant 257 : index
    %c0_93 = arith.constant 0 : index
    %280 = vector.load %arg3[%c257, %c0_93] : memref<624x128xf32, #tpu.memory_space<vmem>>, vector<1x8xf32>
    %281 = vector.broadcast %280 : vector<1x8xf32> to vector<16x8xf32>
    %282 = arith.mulf %279, %281 : vector<16x8xf32>
    %c258 = arith.constant 258 : index
    %c0_94 = arith.constant 0 : index
    %283 = vector.load %arg3[%c258, %c0_94] : memref<624x128xf32, #tpu.memory_space<vmem>>, vector<1x8xf32>
    %284 = vector.broadcast %283 : vector<1x8xf32> to vector<16x8xf32>
    %285 = arith.addf %282, %284 : vector<16x8xf32>
    %c264 = arith.constant 264 : index
    %c0_95 = arith.constant 0 : index
    %286 = vector.load %arg3[%c264, %c0_95] : memref<624x128xf32, #tpu.memory_space<vmem>>, vector<8x32xf32>
    %cst_96 = arith.constant dense<0.000000e+00> : vector<16x32xf32>
    %287 = tpu.matmul %285, %286, %cst_96 {dimension_numbers = #tpu.dot_dimension_numbers<[1], [0], [0], [1], [0, 0, 1, 1], [], []>} : vector<16x8xf32>, vector<8x32xf32>, vector<16x32xf32> -> vector<16x32xf32>
    %c272 = arith.constant 272 : index
    %c0_97 = arith.constant 0 : index
    %288 = vector.load %arg3[%c272, %c0_97] : memref<624x128xf32, #tpu.memory_space<vmem>>, vector<1x32xf32>
    %289 = vector.broadcast %288 : vector<1x32xf32> to vector<16x32xf32>
    %290 = arith.addf %287, %289 : vector<16x32xf32>
    %cst_98 = arith.constant 0.000000e+00 : f32
    %291 = vector.broadcast %cst_98 : f32 to vector<16x32xf32>
    %292 = arith.maximumf %290, %291 : vector<16x32xf32>
    %c280 = arith.constant 280 : index
    %c0_99 = arith.constant 0 : index
    %293 = vector.load %arg3[%c280, %c0_99] : memref<624x128xf32, #tpu.memory_space<vmem>>, vector<32x8xf32>
    %cst_100 = arith.constant dense<0.000000e+00> : vector<16x8xf32>
    %294 = tpu.matmul %292, %293, %cst_100 {dimension_numbers = #tpu.dot_dimension_numbers<[1], [0], [0], [1], [0, 0, 1, 1], [], []>} : vector<16x32xf32>, vector<32x8xf32>, vector<16x8xf32> -> vector<16x8xf32>
    %c312 = arith.constant 312 : index
    %c0_101 = arith.constant 0 : index
    %295 = vector.load %arg3[%c312, %c0_101] : memref<624x128xf32, #tpu.memory_space<vmem>>, vector<1x8xf32>
    %296 = vector.broadcast %295 : vector<1x8xf32> to vector<16x8xf32>
    %297 = arith.addf %294, %296 : vector<16x8xf32>
    %298 = arith.addf %285, %297 : vector<16x8xf32>
    %cst_102 = arith.constant dense<0.000000e+00> : vector<16xf32>
    %299 = vector.multi_reduction <add>, %298, %cst_102 [1] : vector<16x8xf32> to vector<16xf32>
    %300 = vector.shape_cast %299 : vector<16xf32> to vector<16x1xf32>
    %cst_103 = arith.constant 1.250000e-01 : f32
    %301 = vector.broadcast %cst_103 : f32 to vector<16x1xf32>
    %302 = arith.mulf %300, %301 : vector<16x1xf32>
    %303 = vector.broadcast %302 : vector<16x1xf32> to vector<16x8xf32>
    %304 = arith.subf %298, %303 : vector<16x8xf32>
    %305 = arith.mulf %304, %304 : vector<16x8xf32>
    %cst_104 = arith.constant dense<0.000000e+00> : vector<16xf32>
    %306 = vector.multi_reduction <add>, %305, %cst_104 [1] : vector<16x8xf32> to vector<16xf32>
    %307 = vector.shape_cast %306 : vector<16xf32> to vector<16x1xf32>
    %cst_105 = arith.constant 1.250000e-01 : f32
    %308 = vector.broadcast %cst_105 : f32 to vector<16x1xf32>
    %309 = arith.mulf %307, %308 : vector<16x1xf32>
    %cst_106 = arith.constant 9.99999974E-6 : f32
    %310 = vector.broadcast %cst_106 : f32 to vector<16x1xf32>
    %311 = arith.addf %309, %310 : vector<16x1xf32>
    %312 = math.rsqrt %311 : vector<16x1xf32>
    %313 = vector.broadcast %312 : vector<16x1xf32> to vector<16x8xf32>
    %314 = arith.mulf %304, %313 : vector<16x8xf32>
    %c259 = arith.constant 259 : index
    %c0_107 = arith.constant 0 : index
    %315 = vector.load %arg3[%c259, %c0_107] : memref<624x128xf32, #tpu.memory_space<vmem>>, vector<1x8xf32>
    %316 = vector.broadcast %315 : vector<1x8xf32> to vector<16x8xf32>
    %317 = arith.mulf %314, %316 : vector<16x8xf32>
    %c260 = arith.constant 260 : index
    %c0_108 = arith.constant 0 : index
    %318 = vector.load %arg3[%c260, %c0_108] : memref<624x128xf32, #tpu.memory_space<vmem>>, vector<1x8xf32>
    %319 = vector.broadcast %318 : vector<1x8xf32> to vector<16x8xf32>
    %320 = arith.addf %317, %319 : vector<16x8xf32>
    %c192 = arith.constant 192 : index
    %c0_109 = arith.constant 0 : index
    %321 = vector.load %arg3[%c192, %c0_109] : memref<624x128xf32, #tpu.memory_space<vmem>>, vector<8x32xf32>
    %cst_110 = arith.constant dense<0.000000e+00> : vector<16x32xf32>
    %322 = tpu.matmul %320, %321, %cst_110 {dimension_numbers = #tpu.dot_dimension_numbers<[1], [0], [0], [1], [0, 0, 1, 1], [], []>} : vector<16x8xf32>, vector<8x32xf32>, vector<16x32xf32> -> vector<16x32xf32>
    %c200 = arith.constant 200 : index
    %c0_111 = arith.constant 0 : index
    %323 = vector.load %arg3[%c200, %c0_111] : memref<624x128xf32, #tpu.memory_space<vmem>>, vector<1x32xf32>
    %324 = vector.broadcast %323 : vector<1x32xf32> to vector<16x32xf32>
    %325 = arith.addf %322, %324 : vector<16x32xf32>
    %c64 = arith.constant 64 : index
    %c0_112 = arith.constant 0 : index
    %326 = vector.load %arg3[%c64, %c0_112] : memref<624x128xf32, #tpu.memory_space<vmem>>, vector<8x24xf32>
    %cst_113 = arith.constant dense<0.000000e+00> : vector<16x24xf32>
    %327 = tpu.matmul %92, %326, %cst_113 {dimension_numbers = #tpu.dot_dimension_numbers<[1], [0], [0], [1], [0, 0, 1, 1], [], []>} : vector<16x8xf32>, vector<8x24xf32>, vector<16x24xf32> -> vector<16x24xf32>
    %c72 = arith.constant 72 : index
    %c0_114 = arith.constant 0 : index
    %328 = vector.load %arg3[%c72, %c0_114] : memref<624x128xf32, #tpu.memory_space<vmem>>, vector<1x24xf32>
    %329 = vector.broadcast %328 : vector<1x24xf32> to vector<16x24xf32>
    %330 = arith.addf %327, %329 : vector<16x24xf32>
    %331 = vector.extract_strided_slice %330 {offsets = [0, 0], sizes = [16, 8], strides = [1, 1]} : vector<16x24xf32> to vector<16x8xf32>
    %332 = vector.extract_strided_slice %330 {offsets = [0, 8], sizes = [16, 8], strides = [1, 1]} : vector<16x24xf32> to vector<16x8xf32>
    %333 = vector.extract_strided_slice %330 {offsets = [0, 16], sizes = [16, 8], strides = [1, 1]} : vector<16x24xf32> to vector<16x8xf32>
    %334 = vector.extract_strided_slice %331 {offsets = [0, 0], sizes = [16, 4], strides = [1, 1]} : vector<16x8xf32> to vector<16x4xf32>
    %335 = vector.extract_strided_slice %332 {offsets = [0, 0], sizes = [16, 4], strides = [1, 1]} : vector<16x8xf32> to vector<16x4xf32>
    %336 = vector.extract_strided_slice %333 {offsets = [0, 0], sizes = [16, 4], strides = [1, 1]} : vector<16x8xf32> to vector<16x4xf32>
    %cst_115 = arith.constant dense<0.000000e+00> : vector<16x16xf32>
    %337 = tpu.matmul %334, %335, %cst_115 {dimension_numbers = #tpu.dot_dimension_numbers<[1], [1], [0], [0], [0, 0, 1, 0], [], []>} : vector<16x4xf32>, vector<16x4xf32>, vector<16x16xf32> -> vector<16x16xf32>
    %cst_116 = arith.constant 5.000000e-01 : f32
    %338 = vector.broadcast %cst_116 : f32 to vector<16x16xf32>
    %339 = arith.mulf %337, %338 : vector<16x16xf32>
    %cst_117 = arith.constant -1.000000e+30 : f32
    %340 = vector.shape_cast %7 : vector<1x16xi1> to vector<1x16xi1>
    %341 = vector.broadcast %340 : vector<1x16xi1> to vector<16x16xi1>
    %342 = vector.broadcast %cst_117 : f32 to vector<16x16xf32>
    %343 = arith.select %341, %339, %342 : vector<16x16xi1>, vector<16x16xf32>
    %cst_118 = arith.constant dense<0xFF800000> : vector<16xf32>
    %344 = vector.multi_reduction <maximumf>, %343, %cst_118 [1] : vector<16x16xf32> to vector<16xf32>
    %345 = vector.shape_cast %344 : vector<16xf32> to vector<16x1xf32>
    %346 = vector.broadcast %345 : vector<16x1xf32> to vector<16x16xf32>
    %347 = arith.subf %343, %346 : vector<16x16xf32>
    %348 = math.exp %347 : vector<16x16xf32>
    %cst_119 = arith.constant dense<0.000000e+00> : vector<16xf32>
    %349 = vector.multi_reduction <add>, %348, %cst_119 [1] : vector<16x16xf32> to vector<16xf32>
    %350 = vector.shape_cast %349 : vector<16xf32> to vector<16x1xf32>
    %351 = tpu.reciprocal %350 {approx = true} : vector<16x1xf32> -> vector<16x1xf32>
    %352 = vector.broadcast %351 : vector<16x1xf32> to vector<16x16xf32>
    %353 = arith.mulf %348, %352 : vector<16x16xf32>
    %cst_120 = arith.constant dense<0.000000e+00> : vector<16x4xf32>
    %354 = tpu.matmul %353, %336, %cst_120 {dimension_numbers = #tpu.dot_dimension_numbers<[1], [0], [0], [1], [0, 0, 1, 1], [], []>} : vector<16x16xf32>, vector<16x4xf32>, vector<16x4xf32> -> vector<16x4xf32>
    %355 = vector.extract_strided_slice %331 {offsets = [0, 4], sizes = [16, 4], strides = [1, 1]} : vector<16x8xf32> to vector<16x4xf32>
    %356 = vector.extract_strided_slice %332 {offsets = [0, 4], sizes = [16, 4], strides = [1, 1]} : vector<16x8xf32> to vector<16x4xf32>
    %357 = vector.extract_strided_slice %333 {offsets = [0, 4], sizes = [16, 4], strides = [1, 1]} : vector<16x8xf32> to vector<16x4xf32>
    %cst_121 = arith.constant dense<0.000000e+00> : vector<16x16xf32>
    %358 = tpu.matmul %355, %356, %cst_121 {dimension_numbers = #tpu.dot_dimension_numbers<[1], [1], [0], [0], [0, 0, 1, 0], [], []>} : vector<16x4xf32>, vector<16x4xf32>, vector<16x16xf32> -> vector<16x16xf32>
    %cst_122 = arith.constant 5.000000e-01 : f32
    %359 = vector.broadcast %cst_122 : f32 to vector<16x16xf32>
    %360 = arith.mulf %358, %359 : vector<16x16xf32>
    %cst_123 = arith.constant -1.000000e+30 : f32
    %361 = vector.shape_cast %7 : vector<1x16xi1> to vector<1x16xi1>
    %362 = vector.broadcast %361 : vector<1x16xi1> to vector<16x16xi1>
    %363 = vector.broadcast %cst_123 : f32 to vector<16x16xf32>
    %364 = arith.select %362, %360, %363 : vector<16x16xi1>, vector<16x16xf32>
    %cst_124 = arith.constant dense<0xFF800000> : vector<16xf32>
    %365 = vector.multi_reduction <maximumf>, %364, %cst_124 [1] : vector<16x16xf32> to vector<16xf32>
    %366 = vector.shape_cast %365 : vector<16xf32> to vector<16x1xf32>
    %367 = vector.broadcast %366 : vector<16x1xf32> to vector<16x16xf32>
    %368 = arith.subf %364, %367 : vector<16x16xf32>
    %369 = math.exp %368 : vector<16x16xf32>
    %cst_125 = arith.constant dense<0.000000e+00> : vector<16xf32>
    %370 = vector.multi_reduction <add>, %369, %cst_125 [1] : vector<16x16xf32> to vector<16xf32>
    %371 = vector.shape_cast %370 : vector<16xf32> to vector<16x1xf32>
    %372 = tpu.reciprocal %371 {approx = true} : vector<16x1xf32> -> vector<16x1xf32>
    %373 = vector.broadcast %372 : vector<16x1xf32> to vector<16x16xf32>
    %374 = arith.mulf %369, %373 : vector<16x16xf32>
    %cst_126 = arith.constant dense<0.000000e+00> : vector<16x4xf32>
    %375 = tpu.matmul %374, %357, %cst_126 {dimension_numbers = #tpu.dot_dimension_numbers<[1], [0], [0], [1], [0, 0, 1, 1], [], []>} : vector<16x16xf32>, vector<16x4xf32>, vector<16x4xf32> -> vector<16x4xf32>
    %376 = tpu.concatenate %354, %375 in 1 : vector<16x4xf32>, vector<16x4xf32> -> vector<16x8xf32>
    %c80 = arith.constant 80 : index
    %c0_127 = arith.constant 0 : index
    %377 = vector.load %arg3[%c80, %c0_127] : memref<624x128xf32, #tpu.memory_space<vmem>>, vector<8x8xf32>
    %cst_128 = arith.constant dense<0.000000e+00> : vector<16x8xf32>
    %378 = tpu.matmul %376, %377, %cst_128 {dimension_numbers = #tpu.dot_dimension_numbers<[1], [0], [0], [1], [0, 0, 1, 1], [], []>} : vector<16x8xf32>, vector<8x8xf32>, vector<16x8xf32> -> vector<16x8xf32>
    %c88 = arith.constant 88 : index
    %c0_129 = arith.constant 0 : index
    %379 = vector.load %arg3[%c88, %c0_129] : memref<624x128xf32, #tpu.memory_space<vmem>>, vector<1x8xf32>
    %380 = vector.broadcast %379 : vector<1x8xf32> to vector<16x8xf32>
    %381 = arith.addf %378, %380 : vector<16x8xf32>
    %382 = arith.addf %92, %381 : vector<16x8xf32>
    %cst_130 = arith.constant dense<0.000000e+00> : vector<16xf32>
    %383 = vector.multi_reduction <add>, %382, %cst_130 [1] : vector<16x8xf32> to vector<16xf32>
    %384 = vector.shape_cast %383 : vector<16xf32> to vector<16x1xf32>
    %cst_131 = arith.constant 1.250000e-01 : f32
    %385 = vector.broadcast %cst_131 : f32 to vector<16x1xf32>
    %386 = arith.mulf %384, %385 : vector<16x1xf32>
    %387 = vector.broadcast %386 : vector<16x1xf32> to vector<16x8xf32>
    %388 = arith.subf %382, %387 : vector<16x8xf32>
    %389 = arith.mulf %388, %388 : vector<16x8xf32>
    %cst_132 = arith.constant dense<0.000000e+00> : vector<16xf32>
    %390 = vector.multi_reduction <add>, %389, %cst_132 [1] : vector<16x8xf32> to vector<16xf32>
    %391 = vector.shape_cast %390 : vector<16xf32> to vector<16x1xf32>
    %cst_133 = arith.constant 1.250000e-01 : f32
    %392 = vector.broadcast %cst_133 : f32 to vector<16x1xf32>
    %393 = arith.mulf %391, %392 : vector<16x1xf32>
    %cst_134 = arith.constant 9.99999974E-6 : f32
    %394 = vector.broadcast %cst_134 : f32 to vector<16x1xf32>
    %395 = arith.addf %393, %394 : vector<16x1xf32>
    %396 = math.rsqrt %395 : vector<16x1xf32>
    %397 = vector.broadcast %396 : vector<16x1xf32> to vector<16x8xf32>
    %398 = arith.mulf %388, %397 : vector<16x8xf32>
    %c313 = arith.constant 313 : index
    %c0_135 = arith.constant 0 : index
    %399 = vector.load %arg3[%c313, %c0_135] : memref<624x128xf32, #tpu.memory_space<vmem>>, vector<1x8xf32>
    %400 = vector.broadcast %399 : vector<1x8xf32> to vector<16x8xf32>
    %401 = arith.mulf %398, %400 : vector<16x8xf32>
    %c314 = arith.constant 314 : index
    %c0_136 = arith.constant 0 : index
    %402 = vector.load %arg3[%c314, %c0_136] : memref<624x128xf32, #tpu.memory_space<vmem>>, vector<1x8xf32>
    %403 = vector.broadcast %402 : vector<1x8xf32> to vector<16x8xf32>
    %404 = arith.addf %401, %403 : vector<16x8xf32>
    %c128 = arith.constant 128 : index
    %c0_137 = arith.constant 0 : index
    %405 = vector.load %arg3[%c128, %c0_137] : memref<624x128xf32, #tpu.memory_space<vmem>>, vector<8x8xf32>
    %cst_138 = arith.constant dense<0.000000e+00> : vector<16x8xf32>
    %406 = tpu.matmul %404, %405, %cst_138 {dimension_numbers = #tpu.dot_dimension_numbers<[1], [0], [0], [1], [0, 0, 1, 1], [], []>} : vector<16x8xf32>, vector<8x8xf32>, vector<16x8xf32> -> vector<16x8xf32>
    %c136 = arith.constant 136 : index
    %c0_139 = arith.constant 0 : index
    %407 = vector.load %arg3[%c136, %c0_139] : memref<624x128xf32, #tpu.memory_space<vmem>>, vector<1x8xf32>
    %408 = vector.broadcast %407 : vector<1x8xf32> to vector<16x8xf32>
    %409 = arith.addf %406, %408 : vector<16x8xf32>
    %410 = vector.extract_strided_slice %325 {offsets = [0, 0], sizes = [16, 8], strides = [1, 1]} : vector<16x32xf32> to vector<16x8xf32>
    %411 = vector.extract_strided_slice %325 {offsets = [0, 8], sizes = [16, 8], strides = [1, 1]} : vector<16x32xf32> to vector<16x8xf32>
    %412 = vector.extract_strided_slice %409 {offsets = [0, 0], sizes = [16, 4], strides = [1, 1]} : vector<16x8xf32> to vector<16x4xf32>
    %413 = vector.extract_strided_slice %410 {offsets = [0, 0], sizes = [16, 4], strides = [1, 1]} : vector<16x8xf32> to vector<16x4xf32>
    %414 = vector.extract_strided_slice %411 {offsets = [0, 0], sizes = [16, 4], strides = [1, 1]} : vector<16x8xf32> to vector<16x4xf32>
    %cst_140 = arith.constant dense<0.000000e+00> : vector<16x16xf32>
    %415 = tpu.matmul %412, %413, %cst_140 {dimension_numbers = #tpu.dot_dimension_numbers<[1], [1], [0], [0], [0, 0, 1, 0], [], []>} : vector<16x4xf32>, vector<16x4xf32>, vector<16x16xf32> -> vector<16x16xf32>
    %cst_141 = arith.constant 5.000000e-01 : f32
    %416 = vector.broadcast %cst_141 : f32 to vector<16x16xf32>
    %417 = arith.mulf %415, %416 : vector<16x16xf32>
    %cst_142 = arith.constant -1.000000e+30 : f32
    %418 = vector.shape_cast %7 : vector<1x16xi1> to vector<1x16xi1>
    %419 = vector.broadcast %418 : vector<1x16xi1> to vector<16x16xi1>
    %420 = vector.broadcast %cst_142 : f32 to vector<16x16xf32>
    %421 = arith.select %419, %417, %420 : vector<16x16xi1>, vector<16x16xf32>
    %cst_143 = arith.constant dense<0xFF800000> : vector<16xf32>
    %422 = vector.multi_reduction <maximumf>, %421, %cst_143 [1] : vector<16x16xf32> to vector<16xf32>
    %423 = vector.shape_cast %422 : vector<16xf32> to vector<16x1xf32>
    %424 = vector.broadcast %423 : vector<16x1xf32> to vector<16x16xf32>
    %425 = arith.subf %421, %424 : vector<16x16xf32>
    %426 = math.exp %425 : vector<16x16xf32>
    %cst_144 = arith.constant dense<0.000000e+00> : vector<16xf32>
    %427 = vector.multi_reduction <add>, %426, %cst_144 [1] : vector<16x16xf32> to vector<16xf32>
    %428 = vector.shape_cast %427 : vector<16xf32> to vector<16x1xf32>
    %429 = tpu.reciprocal %428 {approx = true} : vector<16x1xf32> -> vector<16x1xf32>
    %430 = vector.broadcast %429 : vector<16x1xf32> to vector<16x16xf32>
    %431 = arith.mulf %426, %430 : vector<16x16xf32>
    %cst_145 = arith.constant dense<0.000000e+00> : vector<16x4xf32>
    %432 = tpu.matmul %431, %414, %cst_145 {dimension_numbers = #tpu.dot_dimension_numbers<[1], [0], [0], [1], [0, 0, 1, 1], [], []>} : vector<16x16xf32>, vector<16x4xf32>, vector<16x4xf32> -> vector<16x4xf32>
    %433 = vector.extract_strided_slice %409 {offsets = [0, 4], sizes = [16, 4], strides = [1, 1]} : vector<16x8xf32> to vector<16x4xf32>
    %434 = vector.extract_strided_slice %410 {offsets = [0, 4], sizes = [16, 4], strides = [1, 1]} : vector<16x8xf32> to vector<16x4xf32>
    %435 = vector.extract_strided_slice %411 {offsets = [0, 4], sizes = [16, 4], strides = [1, 1]} : vector<16x8xf32> to vector<16x4xf32>
    %cst_146 = arith.constant dense<0.000000e+00> : vector<16x16xf32>
    %436 = tpu.matmul %433, %434, %cst_146 {dimension_numbers = #tpu.dot_dimension_numbers<[1], [1], [0], [0], [0, 0, 1, 0], [], []>} : vector<16x4xf32>, vector<16x4xf32>, vector<16x16xf32> -> vector<16x16xf32>
    %cst_147 = arith.constant 5.000000e-01 : f32
    %437 = vector.broadcast %cst_147 : f32 to vector<16x16xf32>
    %438 = arith.mulf %436, %437 : vector<16x16xf32>
    %cst_148 = arith.constant -1.000000e+30 : f32
    %439 = vector.shape_cast %7 : vector<1x16xi1> to vector<1x16xi1>
    %440 = vector.broadcast %439 : vector<1x16xi1> to vector<16x16xi1>
    %441 = vector.broadcast %cst_148 : f32 to vector<16x16xf32>
    %442 = arith.select %440, %438, %441 : vector<16x16xi1>, vector<16x16xf32>
    %cst_149 = arith.constant dense<0xFF800000> : vector<16xf32>
    %443 = vector.multi_reduction <maximumf>, %442, %cst_149 [1] : vector<16x16xf32> to vector<16xf32>
    %444 = vector.shape_cast %443 : vector<16xf32> to vector<16x1xf32>
    %445 = vector.broadcast %444 : vector<16x1xf32> to vector<16x16xf32>
    %446 = arith.subf %442, %445 : vector<16x16xf32>
    %447 = math.exp %446 : vector<16x16xf32>
    %cst_150 = arith.constant dense<0.000000e+00> : vector<16xf32>
    %448 = vector.multi_reduction <add>, %447, %cst_150 [1] : vector<16x16xf32> to vector<16xf32>
    %449 = vector.shape_cast %448 : vector<16xf32> to vector<16x1xf32>
    %450 = tpu.reciprocal %449 {approx = true} : vector<16x1xf32> -> vector<16x1xf32>
    %451 = vector.broadcast %450 : vector<16x1xf32> to vector<16x16xf32>
    %452 = arith.mulf %447, %451 : vector<16x16xf32>
    %cst_151 = arith.constant dense<0.000000e+00> : vector<16x4xf32>
    %453 = tpu.matmul %452, %435, %cst_151 {dimension_numbers = #tpu.dot_dimension_numbers<[1], [0], [0], [1], [0, 0, 1, 1], [], []>} : vector<16x16xf32>, vector<16x4xf32>, vector<16x4xf32> -> vector<16x4xf32>
    %454 = tpu.concatenate %432, %453 in 1 : vector<16x4xf32>, vector<16x4xf32> -> vector<16x8xf32>
    %c144 = arith.constant 144 : index
    %c0_152 = arith.constant 0 : index
    %455 = vector.load %arg3[%c144, %c0_152] : memref<624x128xf32, #tpu.memory_space<vmem>>, vector<8x8xf32>
    %cst_153 = arith.constant dense<0.000000e+00> : vector<16x8xf32>
    %456 = tpu.matmul %454, %455, %cst_153 {dimension_numbers = #tpu.dot_dimension_numbers<[1], [0], [0], [1], [0, 0, 1, 1], [], []>} : vector<16x8xf32>, vector<8x8xf32>, vector<16x8xf32> -> vector<16x8xf32>
    %c152 = arith.constant 152 : index
    %c0_154 = arith.constant 0 : index
    %457 = vector.load %arg3[%c152, %c0_154] : memref<624x128xf32, #tpu.memory_space<vmem>>, vector<1x8xf32>
    %458 = vector.broadcast %457 : vector<1x8xf32> to vector<16x8xf32>
    %459 = arith.addf %456, %458 : vector<16x8xf32>
    %460 = arith.addf %404, %459 : vector<16x8xf32>
    %cst_155 = arith.constant dense<0.000000e+00> : vector<16xf32>
    %461 = vector.multi_reduction <add>, %460, %cst_155 [1] : vector<16x8xf32> to vector<16xf32>
    %462 = vector.shape_cast %461 : vector<16xf32> to vector<16x1xf32>
    %cst_156 = arith.constant 1.250000e-01 : f32
    %463 = vector.broadcast %cst_156 : f32 to vector<16x1xf32>
    %464 = arith.mulf %462, %463 : vector<16x1xf32>
    %465 = vector.broadcast %464 : vector<16x1xf32> to vector<16x8xf32>
    %466 = arith.subf %460, %465 : vector<16x8xf32>
    %467 = arith.mulf %466, %466 : vector<16x8xf32>
    %cst_157 = arith.constant dense<0.000000e+00> : vector<16xf32>
    %468 = vector.multi_reduction <add>, %467, %cst_157 [1] : vector<16x8xf32> to vector<16xf32>
    %469 = vector.shape_cast %468 : vector<16xf32> to vector<16x1xf32>
    %cst_158 = arith.constant 1.250000e-01 : f32
    %470 = vector.broadcast %cst_158 : f32 to vector<16x1xf32>
    %471 = arith.mulf %469, %470 : vector<16x1xf32>
    %cst_159 = arith.constant 9.99999974E-6 : f32
    %472 = vector.broadcast %cst_159 : f32 to vector<16x1xf32>
    %473 = arith.addf %471, %472 : vector<16x1xf32>
    %474 = math.rsqrt %473 : vector<16x1xf32>
    %475 = vector.broadcast %474 : vector<16x1xf32> to vector<16x8xf32>
    %476 = arith.mulf %466, %475 : vector<16x8xf32>
    %c315 = arith.constant 315 : index
    %c0_160 = arith.constant 0 : index
    %477 = vector.load %arg3[%c315, %c0_160] : memref<624x128xf32, #tpu.memory_space<vmem>>, vector<1x8xf32>
    %478 = vector.broadcast %477 : vector<1x8xf32> to vector<16x8xf32>
    %479 = arith.mulf %476, %478 : vector<16x8xf32>
    %c316 = arith.constant 316 : index
    %c0_161 = arith.constant 0 : index
    %480 = vector.load %arg3[%c316, %c0_161] : memref<624x128xf32, #tpu.memory_space<vmem>>, vector<1x8xf32>
    %481 = vector.broadcast %480 : vector<1x8xf32> to vector<16x8xf32>
    %482 = arith.addf %479, %481 : vector<16x8xf32>
    %c320 = arith.constant 320 : index
    %c0_162 = arith.constant 0 : index
    %483 = vector.load %arg3[%c320, %c0_162] : memref<624x128xf32, #tpu.memory_space<vmem>>, vector<8x32xf32>
    %cst_163 = arith.constant dense<0.000000e+00> : vector<16x32xf32>
    %484 = tpu.matmul %482, %483, %cst_163 {dimension_numbers = #tpu.dot_dimension_numbers<[1], [0], [0], [1], [0, 0, 1, 1], [], []>} : vector<16x8xf32>, vector<8x32xf32>, vector<16x32xf32> -> vector<16x32xf32>
    %c328 = arith.constant 328 : index
    %c0_164 = arith.constant 0 : index
    %485 = vector.load %arg3[%c328, %c0_164] : memref<624x128xf32, #tpu.memory_space<vmem>>, vector<1x32xf32>
    %486 = vector.broadcast %485 : vector<1x32xf32> to vector<16x32xf32>
    %487 = arith.addf %484, %486 : vector<16x32xf32>
    %cst_165 = arith.constant 0.000000e+00 : f32
    %488 = vector.broadcast %cst_165 : f32 to vector<16x32xf32>
    %489 = arith.maximumf %487, %488 : vector<16x32xf32>
    %c336 = arith.constant 336 : index
    %c0_166 = arith.constant 0 : index
    %490 = vector.load %arg3[%c336, %c0_166] : memref<624x128xf32, #tpu.memory_space<vmem>>, vector<32x8xf32>
    %cst_167 = arith.constant dense<0.000000e+00> : vector<16x8xf32>
    %491 = tpu.matmul %489, %490, %cst_167 {dimension_numbers = #tpu.dot_dimension_numbers<[1], [0], [0], [1], [0, 0, 1, 1], [], []>} : vector<16x32xf32>, vector<32x8xf32>, vector<16x8xf32> -> vector<16x8xf32>
    %c368 = arith.constant 368 : index
    %c0_168 = arith.constant 0 : index
    %492 = vector.load %arg3[%c368, %c0_168] : memref<624x128xf32, #tpu.memory_space<vmem>>, vector<1x8xf32>
    %493 = vector.broadcast %492 : vector<1x8xf32> to vector<16x8xf32>
    %494 = arith.addf %491, %493 : vector<16x8xf32>
    %495 = arith.addf %482, %494 : vector<16x8xf32>
    %cst_169 = arith.constant dense<0.000000e+00> : vector<16xf32>
    %496 = vector.multi_reduction <add>, %495, %cst_169 [1] : vector<16x8xf32> to vector<16xf32>
    %497 = vector.shape_cast %496 : vector<16xf32> to vector<16x1xf32>
    %cst_170 = arith.constant 1.250000e-01 : f32
    %498 = vector.broadcast %cst_170 : f32 to vector<16x1xf32>
    %499 = arith.mulf %497, %498 : vector<16x1xf32>
    %500 = vector.broadcast %499 : vector<16x1xf32> to vector<16x8xf32>
    %501 = arith.subf %495, %500 : vector<16x8xf32>
    %502 = arith.mulf %501, %501 : vector<16x8xf32>
    %cst_171 = arith.constant dense<0.000000e+00> : vector<16xf32>
    %503 = vector.multi_reduction <add>, %502, %cst_171 [1] : vector<16x8xf32> to vector<16xf32>
    %504 = vector.shape_cast %503 : vector<16xf32> to vector<16x1xf32>
    %cst_172 = arith.constant 1.250000e-01 : f32
    %505 = vector.broadcast %cst_172 : f32 to vector<16x1xf32>
    %506 = arith.mulf %504, %505 : vector<16x1xf32>
    %cst_173 = arith.constant 9.99999974E-6 : f32
    %507 = vector.broadcast %cst_173 : f32 to vector<16x1xf32>
    %508 = arith.addf %506, %507 : vector<16x1xf32>
    %509 = math.rsqrt %508 : vector<16x1xf32>
    %510 = vector.broadcast %509 : vector<16x1xf32> to vector<16x8xf32>
    %511 = arith.mulf %501, %510 : vector<16x8xf32>
    %c317 = arith.constant 317 : index
    %c0_174 = arith.constant 0 : index
    %512 = vector.load %arg3[%c317, %c0_174] : memref<624x128xf32, #tpu.memory_space<vmem>>, vector<1x8xf32>
    %513 = vector.broadcast %512 : vector<1x8xf32> to vector<16x8xf32>
    %514 = arith.mulf %511, %513 : vector<16x8xf32>
    %c318 = arith.constant 318 : index
    %c0_175 = arith.constant 0 : index
    %515 = vector.load %arg3[%c318, %c0_175] : memref<624x128xf32, #tpu.memory_space<vmem>>, vector<1x8xf32>
    %516 = vector.broadcast %515 : vector<1x8xf32> to vector<16x8xf32>
    %517 = arith.addf %514, %516 : vector<16x8xf32>
    %c96 = arith.constant 96 : index
    %c0_176 = arith.constant 0 : index
    %518 = vector.load %arg3[%c96, %c0_176] : memref<624x128xf32, #tpu.memory_space<vmem>>, vector<8x24xf32>
    %cst_177 = arith.constant dense<0.000000e+00> : vector<16x24xf32>
    %519 = tpu.matmul %517, %518, %cst_177 {dimension_numbers = #tpu.dot_dimension_numbers<[1], [0], [0], [1], [0, 0, 1, 1], [], []>} : vector<16x8xf32>, vector<8x24xf32>, vector<16x24xf32> -> vector<16x24xf32>
    %c104 = arith.constant 104 : index
    %c0_178 = arith.constant 0 : index
    %520 = vector.load %arg3[%c104, %c0_178] : memref<624x128xf32, #tpu.memory_space<vmem>>, vector<1x24xf32>
    %521 = vector.broadcast %520 : vector<1x24xf32> to vector<16x24xf32>
    %522 = arith.addf %519, %521 : vector<16x24xf32>
    %523 = vector.extract_strided_slice %522 {offsets = [0, 0], sizes = [16, 8], strides = [1, 1]} : vector<16x24xf32> to vector<16x8xf32>
    %524 = vector.extract_strided_slice %522 {offsets = [0, 8], sizes = [16, 8], strides = [1, 1]} : vector<16x24xf32> to vector<16x8xf32>
    %525 = vector.extract_strided_slice %522 {offsets = [0, 16], sizes = [16, 8], strides = [1, 1]} : vector<16x24xf32> to vector<16x8xf32>
    %526 = vector.extract_strided_slice %523 {offsets = [0, 0], sizes = [16, 4], strides = [1, 1]} : vector<16x8xf32> to vector<16x4xf32>
    %527 = vector.extract_strided_slice %524 {offsets = [0, 0], sizes = [16, 4], strides = [1, 1]} : vector<16x8xf32> to vector<16x4xf32>
    %528 = vector.extract_strided_slice %525 {offsets = [0, 0], sizes = [16, 4], strides = [1, 1]} : vector<16x8xf32> to vector<16x4xf32>
    %cst_179 = arith.constant dense<0.000000e+00> : vector<16x16xf32>
    %529 = tpu.matmul %526, %527, %cst_179 {dimension_numbers = #tpu.dot_dimension_numbers<[1], [1], [0], [0], [0, 0, 1, 0], [], []>} : vector<16x4xf32>, vector<16x4xf32>, vector<16x16xf32> -> vector<16x16xf32>
    %cst_180 = arith.constant 5.000000e-01 : f32
    %530 = vector.broadcast %cst_180 : f32 to vector<16x16xf32>
    %531 = arith.mulf %529, %530 : vector<16x16xf32>
    %cst_181 = arith.constant -1.000000e+30 : f32
    %532 = vector.shape_cast %7 : vector<1x16xi1> to vector<1x16xi1>
    %533 = vector.broadcast %532 : vector<1x16xi1> to vector<16x16xi1>
    %534 = vector.broadcast %cst_181 : f32 to vector<16x16xf32>
    %535 = arith.select %533, %531, %534 : vector<16x16xi1>, vector<16x16xf32>
    %cst_182 = arith.constant dense<0xFF800000> : vector<16xf32>
    %536 = vector.multi_reduction <maximumf>, %535, %cst_182 [1] : vector<16x16xf32> to vector<16xf32>
    %537 = vector.shape_cast %536 : vector<16xf32> to vector<16x1xf32>
    %538 = vector.broadcast %537 : vector<16x1xf32> to vector<16x16xf32>
    %539 = arith.subf %535, %538 : vector<16x16xf32>
    %540 = math.exp %539 : vector<16x16xf32>
    %cst_183 = arith.constant dense<0.000000e+00> : vector<16xf32>
    %541 = vector.multi_reduction <add>, %540, %cst_183 [1] : vector<16x16xf32> to vector<16xf32>
    %542 = vector.shape_cast %541 : vector<16xf32> to vector<16x1xf32>
    %543 = tpu.reciprocal %542 {approx = true} : vector<16x1xf32> -> vector<16x1xf32>
    %544 = vector.broadcast %543 : vector<16x1xf32> to vector<16x16xf32>
    %545 = arith.mulf %540, %544 : vector<16x16xf32>
    %cst_184 = arith.constant dense<0.000000e+00> : vector<16x4xf32>
    %546 = tpu.matmul %545, %528, %cst_184 {dimension_numbers = #tpu.dot_dimension_numbers<[1], [0], [0], [1], [0, 0, 1, 1], [], []>} : vector<16x16xf32>, vector<16x4xf32>, vector<16x4xf32> -> vector<16x4xf32>
    %547 = vector.extract_strided_slice %523 {offsets = [0, 4], sizes = [16, 4], strides = [1, 1]} : vector<16x8xf32> to vector<16x4xf32>
    %548 = vector.extract_strided_slice %524 {offsets = [0, 4], sizes = [16, 4], strides = [1, 1]} : vector<16x8xf32> to vector<16x4xf32>
    %549 = vector.extract_strided_slice %525 {offsets = [0, 4], sizes = [16, 4], strides = [1, 1]} : vector<16x8xf32> to vector<16x4xf32>
    %cst_185 = arith.constant dense<0.000000e+00> : vector<16x16xf32>
    %550 = tpu.matmul %547, %548, %cst_185 {dimension_numbers = #tpu.dot_dimension_numbers<[1], [1], [0], [0], [0, 0, 1, 0], [], []>} : vector<16x4xf32>, vector<16x4xf32>, vector<16x16xf32> -> vector<16x16xf32>
    %cst_186 = arith.constant 5.000000e-01 : f32
    %551 = vector.broadcast %cst_186 : f32 to vector<16x16xf32>
    %552 = arith.mulf %550, %551 : vector<16x16xf32>
    %cst_187 = arith.constant -1.000000e+30 : f32
    %553 = vector.shape_cast %7 : vector<1x16xi1> to vector<1x16xi1>
    %554 = vector.broadcast %553 : vector<1x16xi1> to vector<16x16xi1>
    %555 = vector.broadcast %cst_187 : f32 to vector<16x16xf32>
    %556 = arith.select %554, %552, %555 : vector<16x16xi1>, vector<16x16xf32>
    %cst_188 = arith.constant dense<0xFF800000> : vector<16xf32>
    %557 = vector.multi_reduction <maximumf>, %556, %cst_188 [1] : vector<16x16xf32> to vector<16xf32>
    %558 = vector.shape_cast %557 : vector<16xf32> to vector<16x1xf32>
    %559 = vector.broadcast %558 : vector<16x1xf32> to vector<16x16xf32>
    %560 = arith.subf %556, %559 : vector<16x16xf32>
    %561 = math.exp %560 : vector<16x16xf32>
    %cst_189 = arith.constant dense<0.000000e+00> : vector<16xf32>
    %562 = vector.multi_reduction <add>, %561, %cst_189 [1] : vector<16x16xf32> to vector<16xf32>
    %563 = vector.shape_cast %562 : vector<16xf32> to vector<16x1xf32>
    %564 = tpu.reciprocal %563 {approx = true} : vector<16x1xf32> -> vector<16x1xf32>
    %565 = vector.broadcast %564 : vector<16x1xf32> to vector<16x16xf32>
    %566 = arith.mulf %561, %565 : vector<16x16xf32>
    %cst_190 = arith.constant dense<0.000000e+00> : vector<16x4xf32>
    %567 = tpu.matmul %566, %549, %cst_190 {dimension_numbers = #tpu.dot_dimension_numbers<[1], [0], [0], [1], [0, 0, 1, 1], [], []>} : vector<16x16xf32>, vector<16x4xf32>, vector<16x4xf32> -> vector<16x4xf32>
    %568 = tpu.concatenate %546, %567 in 1 : vector<16x4xf32>, vector<16x4xf32> -> vector<16x8xf32>
    %c112 = arith.constant 112 : index
    %c0_191 = arith.constant 0 : index
    %569 = vector.load %arg3[%c112, %c0_191] : memref<624x128xf32, #tpu.memory_space<vmem>>, vector<8x8xf32>
    %cst_192 = arith.constant dense<0.000000e+00> : vector<16x8xf32>
    %570 = tpu.matmul %568, %569, %cst_192 {dimension_numbers = #tpu.dot_dimension_numbers<[1], [0], [0], [1], [0, 0, 1, 1], [], []>} : vector<16x8xf32>, vector<8x8xf32>, vector<16x8xf32> -> vector<16x8xf32>
    %c120 = arith.constant 120 : index
    %c0_193 = arith.constant 0 : index
    %571 = vector.load %arg3[%c120, %c0_193] : memref<624x128xf32, #tpu.memory_space<vmem>>, vector<1x8xf32>
    %572 = vector.broadcast %571 : vector<1x8xf32> to vector<16x8xf32>
    %573 = arith.addf %570, %572 : vector<16x8xf32>
    %574 = arith.addf %517, %573 : vector<16x8xf32>
    %cst_194 = arith.constant dense<0.000000e+00> : vector<16xf32>
    %575 = vector.multi_reduction <add>, %574, %cst_194 [1] : vector<16x8xf32> to vector<16xf32>
    %576 = vector.shape_cast %575 : vector<16xf32> to vector<16x1xf32>
    %cst_195 = arith.constant 1.250000e-01 : f32
    %577 = vector.broadcast %cst_195 : f32 to vector<16x1xf32>
    %578 = arith.mulf %576, %577 : vector<16x1xf32>
    %579 = vector.broadcast %578 : vector<16x1xf32> to vector<16x8xf32>
    %580 = arith.subf %574, %579 : vector<16x8xf32>
    %581 = arith.mulf %580, %580 : vector<16x8xf32>
    %cst_196 = arith.constant dense<0.000000e+00> : vector<16xf32>
    %582 = vector.multi_reduction <add>, %581, %cst_196 [1] : vector<16x8xf32> to vector<16xf32>
    %583 = vector.shape_cast %582 : vector<16xf32> to vector<16x1xf32>
    %cst_197 = arith.constant 1.250000e-01 : f32
    %584 = vector.broadcast %cst_197 : f32 to vector<16x1xf32>
    %585 = arith.mulf %583, %584 : vector<16x1xf32>
    %cst_198 = arith.constant 9.99999974E-6 : f32
    %586 = vector.broadcast %cst_198 : f32 to vector<16x1xf32>
    %587 = arith.addf %585, %586 : vector<16x1xf32>
    %588 = math.rsqrt %587 : vector<16x1xf32>
    %589 = vector.broadcast %588 : vector<16x1xf32> to vector<16x8xf32>
    %590 = arith.mulf %580, %589 : vector<16x8xf32>
    %c369 = arith.constant 369 : index
    %c0_199 = arith.constant 0 : index
    %591 = vector.load %arg3[%c369, %c0_199] : memref<624x128xf32, #tpu.memory_space<vmem>>, vector<1x8xf32>
    %592 = vector.broadcast %591 : vector<1x8xf32> to vector<16x8xf32>
    %593 = arith.mulf %590, %592 : vector<16x8xf32>
    %c370 = arith.constant 370 : index
    %c0_200 = arith.constant 0 : index
    %594 = vector.load %arg3[%c370, %c0_200] : memref<624x128xf32, #tpu.memory_space<vmem>>, vector<1x8xf32>
    %595 = vector.broadcast %594 : vector<1x8xf32> to vector<16x8xf32>
    %596 = arith.addf %593, %595 : vector<16x8xf32>
    %c160 = arith.constant 160 : index
    %c0_201 = arith.constant 0 : index
    %597 = vector.load %arg3[%c160, %c0_201] : memref<624x128xf32, #tpu.memory_space<vmem>>, vector<8x8xf32>
    %cst_202 = arith.constant dense<0.000000e+00> : vector<16x8xf32>
    %598 = tpu.matmul %596, %597, %cst_202 {dimension_numbers = #tpu.dot_dimension_numbers<[1], [0], [0], [1], [0, 0, 1, 1], [], []>} : vector<16x8xf32>, vector<8x8xf32>, vector<16x8xf32> -> vector<16x8xf32>
    %c168 = arith.constant 168 : index
    %c0_203 = arith.constant 0 : index
    %599 = vector.load %arg3[%c168, %c0_203] : memref<624x128xf32, #tpu.memory_space<vmem>>, vector<1x8xf32>
    %600 = vector.broadcast %599 : vector<1x8xf32> to vector<16x8xf32>
    %601 = arith.addf %598, %600 : vector<16x8xf32>
    %602 = vector.extract_strided_slice %325 {offsets = [0, 16], sizes = [16, 8], strides = [1, 1]} : vector<16x32xf32> to vector<16x8xf32>
    %603 = vector.extract_strided_slice %325 {offsets = [0, 24], sizes = [16, 8], strides = [1, 1]} : vector<16x32xf32> to vector<16x8xf32>
    %604 = vector.extract_strided_slice %601 {offsets = [0, 0], sizes = [16, 4], strides = [1, 1]} : vector<16x8xf32> to vector<16x4xf32>
    %605 = vector.extract_strided_slice %602 {offsets = [0, 0], sizes = [16, 4], strides = [1, 1]} : vector<16x8xf32> to vector<16x4xf32>
    %606 = vector.extract_strided_slice %603 {offsets = [0, 0], sizes = [16, 4], strides = [1, 1]} : vector<16x8xf32> to vector<16x4xf32>
    %cst_204 = arith.constant dense<0.000000e+00> : vector<16x16xf32>
    %607 = tpu.matmul %604, %605, %cst_204 {dimension_numbers = #tpu.dot_dimension_numbers<[1], [1], [0], [0], [0, 0, 1, 0], [], []>} : vector<16x4xf32>, vector<16x4xf32>, vector<16x16xf32> -> vector<16x16xf32>
    %cst_205 = arith.constant 5.000000e-01 : f32
    %608 = vector.broadcast %cst_205 : f32 to vector<16x16xf32>
    %609 = arith.mulf %607, %608 : vector<16x16xf32>
    %cst_206 = arith.constant -1.000000e+30 : f32
    %610 = vector.shape_cast %7 : vector<1x16xi1> to vector<1x16xi1>
    %611 = vector.broadcast %610 : vector<1x16xi1> to vector<16x16xi1>
    %612 = vector.broadcast %cst_206 : f32 to vector<16x16xf32>
    %613 = arith.select %611, %609, %612 : vector<16x16xi1>, vector<16x16xf32>
    %cst_207 = arith.constant dense<0xFF800000> : vector<16xf32>
    %614 = vector.multi_reduction <maximumf>, %613, %cst_207 [1] : vector<16x16xf32> to vector<16xf32>
    %615 = vector.shape_cast %614 : vector<16xf32> to vector<16x1xf32>
    %616 = vector.broadcast %615 : vector<16x1xf32> to vector<16x16xf32>
    %617 = arith.subf %613, %616 : vector<16x16xf32>
    %618 = math.exp %617 : vector<16x16xf32>
    %cst_208 = arith.constant dense<0.000000e+00> : vector<16xf32>
    %619 = vector.multi_reduction <add>, %618, %cst_208 [1] : vector<16x16xf32> to vector<16xf32>
    %620 = vector.shape_cast %619 : vector<16xf32> to vector<16x1xf32>
    %621 = tpu.reciprocal %620 {approx = true} : vector<16x1xf32> -> vector<16x1xf32>
    %622 = vector.broadcast %621 : vector<16x1xf32> to vector<16x16xf32>
    %623 = arith.mulf %618, %622 : vector<16x16xf32>
    %cst_209 = arith.constant dense<0.000000e+00> : vector<16x4xf32>
    %624 = tpu.matmul %623, %606, %cst_209 {dimension_numbers = #tpu.dot_dimension_numbers<[1], [0], [0], [1], [0, 0, 1, 1], [], []>} : vector<16x16xf32>, vector<16x4xf32>, vector<16x4xf32> -> vector<16x4xf32>
    %625 = vector.extract_strided_slice %601 {offsets = [0, 4], sizes = [16, 4], strides = [1, 1]} : vector<16x8xf32> to vector<16x4xf32>
    %626 = vector.extract_strided_slice %602 {offsets = [0, 4], sizes = [16, 4], strides = [1, 1]} : vector<16x8xf32> to vector<16x4xf32>
    %627 = vector.extract_strided_slice %603 {offsets = [0, 4], sizes = [16, 4], strides = [1, 1]} : vector<16x8xf32> to vector<16x4xf32>
    %cst_210 = arith.constant dense<0.000000e+00> : vector<16x16xf32>
    %628 = tpu.matmul %625, %626, %cst_210 {dimension_numbers = #tpu.dot_dimension_numbers<[1], [1], [0], [0], [0, 0, 1, 0], [], []>} : vector<16x4xf32>, vector<16x4xf32>, vector<16x16xf32> -> vector<16x16xf32>
    %cst_211 = arith.constant 5.000000e-01 : f32
    %629 = vector.broadcast %cst_211 : f32 to vector<16x16xf32>
    %630 = arith.mulf %628, %629 : vector<16x16xf32>
    %cst_212 = arith.constant -1.000000e+30 : f32
    %631 = vector.shape_cast %7 : vector<1x16xi1> to vector<1x16xi1>
    %632 = vector.broadcast %631 : vector<1x16xi1> to vector<16x16xi1>
    %633 = vector.broadcast %cst_212 : f32 to vector<16x16xf32>
    %634 = arith.select %632, %630, %633 : vector<16x16xi1>, vector<16x16xf32>
    %cst_213 = arith.constant dense<0xFF800000> : vector<16xf32>
    %635 = vector.multi_reduction <maximumf>, %634, %cst_213 [1] : vector<16x16xf32> to vector<16xf32>
    %636 = vector.shape_cast %635 : vector<16xf32> to vector<16x1xf32>
    %637 = vector.broadcast %636 : vector<16x1xf32> to vector<16x16xf32>
    %638 = arith.subf %634, %637 : vector<16x16xf32>
    %639 = math.exp %638 : vector<16x16xf32>
    %cst_214 = arith.constant dense<0.000000e+00> : vector<16xf32>
    %640 = vector.multi_reduction <add>, %639, %cst_214 [1] : vector<16x16xf32> to vector<16xf32>
    %641 = vector.shape_cast %640 : vector<16xf32> to vector<16x1xf32>
    %642 = tpu.reciprocal %641 {approx = true} : vector<16x1xf32> -> vector<16x1xf32>
    %643 = vector.broadcast %642 : vector<16x1xf32> to vector<16x16xf32>
    %644 = arith.mulf %639, %643 : vector<16x16xf32>
    %cst_215 = arith.constant dense<0.000000e+00> : vector<16x4xf32>
    %645 = tpu.matmul %644, %627, %cst_215 {dimension_numbers = #tpu.dot_dimension_numbers<[1], [0], [0], [1], [0, 0, 1, 1], [], []>} : vector<16x16xf32>, vector<16x4xf32>, vector<16x4xf32> -> vector<16x4xf32>
    %646 = tpu.concatenate %624, %645 in 1 : vector<16x4xf32>, vector<16x4xf32> -> vector<16x8xf32>
    %c176 = arith.constant 176 : index
    %c0_216 = arith.constant 0 : index
    %647 = vector.load %arg3[%c176, %c0_216] : memref<624x128xf32, #tpu.memory_space<vmem>>, vector<8x8xf32>
    %cst_217 = arith.constant dense<0.000000e+00> : vector<16x8xf32>
    %648 = tpu.matmul %646, %647, %cst_217 {dimension_numbers = #tpu.dot_dimension_numbers<[1], [0], [0], [1], [0, 0, 1, 1], [], []>} : vector<16x8xf32>, vector<8x8xf32>, vector<16x8xf32> -> vector<16x8xf32>
    %c184 = arith.constant 184 : index
    %c0_218 = arith.constant 0 : index
    %649 = vector.load %arg3[%c184, %c0_218] : memref<624x128xf32, #tpu.memory_space<vmem>>, vector<1x8xf32>
    %650 = vector.broadcast %649 : vector<1x8xf32> to vector<16x8xf32>
    %651 = arith.addf %648, %650 : vector<16x8xf32>
    %652 = arith.addf %596, %651 : vector<16x8xf32>
    %cst_219 = arith.constant dense<0.000000e+00> : vector<16xf32>
    %653 = vector.multi_reduction <add>, %652, %cst_219 [1] : vector<16x8xf32> to vector<16xf32>
    %654 = vector.shape_cast %653 : vector<16xf32> to vector<16x1xf32>
    %cst_220 = arith.constant 1.250000e-01 : f32
    %655 = vector.broadcast %cst_220 : f32 to vector<16x1xf32>
    %656 = arith.mulf %654, %655 : vector<16x1xf32>
    %657 = vector.broadcast %656 : vector<16x1xf32> to vector<16x8xf32>
    %658 = arith.subf %652, %657 : vector<16x8xf32>
    %659 = arith.mulf %658, %658 : vector<16x8xf32>
    %cst_221 = arith.constant dense<0.000000e+00> : vector<16xf32>
    %660 = vector.multi_reduction <add>, %659, %cst_221 [1] : vector<16x8xf32> to vector<16xf32>
    %661 = vector.shape_cast %660 : vector<16xf32> to vector<16x1xf32>
    %cst_222 = arith.constant 1.250000e-01 : f32
    %662 = vector.broadcast %cst_222 : f32 to vector<16x1xf32>
    %663 = arith.mulf %661, %662 : vector<16x1xf32>
    %cst_223 = arith.constant 9.99999974E-6 : f32
    %664 = vector.broadcast %cst_223 : f32 to vector<16x1xf32>
    %665 = arith.addf %663, %664 : vector<16x1xf32>
    %666 = math.rsqrt %665 : vector<16x1xf32>
    %667 = vector.broadcast %666 : vector<16x1xf32> to vector<16x8xf32>
    %668 = arith.mulf %658, %667 : vector<16x8xf32>
    %c371 = arith.constant 371 : index
    %c0_224 = arith.constant 0 : index
    %669 = vector.load %arg3[%c371, %c0_224] : memref<624x128xf32, #tpu.memory_space<vmem>>, vector<1x8xf32>
    %670 = vector.broadcast %669 : vector<1x8xf32> to vector<16x8xf32>
    %671 = arith.mulf %668, %670 : vector<16x8xf32>
    %c372 = arith.constant 372 : index
    %c0_225 = arith.constant 0 : index
    %672 = vector.load %arg3[%c372, %c0_225] : memref<624x128xf32, #tpu.memory_space<vmem>>, vector<1x8xf32>
    %673 = vector.broadcast %672 : vector<1x8xf32> to vector<16x8xf32>
    %674 = arith.addf %671, %673 : vector<16x8xf32>
    %c376 = arith.constant 376 : index
    %c0_226 = arith.constant 0 : index
    %675 = vector.load %arg3[%c376, %c0_226] : memref<624x128xf32, #tpu.memory_space<vmem>>, vector<8x32xf32>
    %cst_227 = arith.constant dense<0.000000e+00> : vector<16x32xf32>
    %676 = tpu.matmul %674, %675, %cst_227 {dimension_numbers = #tpu.dot_dimension_numbers<[1], [0], [0], [1], [0, 0, 1, 1], [], []>} : vector<16x8xf32>, vector<8x32xf32>, vector<16x32xf32> -> vector<16x32xf32>
    %c384 = arith.constant 384 : index
    %c0_228 = arith.constant 0 : index
    %677 = vector.load %arg3[%c384, %c0_228] : memref<624x128xf32, #tpu.memory_space<vmem>>, vector<1x32xf32>
    %678 = vector.broadcast %677 : vector<1x32xf32> to vector<16x32xf32>
    %679 = arith.addf %676, %678 : vector<16x32xf32>
    %cst_229 = arith.constant 0.000000e+00 : f32
    %680 = vector.broadcast %cst_229 : f32 to vector<16x32xf32>
    %681 = arith.maximumf %679, %680 : vector<16x32xf32>
    %c392 = arith.constant 392 : index
    %c0_230 = arith.constant 0 : index
    %682 = vector.load %arg3[%c392, %c0_230] : memref<624x128xf32, #tpu.memory_space<vmem>>, vector<32x8xf32>
    %cst_231 = arith.constant dense<0.000000e+00> : vector<16x8xf32>
    %683 = tpu.matmul %681, %682, %cst_231 {dimension_numbers = #tpu.dot_dimension_numbers<[1], [0], [0], [1], [0, 0, 1, 1], [], []>} : vector<16x32xf32>, vector<32x8xf32>, vector<16x8xf32> -> vector<16x8xf32>
    %c424 = arith.constant 424 : index
    %c0_232 = arith.constant 0 : index
    %684 = vector.load %arg3[%c424, %c0_232] : memref<624x128xf32, #tpu.memory_space<vmem>>, vector<1x8xf32>
    %685 = vector.broadcast %684 : vector<1x8xf32> to vector<16x8xf32>
    %686 = arith.addf %683, %685 : vector<16x8xf32>
    %687 = arith.addf %674, %686 : vector<16x8xf32>
    %cst_233 = arith.constant dense<0.000000e+00> : vector<16xf32>
    %688 = vector.multi_reduction <add>, %687, %cst_233 [1] : vector<16x8xf32> to vector<16xf32>
    %689 = vector.shape_cast %688 : vector<16xf32> to vector<16x1xf32>
    %cst_234 = arith.constant 1.250000e-01 : f32
    %690 = vector.broadcast %cst_234 : f32 to vector<16x1xf32>
    %691 = arith.mulf %689, %690 : vector<16x1xf32>
    %692 = vector.broadcast %691 : vector<16x1xf32> to vector<16x8xf32>
    %693 = arith.subf %687, %692 : vector<16x8xf32>
    %694 = arith.mulf %693, %693 : vector<16x8xf32>
    %cst_235 = arith.constant dense<0.000000e+00> : vector<16xf32>
    %695 = vector.multi_reduction <add>, %694, %cst_235 [1] : vector<16x8xf32> to vector<16xf32>
    %696 = vector.shape_cast %695 : vector<16xf32> to vector<16x1xf32>
    %cst_236 = arith.constant 1.250000e-01 : f32
    %697 = vector.broadcast %cst_236 : f32 to vector<16x1xf32>
    %698 = arith.mulf %696, %697 : vector<16x1xf32>
    %cst_237 = arith.constant 9.99999974E-6 : f32
    %699 = vector.broadcast %cst_237 : f32 to vector<16x1xf32>
    %700 = arith.addf %698, %699 : vector<16x1xf32>
    %701 = math.rsqrt %700 : vector<16x1xf32>
    %702 = vector.broadcast %701 : vector<16x1xf32> to vector<16x8xf32>
    %703 = arith.mulf %693, %702 : vector<16x8xf32>
    %c373 = arith.constant 373 : index
    %c0_238 = arith.constant 0 : index
    %704 = vector.load %arg3[%c373, %c0_238] : memref<624x128xf32, #tpu.memory_space<vmem>>, vector<1x8xf32>
    %705 = vector.broadcast %704 : vector<1x8xf32> to vector<16x8xf32>
    %706 = arith.mulf %703, %705 : vector<16x8xf32>
    %c374 = arith.constant 374 : index
    %c0_239 = arith.constant 0 : index
    %707 = vector.load %arg3[%c374, %c0_239] : memref<624x128xf32, #tpu.memory_space<vmem>>, vector<1x8xf32>
    %708 = vector.broadcast %707 : vector<1x8xf32> to vector<16x8xf32>
    %709 = arith.addf %706, %708 : vector<16x8xf32>
    %cst_240 = arith.constant 0.000000e+00 : f32
    %710 = vector.shape_cast %10 : vector<16x1xi1> to vector<16x1xi1>
    %711 = vector.broadcast %710 : vector<16x1xi1> to vector<16x8xi1>
    %712 = vector.broadcast %cst_240 : f32 to vector<16x8xf32>
    %713 = arith.select %711, %709, %712 : vector<16x8xi1>, vector<16x8xf32>
    %cst_241 = arith.constant 0.000000e+00 : f32
    %714 = vector.broadcast %cst_241 : f32 to vector<16x32xf32>
    %715 = vector.extract_strided_slice %713 {offsets = [0, 2], sizes = [16, 1], strides = [1, 1]} : vector<16x8xf32> to vector<16x1xf32>
    %c432 = arith.constant 432 : index
    %c0_242 = arith.constant 0 : index
    %716 = vector.load %arg3[%c432, %c0_242] : memref<624x128xf32, #tpu.memory_space<vmem>>, vector<16x32xf32>
    %717 = vector.broadcast %715 : vector<16x1xf32> to vector<16x32xf32>
    %718 = arith.mulf %717, %716 : vector<16x32xf32>
    %719 = arith.addf %714, %718 : vector<16x32xf32>
    %720 = vector.extract_strided_slice %713 {offsets = [0, 3], sizes = [16, 1], strides = [1, 1]} : vector<16x8xf32> to vector<16x1xf32>
    %c448 = arith.constant 448 : index
    %c0_243 = arith.constant 0 : index
    %721 = vector.load %arg3[%c448, %c0_243] : memref<624x128xf32, #tpu.memory_space<vmem>>, vector<16x32xf32>
    %722 = vector.broadcast %720 : vector<16x1xf32> to vector<16x32xf32>
    %723 = arith.mulf %722, %721 : vector<16x32xf32>
    %724 = arith.addf %719, %723 : vector<16x32xf32>
    %725 = vector.extract_strided_slice %713 {offsets = [0, 4], sizes = [16, 1], strides = [1, 1]} : vector<16x8xf32> to vector<16x1xf32>
    %c464 = arith.constant 464 : index
    %c0_244 = arith.constant 0 : index
    %726 = vector.load %arg3[%c464, %c0_244] : memref<624x128xf32, #tpu.memory_space<vmem>>, vector<16x32xf32>
    %727 = vector.broadcast %725 : vector<16x1xf32> to vector<16x32xf32>
    %728 = arith.mulf %727, %726 : vector<16x32xf32>
    %729 = arith.addf %724, %728 : vector<16x32xf32>
    %730 = vector.extract_strided_slice %713 {offsets = [0, 5], sizes = [16, 1], strides = [1, 1]} : vector<16x8xf32> to vector<16x1xf32>
    %c480 = arith.constant 480 : index
    %c0_245 = arith.constant 0 : index
    %731 = vector.load %arg3[%c480, %c0_245] : memref<624x128xf32, #tpu.memory_space<vmem>>, vector<16x32xf32>
    %732 = vector.broadcast %730 : vector<16x1xf32> to vector<16x32xf32>
    %733 = arith.mulf %732, %731 : vector<16x32xf32>
    %734 = arith.addf %729, %733 : vector<16x32xf32>
    %735 = vector.extract_strided_slice %713 {offsets = [0, 6], sizes = [16, 1], strides = [1, 1]} : vector<16x8xf32> to vector<16x1xf32>
    %c496 = arith.constant 496 : index
    %c0_246 = arith.constant 0 : index
    %736 = vector.load %arg3[%c496, %c0_246] : memref<624x128xf32, #tpu.memory_space<vmem>>, vector<16x32xf32>
    %737 = vector.broadcast %735 : vector<16x1xf32> to vector<16x32xf32>
    %738 = arith.mulf %737, %736 : vector<16x32xf32>
    %739 = arith.addf %734, %738 : vector<16x32xf32>
    %740 = vector.extract_strided_slice %713 {offsets = [0, 7], sizes = [16, 1], strides = [1, 1]} : vector<16x8xf32> to vector<16x1xf32>
    %c512 = arith.constant 512 : index
    %c0_247 = arith.constant 0 : index
    %741 = vector.load %arg3[%c512, %c0_247] : memref<624x128xf32, #tpu.memory_space<vmem>>, vector<16x32xf32>
    %742 = vector.broadcast %740 : vector<16x1xf32> to vector<16x32xf32>
    %743 = arith.mulf %742, %741 : vector<16x32xf32>
    %744 = arith.addf %739, %743 : vector<16x32xf32>
    %cst_248 = arith.constant dense<0.000000e+00> : vector<32xf32>
    %745 = vector.multi_reduction <add>, %744, %cst_248 [0] : vector<16x32xf32> to vector<32xf32>
    %746 = vector.shape_cast %745 : vector<32xf32> to vector<1x32xf32>
    %c528 = arith.constant 528 : index
    %c0_249 = arith.constant 0 : index
    %747 = vector.load %arg3[%c528, %c0_249] : memref<624x128xf32, #tpu.memory_space<vmem>>, vector<1x32xf32>
    %748 = arith.addf %746, %747 : vector<1x32xf32>
    %cst_250 = arith.constant 0.000000e+00 : f32
    %749 = vector.broadcast %cst_250 : f32 to vector<1x32xf32>
    %750 = arith.cmpf ogt, %748, %749 : vector<1x32xf32>
    %cst_251 = arith.constant 0.000000e+00 : f32
    %751 = vector.broadcast %cst_251 : f32 to vector<1x32xf32>
    %752 = arith.minimumf %748, %751 : vector<1x32xf32>
    %753 = math.exp %752 : vector<1x32xf32>
    %cst_252 = arith.constant 1.000000e+00 : f32
    %754 = vector.broadcast %cst_252 : f32 to vector<1x32xf32>
    %755 = arith.subf %753, %754 : vector<1x32xf32>
    %756 = arith.select %750, %748, %755 : vector<1x32xi1>, vector<1x32xf32>
    %c536 = arith.constant 536 : index
    %c0_253 = arith.constant 0 : index
    %757 = vector.load %arg3[%c536, %c0_253] : memref<624x128xf32, #tpu.memory_space<vmem>>, vector<32x16xf32>
    %cst_254 = arith.constant dense<0.000000e+00> : vector<1x16xf32>
    %758 = tpu.matmul %756, %757, %cst_254 {dimension_numbers = #tpu.dot_dimension_numbers<[1], [0], [0], [1], [0, 0, 1, 1], [], []>} : vector<1x32xf32>, vector<32x16xf32>, vector<1x16xf32> -> vector<1x16xf32>
    %c568 = arith.constant 568 : index
    %c0_255 = arith.constant 0 : index
    %759 = vector.load %arg3[%c568, %c0_255] : memref<624x128xf32, #tpu.memory_space<vmem>>, vector<1x16xf32>
    %760 = arith.addf %758, %759 : vector<1x16xf32>
    %761 = arith.subf %13, %21 : vector<1x4xf32>
    %762 = tpu.concatenate %761, %761, %761, %761 in 1 : vector<1x4xf32>, vector<1x4xf32>, vector<1x4xf32>, vector<1x4xf32> -> vector<1x16xf32>
    %763 = arith.mulf %760, %762 : vector<1x16xf32>
    %c576 = arith.constant 576 : index
    %c0_256 = arith.constant 0 : index
    %764 = vector.load %arg3[%c576, %c0_256] : memref<624x128xf32, #tpu.memory_space<vmem>>, vector<16x4xf32>
    %cst_257 = arith.constant dense<0.000000e+00> : vector<1x4xf32>
    %765 = tpu.matmul %763, %764, %cst_257 {dimension_numbers = #tpu.dot_dimension_numbers<[1], [0], [0], [1], [0, 0, 1, 1], [], []>} : vector<1x16xf32>, vector<16x4xf32>, vector<1x4xf32> -> vector<1x4xf32>
    %766 = arith.addf %19, %765 : vector<1x4xf32>
    %cst_258 = arith.constant 0.000000e+00 : f32
    %767 = vector.broadcast %cst_258 : f32 to vector<1x124xf32>
    %768 = tpu.concatenate %766, %767 in 1 : vector<1x4xf32>, vector<1x124xf32> -> vector<1x128xf32>
    %cst_259 = arith.constant 0.000000e+00 : f32
    %769 = vector.broadcast %cst_259 : f32 to vector<1x124xf32>
    %770 = tpu.concatenate %14, %769 in 1 : vector<1x4xf32>, vector<1x124xf32> -> vector<1x128xf32>
    %cst_260 = arith.constant 0.000000e+00 : f32
    %771 = vector.broadcast %cst_260 : f32 to vector<1x124xf32>
    %772 = tpu.concatenate %19, %771 in 1 : vector<1x4xf32>, vector<1x124xf32> -> vector<1x128xf32>
    %cst_261 = arith.constant 0.000000e+00 : f32
    %773 = vector.broadcast %cst_261 : f32 to vector<1x124xf32>
    %774 = tpu.concatenate %13, %773 in 1 : vector<1x4xf32>, vector<1x124xf32> -> vector<1x128xf32>
    %cst_262 = arith.constant 0.000000e+00 : f32
    %775 = vector.broadcast %cst_262 : f32 to vector<4x128xf32>
    %776 = tpu.concatenate %768, %770, %772, %774, %775 in 0 : vector<1x128xf32>, vector<1x128xf32>, vector<1x128xf32>, vector<1x128xf32>, vector<4x128xf32> -> vector<8x128xf32>
    %c0_263 = arith.constant 0 : index
    %c0_264 = arith.constant 0 : index
    %777 = vector.load %arg5[%c0_263, %c0_264] : memref<8x128xf32, #tpu.memory_space<vmem>>, vector<8x128xf32>
    tpu.vector_store %arg5[%c0_263, %c0_264], %776 {strides = array<i32>} : memref<8x128xf32, #tpu.memory_space<vmem>>, vector<8x128xf32>,
    %cst_265 = arith.constant 0.000000e+00 : f32
    %778 = vector.broadcast %cst_265 : f32 to vector<1x124xf32>
    %779 = tpu.concatenate %766, %778 in 1 : vector<1x4xf32>, vector<1x124xf32> -> vector<1x128xf32>
    %cst_266 = arith.constant 0.000000e+00 : f32
    %780 = vector.broadcast %cst_266 : f32 to vector<1x112xf32>
    %781 = tpu.concatenate %760, %780 in 1 : vector<1x16xf32>, vector<1x112xf32> -> vector<1x128xf32>
    %cst_267 = arith.constant 0.000000e+00 : f32
    %782 = vector.broadcast %cst_267 : f32 to vector<6x128xf32>
    %783 = tpu.concatenate %779, %781, %782 in 0 : vector<1x128xf32>, vector<1x128xf32>, vector<6x128xf32> -> vector<8x128xf32>
    %c0_268 = arith.constant 0 : index
    %c0_269 = arith.constant 0 : index
    %c0_270 = arith.constant 0 : index
    %784 = vector.load %arg4[%c0_268, %c0_269, %c0_270] : memref<1x8x128xf32, #tpu.memory_space<vmem>>, vector<1x8x128xf32>
    %785 = vector.shape_cast %784 : vector<1x8x128xf32> to vector<8x128xf32>
    %786 = vector.shape_cast %783 : vector<8x128xf32> to vector<1x8x128xf32>
    tpu.vector_store %arg4[%c0_268, %c0_269, %c0_270], %786 {strides = array<i32>} : memref<1x8x128xf32, #tpu.memory_space<vmem>>, vector<1x8x128xf32>,
    return
  }
  func.func @transform_0(%arg0: i32) -> (i32, i32, i32) {
    %c0_i32 = arith.constant 0 : i32
    %c0_i32_0 = arith.constant 0 : i32
    %c0_i32_1 = arith.constant 0 : i32
    return %arg0, %c0_i32, %c0_i32_0 : i32, i32, i32
  }
  func.func @transform_1(%arg0: i32) -> (i32, i32) {
    %c0_i32 = arith.constant 0 : i32
    %c0_i32_0 = arith.constant 0 : i32
    %c0_i32_1 = arith.constant 0 : i32
    return %c0_i32, %c0_i32_0 : i32, i32
  }
  func.func @transform_2(%arg0: i32) -> (i32, i32) {
    %c0_i32 = arith.constant 0 : i32
    %c0_i32_0 = arith.constant 0 : i32
    %c0_i32_1 = arith.constant 0 : i32
    return %c0_i32, %c0_i32_0 : i32, i32
  }
  func.func @transform_3(%arg0: i32) -> (i32, i32, i32) {
    %c0_i32 = arith.constant 0 : i32
    %c0_i32_0 = arith.constant 0 : i32
    %c0_i32_1 = arith.constant 0 : i32
    return %arg0, %c0_i32, %c0_i32_0 : i32, i32, i32
  }
}

</mosaic_0001>

<bundles_post_ra>
// kernel: forward.1
= control target key start
LH: loop header
LB: loop body
LE: loop exit
PB: predicated region body
PF: predicated region fallthrough
CT: control target
= control target key end

     0   :  { %8 = vsyncpa [#allocation6], 0  ;;  %s4510_s0 = inlined_call_operand.hbm [shape: f32[16,8,128], index: 0, kind: input, shape index: {}]   ;;  %s4511_s1 = inlined_call_operand.hbm [shape: f32[8,128], index: 1, kind: input, shape index: {}]   ;;  %s4512_s2 = inlined_call_operand.hbm [shape: f32[624,128], index: 2, kind: input, shape index: {}]   ;;  %s4513_s3 = inlined_call_operand.vmem [shape: f32[16,8,128], index: 3, kind: output, shape index: {}]  }
   0x1   :  { %10 = vsyncpa [#allocation6 + $0x1], 0 }
   0x2   :  { %11 = vsyncpa [#allocation8], 0  ;;  %s3863_s12 = smov 0   ;;  %s3865_s13 = smov 0  }
   0x3   :  { %s3867_s14 = smov 0   ;;  %s3869_s15 = smov 0  }
   0x4 LB: > { %s3882_s16 = sadd.s32 4294967295, %s3820_s15   ;;  %p37_p0 = scmp.ne.s32.totalorder %s3812_s13, %s3808_s12  ;;  %s3820_s15 = sphi %s3869_s15, %s4528_s15   ;;  %s3816_s14 = sphi %s3867_s14, %s4527_s14   ;;  %s3812_s13 = sphi %s3865_s13, %s4526_s13   ;;  %s3808_s12 = sphi %s3863_s12, %s4525_s12  }
   0x5   : > { %p38_p1 = scmp.eq.s32.totalorder %s3882_s16, 0  ;;  %p3213_p2 = scmp.ge.s32.totalorder %s3820_s15, 1 }
   0x6   : > { %p116_p3 = scmp.lt.s32.totalorder %s3820_s15, 17  ;;  %p3214_p4 = scmp.ne.s32.totalorder %s3882_s16, 0 }
   0x7   : > { %p3891_p5 = por %p38_p1, %p37_p0  ;;  %s128_s20 = sshll.u32 %s4511_s1, 4  ;;  %s129_s20 = int_to_ptr.hbm [resolvable:$true] %s128_s20 }
   0x8   : > { %p3898_p6 = pnand %p3213_p2, %p116_p3  ;;  %s3822_s22 = smov [#allocation7]  }
   0x9   : > { %s130_s23 = sshll.u32 %s3822_s22, 4  ;;  %s139_s26 = sshll.u32 %s4512_s2, 4  ;;  %s131_s23 = int_to_ptr.vmem [resolvable:$true] %s130_s23  ;;  %s140_s26 = int_to_ptr.hbm [resolvable:$true] %s139_s26 }
   0xa   : > { %p3358_p7 = pneg %p3898_p6  ;;  %s3823_s27 = smov [#allocation9]  }
   0xb   : > { %s141_s28 = sshll.u32 %s3823_s27, 4  ;;  %s3824_s29 = smov 128   ;;  %s142_s28 = int_to_ptr.vmem [resolvable:$true] %s141_s28 }
   0xc   : > { %p3359_p8 = pnand %p3358_p7, %p38_p1  ;;  %s3825_s30 = smov 8  }
   0xd   : > { %s3910_s4 = sadd.s32 1, %s3820_s15   ;;  %s24_s6 = sadd.s32 1, %s3816_s14 }
   0xe   : > { %3361 = dma.hbm_to_vmem [thread:$0]  (!%p3359_p8), %s129_s20, 128, %s131_s23, [#allocation8]  }
   0xf   : > { %3364 = dma.hbm_to_vmem [thread:$0]  (!%p3359_p8), %s140_s26, 9984, %s142_s28, [#allocation8], %s3824_s29, %s3824_s29, %s3825_s30  }
  0x10   : > { %s21_s5 = ssub.s32 %s3820_s15, %s3910_s4  ;;  %p31_p10 = scmp.ne.s32.totalorder %s3816_s14, %s3812_s13 }
  0x11   : > { %p22_p9 = scmp.eq.s32.totalorder %s21_s5, 0  ;;  %p32_p11 = scmp.eq.s32.totalorder %s3820_s15, 0 }
  0x12   : > { %s155_s8 = sand.u32 1, %s3816_s14   ;;  %s3218_s9 = sshll.u32 %s3820_s15, 3 }
  0x13   : > { %s3919_s7 = scalar_select %p22_p9, %s3816_s14, %s24_s6  }
  0x14   : > { %p33_p12 = por %p32_p11, %p31_p10  ;;  %p3371_p13 = scmp.lt.s32.totalorder %s3820_s15, 16 }
  0x15   : > { %s3217_s10 = sshll.u32 %s155_s8, 3  ;;  %s163_s18 = scalar_lea.hbm %s4510_s0, %s3218_s9 }
  0x16   : > { %s165_s19 = sshll.u32 %s163_s18, 4  ;;  %s159_s20 = scalar_lea.vmem [#allocation5], %s3217_s10  ;;  %s166_s19 = int_to_ptr.hbm [resolvable:$true] %s165_s19 }
  0x17   : > { %s167_s22 = sshll.u32 %s159_s20, 4  ;;  %p3927_p0 = pnand %p3371_p13, %p33_p12  ;;  %s168_s22 = int_to_ptr.vmem [resolvable:$true] %s167_s22 }
  0x18   : > { %s156_s24 = scalar_lea.sflag [#allocation6], %s155_s8  ;;  %s3752_s25 = sshra.s32 %s166_s19, 4  ;;  %s3753_s25 = int_to_ptr.hbm [resolvable:$true] %s3752_s25 }
  0x19   : > { %s3754_s26 = scalar_lea.hbm %s3753_s25, 8  ;;  %p3756_p3 = pneg %p3927_p0 }
  0x1a   : > { %p3755_p2 = scmp.ne.s32.totalorder %s3753_s25, %s3754_s26  ;;  %s3759_s28 = scalar_lea.hbm %s4510_s0, 128 }
  0x1b   : > { %p3760_p9 = scmp.lt.s32.totalorder %s3753_s25, %s4510_s0  ;;  %p3761_p10 = scmp.lt.s32.totalorder %s3759_s28, %s3754_s26 }
  0x1c   : > { %p3757_p7 = pnand %p3756_p3, %p3755_p2 }
  0x1d   : > { %p3762_p11 = por %p3761_p10, %p3760_p9 }
  0x1e   : > { %p3758_p8 = pneg %p3757_p7 }
  0x20   : > { %p3763_p12 = pnand %p3762_p11, %p3758_p8 }
  0x22   : > { %3766 = shalt.err (!%p3763_p12)
}
  0x23   : > { %3368 = dma.hbm_to_vmem [thread:$0]  (!%p3927_p0), %s166_s19, 128, %s168_s22, %s156_s24  }
  0x24   : > { %176 = sbr.rel (%p3898_p6) target bundleno = 10657 (0x29a1), region = 32  ;;  %s178_s5 = sand.u32 (!%p3898_p6), 1, %s3812_s13  }
  0x25   : > { %s3944_s6 = sshll.u32 (!%p3898_p6), %s178_s5, 3  ;;  %s179_s8 = scalar_lea.sflag (!%p3898_p6), [#allocation6], %s178_s5 }
  0x26   : > { %s182_s9 = scalar_lea.vmem (!%p3898_p6), [#allocation5], %s3944_s6 }
  0x29   : > { %3799 = dma.done.wait (%p3891_p5), %s179_s8, 128  }
  0x2a   : > { %3801 = vsyncadd (%p3891_p5), %s179_s8, 4294967168 }
  0x2b   : > { %3803 = dma.done.wait (%p38_p1), [#allocation8], 10112  }
  0x2c   : > { %3805 = vsyncadd (%p38_p1), [#allocation8], 4294957184  ;;  %p215_p6 = scmp.lt.s32.totalorder %s3882_s16, 15 }
  0x2d   : > { %222 = sbr.rel (%p3214_p4) target bundleno = 56 (0x38), region = 48 }
  0x2e   : > { %s216_s21 = scalar_select %p215_p6, %s3882_s16, 15 }
  0x30   : > { %s3223_s10 = sshll.u32 %s216_s21, 3 }
  0x31   : > { %s3960_s18 = scalar_lea.vmem %s4513_s3, %s3223_s10 }
  0x32   : > { %v223_v0 = vld [vmem:[#allocation7] sm:$0xff]  ;;  %vm225_vm0 = vcmask 64512   ;;  %v3826_v1 = vmov 0.0  }
  0x33   : > { %224 = vst [vmem:[#allocation2] sm:$0xff] %v223_v0 }
  0x34   : > { %226 = vst.msk [vmem:[#allocation3] sm:$0xff] %vm225_vm0, %v3826_v1 }
  0x35   : > { %227 = vst.msk [vmem:[#allocation3 + $0x8] sm:$0xff] %vm225_vm0, %v3826_v1 }
  0x36   : > { %228 = vst.msk [vmem:[#allocation4] sm:$0xff] %vm225_vm0, %v3826_v1 }
  0x37   : > { %229 = vst.msk [vmem:[#allocation4 + $0x8] sm:$0xff] %vm225_vm0, %v3826_v1 }
  0x38 PF: > { %v247_v2 = vld [vmem:[#allocation9 + $0x250] sm:$0xf]  ;;  %vm248_vm1 = vcmask 31744   ;;  %v275_v4 = vld [vmem:[#allocation9 + $0x258] sm:$0xf]  ;;  %vm304_vm2 = vcmask 24576   ;;  %v233_v33 = vlaneseq }
  0x39   : > { %3225 = vmatpush.xpose.msk.msra.mxu0 %vm248_vm1, %v247_v2  ;;  %3227 = vmatpush.xpose.msk.msra.mxu1 %vm248_vm1, %v275_v4  ;;  %v242_v6 = vld [vmem:[%s182_s9] sm:$0x1]  ;;  %s3827_s17 = smov 4   ;;  %v439_v27 = vld [vmem:[#allocation9] sm:$0xff]  ;;  %s3982_s19 = sadd.s32 2, %s3882_s16  ;;  %vm391_vm9 = vcmask 1046528  }
  0x3a   : > { %v243_v3 = vld [vmem:[#allocation2] sm:$0x1]  ;;  %v246_v8 = vld [vmem:[#allocation2 + $0x3] sm:$0x1]  ;;  %463 = vmatpush.msra.mxu2 %v439_v27  ;;  %p381_p1 = scmp.gt.s32.totalorder %s3982_s19, 12  ;;  %s382_s20 = sadd.s32 1, %s3882_s16 }
  0x3b   : > { %v302_v11 = vsub.f32 %v242_v6, %v246_v8  ;;  %p383_p4 = scmp.lt.s32.totalorder %s382_s20, 11  ;;  %v387_v34 = vld [vmem:[#allocation3] sm:$0xff]  ;;  %v3987_v37 = vshrl.u32 %v233_v33, 7  ;;  %v385_v55 = vld [vmem:[#allocation9 + $0x260] sm:$0xff]  ;;  %vm414_vm13 = vcmask 64512   ;;  %s3828_s16 = smov 116  }
  0x3c   : > { %3226 = vmatmul.msk.f32.vlgmr.msra.gmra.mxu0 %vm248_vm1, %v243_v3  ;;  %v388_v35 = vld [vmem:[#allocation3 + $0x8] sm:$0xff]  ;;  %s399_s22 = scalar_select %p381_p1, 1, 0  ;;  %v392_v38 = vrot.slane %v387_v34, 1  ;;  %v386_v59 = vld [vmem:[#allocation9 + $0x268] sm:$0xff]  ;;  %vm514_vm15 = vcmask 130048  }
  0x3d   : > { %v303_v13 = vmul.f32 %v302_v11, %v302_v11  ;;  %v393_v39 = vrot.slane %v388_v35, 1  ;;  %s4530_s20 = smov (!%p383_p4, %s382_s20), 11  ;;  %v3995_v44 = vadd.s32 8, %v3987_v37  ;;  %v3500_v61 = vld [vmem:[#allocation9 + $0x8] ss:$0 sm:$0xff]  ;;  %s3829_s23 = smov 124  }
  0x3e   : > { %v400_v40 = vstv %s399_s22  ;;  %v404_v45 = vstv %s4530_s20  ;;  %s3830_s24 = smov 120   ;;  %p231_p5 = scmp.lt.s32.totalorder %s3982_s19, 12 }
  0x3f   : > { %v305_v14 = vsel %vm304_vm2, %v303_v13, 0.0  ;;  %v394_v42 = vsel %vm391_vm9, %v392_v38, %v393_v39  ;;  %vm3990_vm10 = vcmp.eq.s32.totalorder %v400_v40, 1  ;;  %v398_v46 = vsel %vm391_vm9, %v393_v39, %v392_v38  ;;  %s3831_s25 = smov 108   ;;  %s3832_s26 = smov 112  }
  0x40   : > { %v402_v49 = vsel %vm3990_vm10, %v394_v42, %v387_v34  ;;  %vm4002_vm11 = vcmp.eq.s32.totalorder %v3987_v37, %v404_v45  ;;  %v403_v52 = vsel %vm3990_vm10, %v398_v46, %v388_v35  ;;  %vm4009_vm12 = vcmp.eq.s32.totalorder %v3995_v44, %v404_v45  ;;  %s4532_s19 = smov (!%p231_p5, %s3982_s19), 12  ;;  %s3833_s15 = smov 100  }
  0x41   : > { %s3834_s27 = smov 104   ;;  %s3841_s28 = smov 12  }
  0x42   : > { %s3842_s29 = smov 8  }
  0xb9   : > { %v3967_v5 = vpop.f32.mrf.mxu0 }
  0xba   : > { %3228 = vmatmul.msk.f32.vlgmr.msra.gmra.mxu1 %vm248_vm1, %v3967_v5 }
 0x137   : > { %v299_v7 = vpop.f32.mrf.mxu1 }
 0x138   : > { %v3973_v9 = vsub.f32 %v242_v6, %v299_v7 }
 0x13a   : > { %v321_v10 = vmul.f32 %v3973_v9, %v3973_v9 }
 0x13c   : > { %v322_v12 = vsel %vm304_vm2, %v321_v10, 0.0  ;;  %v234_v10 = vand.u32 127, %v233_v33 }
 0x13d   : > { %323 = vadd.xlane.f32.xlu0 %v322_v12 }
 0x145   : > { %306 = vadd.xlane.f32.xlu0 %v305_v14 }
 0x1b0   : > { %v324_v15 = vpop.xlane.xlu0 %323 }
 0x1b1   : > { %v325_v16 = vmax.f32 %v324_v15, 1e-24 }
 0x1b3   : > { %3541 = vrsqrt.f32 %v325_v16  ;;  %vm332_vm4 = vweird.f32 %v325_v16 }
 0x1b8   : > { %v307_v25 = vpop.xlane.xlu0 %306 }
 0x1b9   : > { %v3542_v17 = vpop.eup %3541  ;;  %v308_v26 = vmax.f32 %v307_v25, 1e-24 }
 0x1ba   : > { %v327_v18 = vmul.f32 %v3542_v17, %v325_v16  ;;  %vm333_vm3 = vweird.f32 %v3542_v17 }
 0x1bb   : > { %vm334_vm5 = vmor %vm332_vm4, %vm333_vm3  ;;  %3543 = vrsqrt.f32 %v308_v26  ;;  %vm315_vm6 = vweird.f32 %v308_v26 }
 0x1bc   : > { %v328_v19 = vmul.f32 %v3542_v17, %v327_v18 }
 0x1be   : > { %v329_v20 = vmul.f32 0.5, %v328_v19 }
 0x1c0   : > { %v330_v21 = vsub.f32 1.5, %v329_v20 }
 0x1c1   : > { %v3544_v28 = vpop.eup %3543 }
 0x1c2   : > { %v331_v22 = vmul.f32 %v3542_v17, %v330_v21  ;;  %v310_v29 = vmul.f32 %v3544_v28, %v308_v26  ;;  %vm316_vm7 = vweird.f32 %v3544_v28 }
 0x1c3   : > { %vm317_vm8 = vmor %vm315_vm6, %vm316_vm7 }
 0x1c4   : > { %v335_v23 = vsel %vm334_vm5, %v3542_v17, %v331_v22  ;;  %v311_v30 = vmul.f32 %v3544_v28, %v310_v29 }
 0x1c5   : > { %v336_v24 = vmul.f32 %v335_v23, %v3973_v9 }
 0x1c6   : > { %v312_v31 = vmul.f32 0.5, %v311_v30 }
 0x1c7   : > { %372 = vrot.lane.b32.xlu1 %v336_v24, %s3827_s17 }
 0x1c8   : > { %v313_v32 = vsub.f32 1.5, %v312_v31 }
 0x1ca   : > { %v314_v36 = vmul.f32 %v3544_v28, %v313_v32 }
 0x1cc   : > { %v318_v41 = vsel %vm317_vm8, %v3544_v28, %v314_v36  ;;  %vm808_vm8 = vcmask 261120  }
 0x1cd   : > { %v319_v47 = vmul.f32 %v318_v41, %v302_v11  ;;  %v4056_v11 = vstv %s4532_s19 }
 0x1ce   : > { %vm4059_vm14 = vcmp.lt.s32.totalorder %v234_v10, %v4056_v11 }
 0x239   : > { %v373_v48 = vpop.permute.xlu1 %372 }
 0x23a   : > { %v375_v50 = vsel %vm248_vm1, %v319_v47, %v373_v48 }
 0x23b   : > { %v411_v54 = vperm.slane %v375_v50, 0 }
 0x23d   : > { %v412_v56 = vsel %vm4002_vm11, %v411_v54, %v402_v49  ;;  %v413_v57 = vsel %vm4009_vm12, %v411_v54, %v403_v52 }
 0x23e   : > { %415 = vst.msk [vmem:[#allocation3] sm:$0xff] %vm414_vm13, %v412_v56  ;;  %v4018_v58 = vadd.f32 %v412_v56, %v385_v55  ;;  %v4023_v60 = vadd.f32 %v413_v57, %v386_v59 }
 0x23f   : > { %416 = vst.msk [vmem:[#allocation3 + $0x8] sm:$0xff] %vm414_vm13, %v413_v57 }
 0x240   : > { %3229 = vmatmul.msk.f32.vlgmr.msra.gmra.mxu2 %vm414_vm13, %v4018_v58 }
 0x248   : > { %3230 = vmatmul.msk.f32.gmra.mxu2 %vm414_vm13, %v4023_v60 }
 0x2c3   : > { %v465_v62 = vpop.f32.mrf.mxu2 }
 0x2c4   : > { %v4027_v63 = vadd.f32 %v3500_v61, %v465_v62 }
 0x2c6   : > { %576 = vrot.lane.b32.xlu2 %v4027_v63, %s3828_s16 }
 0x2cb   : > { %v468_v0 = vpop.f32.mrf.mxu2 }
 0x2cc   : > { %v4031_v1 = vadd.f32 %v3500_v61, %v468_v0 }
 0x2ce   : > { %574 = vrot.lane.b32.xlu0 %v4031_v1, %s3829_s23  ;;  %578 = vrot.lane.b32.xlu1 %v4031_v1, %s3828_s16  ;;  %v3427_v54 = vpack.i.bf16 %v4027_v63, %v4031_v1 }
 0x2cf   : > { %572 = vrot.lane.b32.xlu2 %v4027_v63, %s3829_s23 }
 0x2d6   : > { %475 = vrot.lane.b32.xlu1 %v4031_v1, %s3830_s24 }
 0x2d7   : > { %473 = vrot.lane.b32.xlu2 %v4027_v63, %s3830_s24 }
 0x320   : > { %v577_v2 = vpop.permute.xlu2 %576 }
 0x329   : > { %v573_v4 = vpop.permute.xlu2 %572 }
 0x331   : > { %v474_v7 = vpop.permute.xlu2 %473 }
 0x340   : > { %v579_v3 = vpop.permute.xlu1 %578  ;;  %v575_v8 = vpop.permute.xlu0 %574 }
 0x341   : > { %3237 = vmatpush.xpose.msk.msrb.mxu1 %vm248_vm1, %v579_v3 }
 0x345   : > { %3238 = vmatpush.xpose.msk.msrb.mxu1 %vm248_vm1, %v577_v2 }
 0x348   : > { %v476_v6 = vpop.permute.xlu1 %475  ;;  %3239 = vmatmul.msk.f32.vlgmr.msrb.gmra.mxu1 %vm248_vm1, %v573_v4 }
 0x349   : > { %3231 = vmatpush.xpose.msk.msra.mxu3 %vm248_vm1, %v476_v6 }
 0x34d   : > { %3232 = vmatpush.xpose.msk.msra.mxu3 %vm248_vm1, %v474_v7 }
 0x350   : > { %3233 = vmatmul.msk.f32.vlgmr.msra.gmra.mxu3 %vm248_vm1, %v4027_v63  ;;  %3240 = vmatmul.msk.f32.gmra.mxu1 %vm248_vm1, %v575_v8 }
 0x358   : > { %3234 = vmatmul.msk.f32.gmra.mxu3 %vm248_vm1, %v4031_v1 }
 0x3c5   : > { %v605_v13 = vpop.f32.mrf.mxu1 }
 0x3c6   : > { %v611_v14 = vmul.f32 0.5, %v605_v13 }
 0x3c8   : > { %v613_v15 = vsel %vm4059_vm14, %v611_v14, -1e+30 }
 0x3c9   : > { %v615_v16 = vsel %vm514_vm15, %v613_v15, -inf }
 0x3ca   : > { %616 = vmax.xlane.f32.xlu1 %v615_v16 }
 0x3cd   : > { %v608_v17 = vpop.f32.mrf.mxu1 }
 0x3ce   : > { %v612_v18 = vmul.f32 0.5, %v608_v17  ;;  %v682_v17 = vld [vmem:[#allocation9 + $0x10] sm:$0xff] }
 0x3cf   : > { %706 = vmatpush.msrb.mxu3 %v682_v17 }
 0x3d0   : > { %v614_v19 = vsel %vm4059_vm14, %v612_v18, -1e+30 }
 0x3d1   : > { %v618_v20 = vsel %vm514_vm15, %v614_v19, -inf }
 0x3d2   : > { %619 = vmax.xlane.f32.xlu2 %v618_v20 }
 0x3d3   : > { %v502_v21 = vpop.f32.mrf.mxu3 }
 0x3d4   : > { %v508_v22 = vmul.f32 0.5, %v502_v21 }
 0x3d6   : > { %v512_v23 = vsel %vm4059_vm14, %v508_v22, -1e+30 }
 0x3d7   : > { %v515_v24 = vsel %vm514_vm15, %v512_v23, -inf }
 0x3d8   : > { %516 = vmax.xlane.f32.xlu0 %v515_v24  ;;  %v3501_v24 = vld [vmem:[#allocation9 + $0x18] ss:$0 sm:$0xff] }
 0x3db   : > { %v505_v25 = vpop.f32.mrf.mxu3 }
 0x3dc   : > { %v509_v26 = vmul.f32 0.5, %v505_v25 }
 0x3de   : > { %v513_v27 = vsel %vm4059_vm14, %v509_v26, -1e+30 }
 0x3df   : > { %v518_v28 = vsel %vm514_vm15, %v513_v27, -inf }
 0x3e0   : > { %519 = vmax.xlane.f32.xlu1 %v518_v28 }
 0x43d   : > { %v617_v29 = vpop.xlane.xlu1 %616 }
 0x43e   : > { %v621_v30 = vsub.f32 %v613_v15, %v617_v29 }
 0x440   : > { %v623_v31 = vmul.f32 1.442695, %v621_v30 }
 0x442   : > { %3545 = vpow2.f32 %v623_v31 }
 0x445   : > { %v620_v32 = vpop.xlane.xlu2 %619 }
 0x446   : > { %v622_v33 = vsub.f32 %v614_v19, %v620_v32 }
 0x448   : > { %v3546_v34 = vpop.eup %3545  ;;  %v625_v35 = vmul.f32 1.442695, %v622_v33 }
 0x449   : > { %v627_v36 = vsel %vm514_vm15, %v3546_v34, 0.0 }
 0x44a   : > { %3547 = vpow2.f32 %v625_v35  ;;  %628 = vadd.xlane.f32.xlu2 %v627_v36 }
 0x44b   : > { %v517_v38 = vpop.xlane.xlu0 %516 }
 0x44c   : > { %v521_v39 = vsub.f32 %v512_v23, %v517_v38 }
 0x44e   : > { %v523_v40 = vmul.f32 1.442695, %v521_v39 }
 0x450   : > { %v3548_v41 = vpop.eup %3547  ;;  %3549 = vpow2.f32 %v523_v40 }
 0x451   : > { %v630_v42 = vsel %vm514_vm15, %v3548_v41, 0.0 }
 0x452   : > { %631 = vadd.xlane.f32.xlu1 %v630_v42 }
 0x453   : > { %v520_v45 = vpop.xlane.xlu1 %519 }
 0x454   : > { %v522_v46 = vsub.f32 %v513_v27, %v520_v45  ;;  %v768_v45 = vld [vmem:[#allocation9 + $0xd0] sm:$0xff] }
 0x456   : > { %v3550_v47 = vpop.eup %3549  ;;  %v525_v48 = vmul.f32 1.442695, %v522_v46 }
 0x457   : > { %v527_v49 = vsel %vm514_vm15, %v3550_v47, 0.0 }
 0x458   : > { %3551 = vpow2.f32 %v525_v48  ;;  %528 = vadd.xlane.f32.xlu0 %v527_v49  ;;  %v805_v48 = vld [vmem:[#allocation9 + $0xf8] sm:$0xff] }
 0x459   : > { %827 = vmatpush.msra.mxu1 %v805_v48  ;;  %v892_v48 = vld [vmem:[#allocation9 + $0x20] sm:$0xff] }
 0x45e   : > { %v3552_v50 = vpop.eup %3551 }
 0x45f   : > { %v530_v52 = vsel %vm514_vm15, %v3552_v50, 0.0 }
 0x460   : > { %531 = vadd.xlane.f32.xlu0 %v530_v52 }
 0x462   : > { %3428 = vrot.lane.b32.xlu2 %v3427_v54, %s3831_s25 }
 0x46b   : > { %3433 = vrot.lane.b32.xlu1 %v3427_v54, %s3832_s26 }
 0x4bd   : > { %v629_v55 = vpop.xlane.xlu2 %628 }
 0x4be   : > { %3553 = vrcp.f32 %v629_v55 }
 0x4c4   : > { %v3554_v59 = vpop.eup %3553 }
 0x4c5   : > { %v3429_v56 = vpop.permute.xlu2 %3428  ;;  %v632_v57 = vpop.xlane.xlu1 %631  ;;  %v635_v0 = vmul.f32 %v3554_v59, %v3546_v34 }
 0x4c6   : > { %v3430_v61 = vunpack.i.l.bf16 %v3429_v56  ;;  %3555 = vrcp.f32 %v632_v57  ;;  %v3431_v62 = vunpack.i.h.bf16 %v3429_v56 }
 0x4c8   : > { %663 = vmatpush.msrb.mxu2 %v3430_v61 }
 0x4ca   : > { %664 = vmatpush.msrb.mxu2 %v3431_v62 }
 0x4cb   : > { %3241 = vmatmul.msk.f32.vlgmr.msrb.gmra.mxu2 %vm514_vm15, %v635_v0  ;;  %v529_v2 = vpop.xlane.xlu0 %528 }
 0x4cc   : > { %v3556_v63 = vpop.eup %3555  ;;  %3557 = vrcp.f32 %v529_v2  ;;  %916 = vmatpush.msra.mxu2 %v892_v48 }
 0x4cd   : > { %v636_v1 = vmul.f32 %v3556_v63, %v3548_v41  ;;  %v3502_v63 = vld [vmem:[#allocation9 + $0xc9] ss:$0 sm:$0xff] }
 0x4d2   : > { %v3558_v6 = vpop.eup %3557 }
 0x4d3   : > { %3242 = vmatmul.msk.f32.gmra.mxu2 %vm514_vm15, %v636_v1  ;;  %v532_v3 = vpop.xlane.xlu0 %531  ;;  %v535_v10 = vmul.f32 %v3558_v6, %v3550_v47 }
 0x4d4   : > { %3559 = vrcp.f32 %v532_v3 }
 0x4da   : > { %v3560_v13 = vpop.eup %3559 }
 0x4db   : > { %v536_v14 = vmul.f32 %v3560_v13, %v3552_v50 }
 0x4dd   : > { %v3434_v4 = vpop.permute.xlu1 %3433 }
 0x4de   : > { %v3435_v7 = vunpack.i.l.bf16 %v3434_v4  ;;  %v3436_v8 = vunpack.i.h.bf16 %v3434_v4  ;;  %v3503_v4 = vld [vmem:[#allocation9 + $0xca] ss:$0 sm:$0xff] }
 0x4e0   : > { %563 = vmatpush.msrb.mxu0 %v3435_v7 }
 0x4e2   : > { %564 = vmatpush.msrb.mxu0 %v3436_v8 }
 0x4e3   : > { %3235 = vmatmul.msk.f32.vlgmr.msrb.gmra.mxu0 %vm514_vm15, %v535_v10 }
 0x4e4   : > { %792 = vmatpush.msra.mxu0 %v768_v45 }
 0x4eb   : > { %3236 = vmatmul.msk.f32.gmra.mxu0 %vm514_vm15, %v536_v14 }
 0x54e   : > { %v666_v15 = vpop.f32.mrf.mxu2 }
 0x54f   : > { %674 = vrot.lane.b32.xlu0 %v666_v15, %s3827_s17 }
 0x556   : > { %v669_v16 = vpop.f32.mrf.mxu2 }
 0x557   : > { %676 = vrot.lane.b32.xlu2 %v669_v16, %s3827_s17 }
 0x560   : > { %v566_v18 = vpop.f32.mrf.mxu0 }
 0x568   : > { %v569_v22 = vpop.f32.mrf.mxu0 }
 0x5b1   : > { %v677_v21 = vpop.permute.xlu2 %676 }
 0x5b2   : > { %v681_v23 = vsel %vm248_vm1, %v569_v22, %v677_v21  ;;  %v3504_v21 = vld [vmem:[#allocation9 + $0xd8] ss:$0 sm:$0xff] }
 0x5c1   : > { %v675_v19 = vpop.permute.xlu0 %674 }
 0x5c2   : > { %v680_v20 = vsel %vm248_vm1, %v566_v18, %v675_v19  ;;  %v804_v18 = vld [vmem:[#allocation9 + $0xf0] sm:$0xff]  ;;  %v803_v19 = vld [vmem:[#allocation9 + $0xe8] sm:$0xff] }
 0x5c3   : > { %3243 = vmatmul.msk.f32.vlgmr.msrb.gmra.mxu3 %vm414_vm13, %v680_v20  ;;  %828 = vmatpush.msra.mxu1 %v804_v18  ;;  %v802_v20 = vld [vmem:[#allocation9 + $0xe0] sm:$0xff] }
 0x5c5   : > { %829 = vmatpush.msra.mxu1 %v803_v19 }
 0x5c7   : > { %830 = vmatpush.msra.mxu1 %v802_v20 }
 0x5cb   : > { %3244 = vmatmul.msk.f32.gmra.mxu3 %vm414_vm13, %v681_v23 }
 0x646   : > { %v708_v25 = vpop.f32.mrf.mxu3 }
 0x647   : > { %v709_v26 = vadd.f32 %v3501_v24, %v708_v25 }
 0x649   : > { %v714_v27 = vadd.f32 %v709_v26, %v4018_v58 }
 0x64b   : > { %v716_v28 = vsel %vm414_vm13, %v714_v27, 0.0 }
 0x64c   : > { %717 = vadd.xlane.f32.xlu2 %v716_v28  ;;  %v3505_v28 = vld [vmem:[#allocation9 + $0x100] ss:$0 sm:$0xff] }
 0x64e   : > { %v711_v29 = vpop.f32.mrf.mxu3 }
 0x64f   : > { %v712_v30 = vadd.f32 %v3501_v24, %v711_v29 }
 0x651   : > { %v715_v31 = vadd.f32 %v712_v30, %v4023_v60 }
 0x653   : > { %v719_v32 = vsel %vm414_vm13, %v715_v31, 0.0 }
 0x654   : > { %720 = vadd.xlane.f32.xlu1 %v719_v32 }
 0x6bf   : > { %v718_v33 = vpop.xlane.xlu2 %717 }
 0x6c0   : > { %v722_v34 = vmul.f32 0.125, %v718_v33 }
 0x6c2   : > { %v724_v35 = vsub.f32 %v714_v27, %v722_v34 }
 0x6c4   : > { %v726_v36 = vmul.f32 %v724_v35, %v724_v35 }
 0x6c6   : > { %v728_v38 = vsel %vm414_vm13, %v726_v36, 0.0 }
 0x6c7   : > { %v721_v39 = vpop.xlane.xlu1 %720  ;;  %729 = vadd.xlane.f32.xlu0 %v728_v38 }
 0x6c8   : > { %v723_v40 = vmul.f32 0.125, %v721_v39 }
 0x6ca   : > { %v725_v58 = vsub.f32 %v715_v31, %v723_v40 }
 0x6cc   : > { %v727_v41 = vmul.f32 %v725_v58, %v725_v58 }
 0x6ce   : > { %v731_v42 = vsel %vm414_vm13, %v727_v41, 0.0 }
 0x6cf   : > { %732 = vadd.xlane.f32.xlu2 %v731_v42 }
 0x73a   : > { %v730_v60 = vpop.xlane.xlu0 %729 }
 0x73b   : > { %v734_v46 = vmul.f32 0.125, %v730_v60 }
 0x73d   : > { %v736_v47 = vadd.f32 1e-05, %v734_v46 }
 0x73f   : > { %3561 = vrsqrt.f32 %v736_v47  ;;  %vm744_vm3 = vweird.f32 %v736_v47 }
 0x742   : > { %v733_v49 = vpop.xlane.xlu2 %732 }
 0x743   : > { %v735_v50 = vmul.f32 0.125, %v733_v49 }
 0x745   : > { %v3562_v52 = vpop.eup %3561  ;;  %v737_v54 = vadd.f32 1e-05, %v735_v50 }
 0x746   : > { %v739_v55 = vmul.f32 %v3562_v52, %v736_v47  ;;  %vm745_vm0 = vweird.f32 %v3562_v52 }
 0x747   : > { %3563 = vrsqrt.f32 %v737_v54  ;;  %vm746_vm4 = vmor %vm744_vm3, %vm745_vm0  ;;  %vm754_vm6 = vweird.f32 %v737_v54 }
 0x748   : > { %v740_v56 = vmul.f32 %v3562_v52, %v739_v55 }
 0x74a   : > { %v741_v57 = vmul.f32 0.5, %v740_v56 }
 0x74c   : > { %v742_v59 = vsub.f32 1.5, %v741_v57 }
 0x74d   : > { %v3564_v61 = vpop.eup %3563 }
 0x74e   : > { %v743_v62 = vmul.f32 %v3562_v52, %v742_v59  ;;  %v749_v0 = vmul.f32 %v3564_v61, %v737_v54  ;;  %vm755_vm5 = vweird.f32 %v3564_v61 }
 0x74f   : > { %vm756_vm7 = vmor %vm754_vm6, %vm755_vm5 }
 0x750   : > { %v747_v1 = vsel %vm746_vm4, %v3562_v52, %v743_v62  ;;  %v750_v2 = vmul.f32 %v3564_v61, %v749_v0 }
 0x751   : > { %v758_v3 = vmul.f32 %v747_v1, %v724_v35 }
 0x752   : > { %v751_v6 = vmul.f32 0.5, %v750_v2 }
 0x753   : > { %v762_v7 = vmul.f32 %v3502_v63, %v758_v3  ;;  %v3506_v3 = vld [vmem:[#allocation9 + $0xcb] ss:$0 sm:$0xff] }
 0x754   : > { %v752_v8 = vsub.f32 1.5, %v751_v6 }
 0x755   : > { %v766_v10 = vadd.f32 %v3503_v4, %v762_v7 }
 0x756   : > { %v753_v13 = vmul.f32 %v3564_v61, %v752_v8  ;;  %v3507_v8 = vld [vmem:[#allocation9 + $0xcc] ss:$0 sm:$0xff] }
 0x757   : > { %3245 = vmatmul.msk.f32.vlgmr.msra.gmra.mxu0 %vm414_vm13, %v766_v10 }
 0x758   : > { %v757_v14 = vsel %vm756_vm7, %v3564_v61, %v753_v13 }
 0x759   : > { %v759_v15 = vmul.f32 %v757_v14, %v725_v58 }
 0x75b   : > { %v763_v16 = vmul.f32 %v3502_v63, %v759_v15 }
 0x75d   : > { %v767_v17 = vadd.f32 %v3503_v4, %v763_v16 }
 0x75f   : > { %3246 = vmatmul.msk.f32.gmra.mxu0 %vm414_vm13, %v767_v17 }
 0x7d4   : > { %v794_v22 = vpop.f32.mrf.mxu0 }
 0x7d5   : > { %v795_v23 = vadd.f32 %v3504_v21, %v794_v22 }
 0x7d7   : > { %v800_v24 = vmax.f32 %v795_v23, 0.0 }
 0x7d9   : > { %3247 = vmatmul.msk.f32.vlgmr.msra.gmra.mxu1 %vm808_vm8, %v800_v24 }
 0x7dc   : > { %v797_v25 = vpop.f32.mrf.mxu0 }
 0x7dd   : > { %v798_v26 = vadd.f32 %v3504_v21, %v797_v25  ;;  %v3508_v21 = vld [vmem:[#allocation9 + $0x28] ss:$0 sm:$0xff] }
 0x7df   : > { %v801_v27 = vmax.f32 %v798_v26, 0.0 }
 0x7e1   : > { %3248 = vmatmul.msk.f32.gmra.mxu1 %vm808_vm8, %v801_v27 }
 0x856   : > { %v832_v29 = vpop.f32.mrf.mxu1 }
 0x857   : > { %v833_v30 = vadd.f32 %v3505_v28, %v832_v29 }
 0x859   : > { %v838_v31 = vadd.f32 %v833_v30, %v766_v10 }
 0x85b   : > { %v840_v32 = vsel %vm414_vm13, %v838_v31, 0.0 }
 0x85c   : > { %841 = vadd.xlane.f32.xlu1 %v840_v32 }
 0x85e   : > { %v835_v33 = vpop.f32.mrf.mxu1 }
 0x85f   : > { %v836_v34 = vadd.f32 %v3505_v28, %v835_v33 }
 0x861   : > { %v839_v35 = vadd.f32 %v836_v34, %v767_v17 }
 0x863   : > { %v843_v36 = vsel %vm414_vm13, %v839_v35, 0.0 }
 0x864   : > { %844 = vadd.xlane.f32.xlu2 %v843_v36 }
 0x8cf   : > { %v842_v38 = vpop.xlane.xlu1 %841 }
 0x8d0   : > { %v846_v39 = vmul.f32 0.125, %v842_v38 }
 0x8d2   : > { %v848_v40 = vsub.f32 %v838_v31, %v846_v39 }
 0x8d4   : > { %v850_v58 = vmul.f32 %v848_v40, %v848_v40 }
 0x8d6   : > { %v852_v41 = vsel %vm414_vm13, %v850_v58, 0.0 }
 0x8d7   : > { %853 = vadd.xlane.f32.xlu0 %v852_v41  ;;  %v845_v42 = vpop.xlane.xlu2 %844 }
 0x8d8   : > { %v847_v45 = vmul.f32 0.125, %v845_v42 }
 0x8da   : > { %v849_v60 = vsub.f32 %v839_v35, %v847_v45 }
 0x8dc   : > { %v851_v46 = vmul.f32 %v849_v60, %v849_v60 }
 0x8de   : > { %v855_v47 = vsel %vm414_vm13, %v851_v46, 0.0 }
 0x8df   : > { %856 = vadd.xlane.f32.xlu1 %v855_v47 }
 0x94a   : > { %v854_v49 = vpop.xlane.xlu0 %853 }
 0x94b   : > { %v858_v50 = vmul.f32 0.125, %v854_v49 }
 0x94d   : > { %v860_v52 = vadd.f32 1e-05, %v858_v50 }
 0x94f   : > { %3565 = vrsqrt.f32 %v860_v52  ;;  %vm868_vm3 = vweird.f32 %v860_v52 }
 0x952   : > { %v857_v54 = vpop.xlane.xlu1 %856 }
 0x953   : > { %v859_v55 = vmul.f32 0.125, %v857_v54 }
 0x955   : > { %v3566_v56 = vpop.eup %3565  ;;  %v861_v57 = vadd.f32 1e-05, %v859_v55 }
 0x956   : > { %v863_v59 = vmul.f32 %v3566_v56, %v860_v52  ;;  %vm869_vm0 = vweird.f32 %v3566_v56 }
 0x957   : > { %3567 = vrsqrt.f32 %v861_v57  ;;  %vm870_vm4 = vmor %vm868_vm3, %vm869_vm0  ;;  %vm878_vm6 = vweird.f32 %v861_v57 }
 0x958   : > { %v864_v61 = vmul.f32 %v3566_v56, %v863_v59 }
 0x95a   : > { %v865_v62 = vmul.f32 0.5, %v864_v61 }
 0x95c   : > { %v866_v0 = vsub.f32 1.5, %v865_v62 }
 0x95d   : > { %v3568_v63 = vpop.eup %3567 }
 0x95e   : > { %v867_v1 = vmul.f32 %v3566_v56, %v866_v0  ;;  %v873_v2 = vmul.f32 %v3568_v63, %v861_v57  ;;  %vm879_vm5 = vweird.f32 %v3568_v63 }
 0x95f   : > { %vm880_vm7 = vmor %vm878_vm6, %vm879_vm5 }
 0x960   : > { %v871_v4 = vsel %vm870_vm4, %v3566_v56, %v867_v1  ;;  %v874_v6 = vmul.f32 %v3568_v63, %v873_v2 }
 0x961   : > { %v882_v7 = vmul.f32 %v871_v4, %v848_v40 }
 0x962   : > { %v875_v10 = vmul.f32 0.5, %v874_v6 }
 0x963   : > { %v886_v13 = vmul.f32 %v3506_v3, %v882_v7 }
 0x964   : > { %v876_v14 = vsub.f32 1.5, %v875_v10 }
 0x965   : > { %v4107_v15 = vadd.f32 %v3507_v8, %v886_v13 }
 0x966   : > { %v877_v16 = vmul.f32 %v3568_v63, %v876_v14 }
 0x967   : > { %3249 = vmatmul.msk.f32.vlgmr.msra.gmra.mxu2 %vm414_vm13, %v4107_v15 }
 0x968   : > { %v881_v17 = vsel %vm880_vm7, %v3568_v63, %v877_v16 }
 0x969   : > { %v883_v18 = vmul.f32 %v881_v17, %v849_v60 }
 0x96b   : > { %v887_v19 = vmul.f32 %v3506_v3, %v883_v18 }
 0x96d   : > { %v4111_v20 = vadd.f32 %v3507_v8, %v887_v19 }
 0x96f   : > { %3250 = vmatmul.msk.f32.gmra.mxu2 %vm414_vm13, %v4111_v20 }
 0x9ea   : > { %v918_v22 = vpop.f32.mrf.mxu2 }
 0x9eb   : > { %v919_v23 = vadd.f32 %v3508_v21, %v918_v22 }
 0x9ed   : > { %1026 = vrot.lane.b32.xlu0 %v919_v23, %s3828_s16  ;;  %1022 = vrot.lane.b32.xlu1 %v919_v23, %s3829_s23 }
 0x9f2   : > { %v921_v24 = vpop.f32.mrf.mxu2 }
 0x9f3   : > { %v922_v25 = vadd.f32 %v3508_v21, %v921_v24 }
 0x9f5   : > { %926 = vrot.lane.b32.xlu1 %v919_v23, %s3830_s24  ;;  %1024 = vrot.lane.b32.xlu0 %v922_v25, %s3829_s23  ;;  %v3437_v49 = vpack.i.bf16 %v919_v23, %v922_v25 }
 0x9f6   : > { %1028 = vrot.lane.b32.xlu2 %v922_v25, %s3828_s16 }
 0x9fe   : > { %928 = vrot.lane.b32.xlu2 %v922_v25, %s3830_s24 }
 0xa50   : > { %v1029_v26 = vpop.permute.xlu2 %1028 }
 0xa51   : > { %3257 = vmatpush.xpose.msk.msrb.mxu1 %vm248_vm1, %v1029_v26 }
 0xa58   : > { %v929_v27 = vpop.permute.xlu2 %928 }
 0xa59   : > { %3251 = vmatpush.xpose.msk.msra.mxu3 %vm248_vm1, %v929_v27 }
 0xa5f   : > { %v1027_v28 = vpop.permute.xlu0 %1026  ;;  %v1023_v29 = vpop.permute.xlu1 %1022 }
 0xa60   : > { %3258 = vmatpush.xpose.msk.msrb.mxu1 %vm248_vm1, %v1027_v28 }
 0xa63   : > { %3259 = vmatmul.msk.f32.vlgmr.msrb.gmra.mxu1 %vm248_vm1, %v1023_v29 }
 0xa67   : > { %v927_v30 = vpop.permute.xlu1 %926  ;;  %v1025_v31 = vpop.permute.xlu0 %1024 }
 0xa68   : > { %3252 = vmatpush.xpose.msk.msra.mxu3 %vm248_vm1, %v927_v30 }
 0xa6b   : > { %3253 = vmatmul.msk.f32.vlgmr.msra.gmra.mxu3 %vm248_vm1, %v919_v23  ;;  %3260 = vmatmul.msk.f32.gmra.mxu1 %vm248_vm1, %v1025_v31 }
 0xa73   : > { %3254 = vmatmul.msk.f32.gmra.mxu3 %vm248_vm1, %v922_v25 }
 0xae0   : > { %v1055_v32 = vpop.f32.mrf.mxu1 }
 0xae1   : > { %v1061_v33 = vmul.f32 0.5, %v1055_v32 }
 0xae3   : > { %v1063_v34 = vsel %vm4059_vm14, %v1061_v33, -1e+30 }
 0xae4   : > { %v1065_v35 = vsel %vm514_vm15, %v1063_v34, -inf }
 0xae5   : > { %1066 = vmax.xlane.f32.xlu0 %v1065_v35 }
 0xae8   : > { %v1058_v36 = vpop.f32.mrf.mxu1 }
 0xae9   : > { %v1062_v38 = vmul.f32 0.5, %v1058_v36  ;;  %v1132_v36 = vld [vmem:[#allocation9 + $0x30] sm:$0xff] }
 0xaea   : > { %1156 = vmatpush.msrb.mxu3 %v1132_v36 }
 0xaeb   : > { %v1064_v39 = vsel %vm4059_vm14, %v1062_v38, -1e+30 }
 0xaec   : > { %v1068_v40 = vsel %vm514_vm15, %v1064_v39, -inf }
 0xaed   : > { %1069 = vmax.xlane.f32.xlu2 %v1068_v40 }
 0xaee   : > { %v955_v58 = vpop.f32.mrf.mxu3 }
 0xaef   : > { %v961_v41 = vmul.f32 0.5, %v955_v58 }
 0xaf1   : > { %v963_v42 = vsel %vm4059_vm14, %v961_v41, -1e+30 }
 0xaf2   : > { %v965_v45 = vsel %vm514_vm15, %v963_v42, -inf }
 0xaf3   : > { %966 = vmax.xlane.f32.xlu1 %v965_v45  ;;  %v3509_v45 = vld [vmem:[#allocation9 + $0x38] ss:$0 sm:$0xff] }
 0xaf6   : > { %v958_v60 = vpop.f32.mrf.mxu3 }
 0xaf7   : > { %v962_v46 = vmul.f32 0.5, %v958_v60 }
 0xaf9   : > { %v964_v47 = vsel %vm4059_vm14, %v962_v46, -1e+30 }
 0xafa   : > { %v968_v48 = vsel %vm514_vm15, %v964_v47, -inf }
 0xafb   : > { %969 = vmax.xlane.f32.xlu2 %v968_v48 }
 0xb0c   : > { %3438 = vrot.lane.b32.xlu1 %v3437_v49, %s3831_s25 }
 0xb58   : > { %v1067_v50 = vpop.xlane.xlu0 %1066 }
 0xb59   : > { %v1071_v52 = vsub.f32 %v1063_v34, %v1067_v50 }
 0xb5b   : > { %v1073_v54 = vmul.f32 1.442695, %v1071_v52 }
 0xb5d   : > { %3569 = vpow2.f32 %v1073_v54 }
 0xb60   : > { %v1070_v55 = vpop.xlane.xlu2 %1069 }
 0xb61   : > { %v1072_v56 = vsub.f32 %v1064_v39, %v1070_v55 }
 0xb63   : > { %v3570_v57 = vpop.eup %3569  ;;  %v1075_v59 = vmul.f32 1.442695, %v1072_v56 }
 0xb64   : > { %v1077_v61 = vsel %vm514_vm15, %v3570_v57, 0.0 }
 0xb65   : > { %3571 = vpow2.f32 %v1075_v59  ;;  %1078 = vadd.xlane.f32.xlu0 %v1077_v61 }
 0xb66   : > { %v967_v62 = vpop.xlane.xlu1 %966 }
 0xb67   : > { %v971_v0 = vsub.f32 %v963_v42, %v967_v62 }
 0xb69   : > { %v973_v63 = vmul.f32 1.442695, %v971_v0 }
 0xb6b   : > { %v3572_v1 = vpop.eup %3571  ;;  %3573 = vpow2.f32 %v973_v63 }
 0xb6c   : > { %v1080_v2 = vsel %vm514_vm15, %v3572_v1, 0.0 }
 0xb6d   : > { %1081 = vadd.xlane.f32.xlu0 %v1080_v2  ;;  %v1218_v2 = vld [vmem:[#allocation9 + $0x108] sm:$0xff] }
 0xb6e   : > { %v970_v3 = vpop.xlane.xlu2 %969 }
 0xb6f   : > { %v972_v4 = vsub.f32 %v964_v47, %v970_v3 }
 0xb71   : > { %v3574_v6 = vpop.eup %3573  ;;  %v975_v7 = vmul.f32 1.442695, %v972_v4 }
 0xb72   : > { %v977_v8 = vsel %vm514_vm15, %v3574_v6, 0.0 }
 0xb73   : > { %3575 = vpow2.f32 %v975_v7  ;;  %978 = vadd.xlane.f32.xlu2 %v977_v8 }
 0xb79   : > { %v3576_v10 = vpop.eup %3575 }
 0xb7a   : > { %v980_v13 = vsel %vm514_vm15, %v3576_v10, 0.0 }
 0xb7b   : > { %981 = vadd.xlane.f32.xlu2 %v980_v13 }
 0xb7e   : > { %v3439_v14 = vpop.permute.xlu1 %3438 }
 0xb7f   : > { %v3440_v16 = vunpack.i.l.bf16 %v3439_v14  ;;  %v3441_v17 = vunpack.i.h.bf16 %v3439_v14  ;;  %v245_v14 = vld [vmem:[#allocation2 + $0x2] sm:$0x1] }
 0xb81   : > { %3443 = vrot.lane.b32.xlu0 %v3437_v49, %s3832_s26  ;;  %1113 = vmatpush.msrb.mxu2 %v3440_v16  ;;  %v3687_v16 = vld [vmem:[#allocation2] sm:$0x1] }
 0xb83   : > { %1114 = vmatpush.msrb.mxu2 %v3441_v17  ;;  %v4163_v17 = vsub.f32 %v3687_v16, %v245_v14 }
 0xbd8   : > { %v1079_v18 = vpop.xlane.xlu0 %1078 }
 0xbd9   : > { %3577 = vrcp.f32 %v1079_v18 }
 0xbdf   : > { %v3578_v19 = vpop.eup %3577 }
 0xbe0   : > { %v1085_v21 = vmul.f32 %v3578_v19, %v3570_v57  ;;  %v1082_v22 = vpop.xlane.xlu0 %1081  ;;  %v3510_v19 = vld [vmem:[#allocation9 + $0x101] ss:$0 sm:$0xff] }
 0xbe1   : > { %3579 = vrcp.f32 %v1082_v22 }
 0xbe2   : > { %3261 = vmatmul.msk.f32.vlgmr.msrb.gmra.mxu2 %vm514_vm15, %v1085_v21  ;;  %v355_v21 = vmul.f32 %v4163_v17, %v4163_v17 }
 0xbe6   : > { %v979_v25 = vpop.xlane.xlu2 %978 }
 0xbe7   : > { %v3580_v23 = vpop.eup %3579  ;;  %3581 = vrcp.f32 %v979_v25  ;;  %v356_v25 = vsel %vm304_vm2, %v355_v21, 0.0 }
 0xbe8   : > { %v1086_v24 = vmul.f32 %v3580_v23, %v3572_v1 }
 0xbea   : > { %3262 = vmatmul.msk.f32.gmra.mxu2 %vm514_vm15, %v1086_v24  ;;  %v3511_v24 = vld [vmem:[#allocation9 + $0x102] ss:$0 sm:$0xff] }
 0xbed   : > { %v3582_v28 = vpop.eup %3581 }
 0xbee   : > { %v982_v26 = vpop.xlane.xlu2 %981  ;;  %v985_v31 = vmul.f32 %v3582_v28, %v3574_v6  ;;  %v1255_v28 = vld [vmem:[#allocation9 + $0x130] sm:$0xff] }
 0xbef   : > { %3583 = vrcp.f32 %v982_v26  ;;  %1276 = vmatpush.msra.mxu1 %v1255_v28 }
 0xbf3   : > { %v3444_v27 = vpop.permute.xlu0 %3443 }
 0xbf4   : > { %v3445_v29 = vunpack.i.l.bf16 %v3444_v27  ;;  %v3446_v30 = vunpack.i.h.bf16 %v3444_v27 }
 0xbf5   : > { %v3584_v32 = vpop.eup %3583 }
 0xbf6   : > { %1013 = vmatpush.msrb.mxu0 %v3445_v29  ;;  %v986_v33 = vmul.f32 %v3584_v32, %v3576_v10 }
 0xbf8   : > { %1014 = vmatpush.msrb.mxu0 %v3446_v30 }
 0xbf9   : > { %3255 = vmatmul.msk.f32.vlgmr.msrb.gmra.mxu0 %vm514_vm15, %v985_v31 }
 0xbfa   : > { %1242 = vmatpush.msra.mxu0 %v1218_v2 }
 0xc01   : > { %3256 = vmatmul.msk.f32.gmra.mxu0 %vm514_vm15, %v986_v33 }
 0xc65   : > { %v1116_v34 = vpop.f32.mrf.mxu2 }
 0xc66   : > { %1124 = vrot.lane.b32.xlu2 %v1116_v34, %s3827_s17 }
 0xc6d   : > { %v1119_v35 = vpop.f32.mrf.mxu2 }
 0xc6e   : > { %1126 = vrot.lane.b32.xlu1 %v1119_v35, %s3827_s17 }
 0xc76   : > { %v1016_v38 = vpop.f32.mrf.mxu0 }
 0xc7e   : > { %v1019_v58 = vpop.f32.mrf.mxu0 }
 0xcc0   : > { %v1125_v39 = vpop.permute.xlu2 %1124 }
 0xcc1   : > { %v1130_v40 = vsel %vm248_vm1, %v1016_v38, %v1125_v39 }
 0xcc2   : > { %3263 = vmatmul.msk.f32.vlgmr.msrb.gmra.mxu3 %vm414_vm13, %v1130_v40 }
 0xce0   : > { %v1127_v41 = vpop.permute.xlu1 %1126 }
 0xce1   : > { %v1131_v42 = vsel %vm248_vm1, %v1019_v58, %v1127_v41 }
 0xce2   : > { %3264 = vmatmul.msk.f32.gmra.mxu3 %vm414_vm13, %v1131_v42  ;;  %v1254_v42 = vld [vmem:[#allocation9 + $0x128] sm:$0xff] }
 0xce3   : > { %1277 = vmatpush.msra.mxu1 %v1254_v42 }
 0xd45   : > { %v1158_v60 = vpop.f32.mrf.mxu3 }
 0xd46   : > { %v1159_v46 = vadd.f32 %v3509_v45, %v1158_v60  ;;  %v1252_v60 = vld [vmem:[#allocation9 + $0x118] sm:$0xff] }
 0xd48   : > { %v1164_v47 = vadd.f32 %v1159_v46, %v4107_v15  ;;  %v244_v46 = vld [vmem:[#allocation2 + $0x1] sm:$0x1] }
 0xd4a   : > { %v1166_v48 = vsel %vm414_vm13, %v1164_v47, 0.0 }
 0xd4b   : > { %1167 = vadd.xlane.f32.xlu0 %v1166_v48 }
 0xd65   : > { %v1161_v49 = vpop.f32.mrf.mxu3 }
 0xd66   : > { %v1162_v50 = vadd.f32 %v3509_v45, %v1161_v49  ;;  %v1253_v45 = vld [vmem:[#allocation9 + $0x120] sm:$0xff] }
 0xd67   : > { %1278 = vmatpush.msra.mxu1 %v1253_v45  ;;  %v3689_v45 = vld [vmem:[#allocation9 + $0x268] sm:$0xff] }
 0xd68   : > { %v1165_v52 = vadd.f32 %v1162_v50, %v4111_v20 }
 0xd69   : > { %1279 = vmatpush.msra.mxu1 %v1252_v60 }
 0xd6a   : > { %v1169_v54 = vsel %vm414_vm13, %v1165_v52, 0.0 }
 0xd6b   : > { %1170 = vadd.xlane.f32.xlu1 %v1169_v54 }
 0xd73   : > { %357 = vadd.xlane.f32.xlu1 %v356_v25 }
 0xdbe   : > { %v1168_v55 = vpop.xlane.xlu0 %1167 }
 0xdbf   : > { %v1172_v56 = vmul.f32 0.125, %v1168_v55 }
 0xdc1   : > { %v1174_v57 = vsub.f32 %v1164_v47, %v1172_v56  ;;  %v337_v47 = vsub.f32 %v3687_v16, %v244_v46  ;;  %v3512_v56 = vld [vmem:[#allocation9 + $0x110] ss:$0 sm:$0xff]  ;;  %v419_v16 = vld [vmem:[#allocation4] sm:$0xff] }
 0xdc3   : > { %v1176_v59 = vmul.f32 %v1174_v57, %v1174_v57  ;;  %v338_v48 = vmul.f32 %v337_v47, %v337_v47 }
 0xdc5   : > { %v1178_v61 = vsel %vm414_vm13, %v1176_v59, 0.0  ;;  %v339_v49 = vsel %vm304_vm2, %v338_v48, 0.0 }
 0xdc6   : > { %1179 = vadd.xlane.f32.xlu2 %v1178_v61 }
 0xdde   : > { %v1171_v62 = vpop.xlane.xlu1 %1170 }
 0xddf   : > { %v1173_v0 = vmul.f32 0.125, %v1171_v62 }
 0xde1   : > { %v1175_v15 = vsub.f32 %v1165_v52, %v1173_v0 }
 0xde3   : > { %v1177_v63 = vmul.f32 %v1175_v15, %v1175_v15 }
 0xde5   : > { %v1181_v1 = vsel %vm414_vm13, %v1177_v63, 0.0 }
 0xde6   : > { %1182 = vadd.xlane.f32.xlu0 %v1181_v1  ;;  %v358_v50 = vpop.xlane.xlu1 %357 }
 0xde7   : > { %v359_v52 = vmax.f32 %v358_v50, 1e-24 }
 0xdee   : > { %340 = vadd.xlane.f32.xlu0 %v339_v49 }
 0xe39   : > { %v1180_v20 = vpop.xlane.xlu2 %1179 }
 0xe3a   : > { %v1184_v3 = vmul.f32 0.125, %v1180_v20 }
 0xe3c   : > { %v1186_v4 = vadd.f32 1e-05, %v1184_v3 }
 0xe3e   : > { %3585 = vrsqrt.f32 %v1186_v4  ;;  %vm1194_vm3 = vweird.f32 %v1186_v4 }
 0xe44   : > { %v3586_v6 = vpop.eup %3585 }
 0xe45   : > { %v1189_v7 = vmul.f32 %v3586_v6, %v1186_v4  ;;  %vm1195_vm0 = vweird.f32 %v3586_v6 }
 0xe46   : > { %vm1196_vm4 = vmor %vm1194_vm3, %vm1195_vm0  ;;  %vm366_vm0 = vweird.f32 %v359_v52 }
 0xe47   : > { %v1190_v8 = vmul.f32 %v3586_v6, %v1189_v7 }
 0xe49   : > { %v1191_v10 = vmul.f32 0.5, %v1190_v8 }
 0xe4b   : > { %v1192_v13 = vsub.f32 1.5, %v1191_v10 }
 0xe4d   : > { %v1193_v18 = vmul.f32 %v3586_v6, %v1192_v13 }
 0xe4f   : > { %v1197_v22 = vsel %vm1196_vm4, %v3586_v6, %v1193_v18  ;;  %v420_v18 = vld [vmem:[#allocation4 + $0x8] sm:$0xff] }
 0xe50   : > { %v1208_v23 = vmul.f32 %v1197_v22, %v1174_v57  ;;  %v424_v21 = vrot.slane %v420_v18, 1 }
 0xe52   : > { %v1212_v26 = vmul.f32 %v3510_v19, %v1208_v23 }
 0xe54   : > { %v4168_v27 = vadd.f32 %v3511_v24, %v1212_v26 }
 0xe56   : > { %3265 = vmatmul.msk.f32.vlgmr.msra.gmra.mxu0 %vm414_vm13, %v4168_v27 }
 0xe59   : > { %v1183_v29 = vpop.xlane.xlu0 %1182 }
 0xe5a   : > { %v1185_v30 = vmul.f32 0.125, %v1183_v29 }
 0xe5c   : > { %v1187_v31 = vadd.f32 1e-05, %v1185_v30 }
 0xe5e   : > { %3587 = vrsqrt.f32 %v1187_v31  ;;  %vm1204_vm6 = vweird.f32 %v1187_v31 }
 0xe5f   : > { %3589 = vrsqrt.f32 %v359_v52 }
 0xe61   : > { %v341_v6 = vpop.xlane.xlu0 %340 }
 0xe62   : > { %v342_v7 = vmax.f32 %v341_v6, 1e-24 }
 0xe64   : > { %v3588_v32 = vpop.eup %3587  ;;  %3591 = vrsqrt.f32 %v342_v7  ;;  %vm349_vm2 = vweird.f32 %v342_v7 }
 0xe65   : > { %v1199_v33 = vmul.f32 %v3588_v32, %v1187_v31  ;;  %vm1205_vm5 = vweird.f32 %v3588_v32  ;;  %v3590_v54 = vpop.eup %3589 }
 0xe66   : > { %vm1206_vm7 = vmor %vm1204_vm6, %vm1205_vm5  ;;  %v361_v55 = vmul.f32 %v3590_v54, %v359_v52  ;;  %vm367_vm3 = vweird.f32 %v3590_v54 }
 0xe67   : > { %v1200_v34 = vmul.f32 %v3588_v32, %v1199_v33  ;;  %vm368_vm4 = vmor %vm366_vm0, %vm367_vm3  ;;  %v3688_v33 = vld [vmem:[#allocation9 + $0x260] sm:$0xff] }
 0xe68   : > { %v362_v57 = vmul.f32 %v3590_v54, %v361_v55 }
 0xe69   : > { %v1201_v35 = vmul.f32 0.5, %v1200_v34 }
 0xe6a   : > { %v363_v59 = vmul.f32 0.5, %v362_v57  ;;  %v3592_v8 = vpop.eup %3591 }
 0xe6b   : > { %v1202_v36 = vsub.f32 1.5, %v1201_v35  ;;  %v344_v10 = vmul.f32 %v3592_v8, %v342_v7  ;;  %vm350_vm5 = vweird.f32 %v3592_v8  ;;  %v1373_v35 = vld [vmem:[#allocation9 + $0x40] sm:$0xff] }
 0xe6c   : > { %v364_v0 = vsub.f32 1.5, %v363_v59  ;;  %vm351_vm6 = vmor %vm349_vm2, %vm350_vm5  ;;  %1397 = vmatpush.msra.mxu3 %v1373_v35 }
 0xe6d   : > { %v1203_v38 = vmul.f32 %v3588_v32, %v1202_v36  ;;  %v345_v13 = vmul.f32 %v3592_v8, %v344_v10 }
 0xe6e   : > { %v365_v63 = vmul.f32 %v3590_v54, %v364_v0 }
 0xe6f   : > { %v1207_v39 = vsel %vm1206_vm7, %v3588_v32, %v1203_v38  ;;  %v346_v14 = vmul.f32 0.5, %v345_v13  ;;  %v3513_v32 = vld [vmem:[#allocation9 + $0x138] ss:$0 sm:$0xff] }
 0xe70   : > { %v1209_v40 = vmul.f32 %v1207_v39, %v1175_v15  ;;  %v369_v1 = vsel %vm368_vm4, %v3590_v54, %v365_v63  ;;  %v3514_v54 = vld [vmem:[#allocation9 + $0x48] ss:$0 sm:$0xff]  ;;  %v1341_v63 = vld [vmem:[#allocation9 + $0xc0] sm:$0xff] }
 0xe71   : > { %v370_v2 = vmul.f32 %v369_v1, %v4163_v17  ;;  %v423_v17 = vrot.slane %v419_v16, 1  ;;  %1365 = vmatpush.msra.mxu2 %v1341_v63 }
 0xe72   : > { %v1213_v58 = vmul.f32 %v3510_v19, %v1209_v40  ;;  %v347_v19 = vsub.f32 1.5, %v346_v14  ;;  %v3515_v14 = vld [vmem:[#allocation9 + $0x103] ss:$0 sm:$0xff] }
 0xe73   : > { %377 = vrot.lane.b32.xlu1 %v370_v2, %s3827_s17  ;;  %v429_v39 = vsel %vm391_vm9, %v424_v21, %v423_v17 }
 0xe74   : > { %v4172_v41 = vadd.f32 %v3511_v24, %v1213_v58  ;;  %v348_v22 = vmul.f32 %v3592_v8, %v347_v19  ;;  %v425_v24 = vsel %vm391_vm9, %v423_v17, %v424_v21  ;;  %v431_v51 = vsel %vm3990_vm10, %v429_v39, %v420_v18  ;;  %v3516_v19 = vld [vmem:[#allocation9 + $0x104] ss:$0 sm:$0xff] }
 0xe75   : > { %v430_v28 = vsel %vm3990_vm10, %v425_v24, %v419_v16 }
 0xe76   : > { %3266 = vmatmul.msk.f32.gmra.mxu0 %vm414_vm13, %v4172_v41  ;;  %v352_v23 = vsel %vm351_vm6, %v3592_v8, %v348_v22 }
 0xe77   : > { %v353_v25 = vmul.f32 %v352_v23, %v337_v47 }
 0xed3   : > { %v1244_v61 = vpop.f32.mrf.mxu0 }
 0xed4   : > { %v1245_v62 = vadd.f32 %v3512_v56, %v1244_v61 }
 0xed6   : > { %v1250_v15 = vmax.f32 %v1245_v62, 0.0 }
 0xed8   : > { %3267 = vmatmul.msk.f32.vlgmr.msra.gmra.mxu1 %vm808_vm8, %v1250_v15 }
 0xee5   : > { %v378_v26 = vpop.permute.xlu1 %377 }
 0xee6   : > { %v380_v29 = vsel %vm248_vm1, %v353_v25, %v378_v26 }
 0xee7   : > { %v432_v30 = vperm.slane %v380_v29, 0 }
 0xee9   : > { %v433_v31 = vsel %vm4002_vm11, %v432_v30, %v430_v28  ;;  %v434_v58 = vsel %vm4009_vm12, %v432_v30, %v431_v51 }
 0xeea   : > { %435 = vst.msk [vmem:[#allocation4] sm:$0xff] %vm414_vm13, %v433_v31  ;;  %v4188_v34 = vadd.f32 %v3688_v33, %v433_v31  ;;  %v4200_v60 = vadd.f32 %v3689_v45, %v434_v58  ;;  %v3517_v45 = vld [vmem:[#allocation9 + $0xc8] ss:$0 sm:$0xff] }
 0xeeb   : > { %436 = vst.msk [vmem:[#allocation4 + $0x8] sm:$0xff] %vm414_vm13, %v434_v58 }
 0xeec   : > { %3271 = vmatmul.msk.f32.vlgmr.msra.gmra.mxu3 %vm414_vm13, %v4188_v34 }
 0xef3   : > { %v1247_v20 = vpop.f32.mrf.mxu0 }
 0xef4   : > { %v1248_v3 = vadd.f32 %v3512_v56, %v1247_v20  ;;  %3272 = vmatmul.msk.f32.gmra.mxu3 %vm414_vm13, %v4200_v60 }
 0xef6   : > { %v1251_v4 = vmax.f32 %v1248_v3, 0.0 }
 0xef8   : > { %3268 = vmatmul.msk.f32.gmra.mxu1 %vm808_vm8, %v1251_v4 }
 0xf55   : > { %v1281_v36 = vpop.f32.mrf.mxu1 }
 0xf56   : > { %v1282_v38 = vadd.f32 %v3513_v32, %v1281_v36 }
 0xf58   : > { %v1287_v40 = vadd.f32 %v1282_v38, %v4168_v27 }
 0xf5a   : > { %v1289_v42 = vsel %vm414_vm13, %v1287_v40, 0.0 }
 0xf5b   : > { %1290 = vadd.xlane.f32.xlu2 %v1289_v42 }
 0xf6f   : > { %v1399_v55 = vpop.f32.mrf.mxu3 }
 0xf70   : > { %v4207_v56 = vadd.f32 %v3514_v54, %v1399_v55 }
 0xf72   : > { %1503 = vrot.lane.b32.xlu1 %v4207_v56, %s3829_s23 }
 0xf75   : > { %v1284_v46 = vpop.f32.mrf.mxu1 }
 0xf76   : > { %v1285_v47 = vadd.f32 %v3513_v32, %v1284_v46 }
 0xf77   : > { %v1402_v57 = vpop.f32.mrf.mxu3 }
 0xf78   : > { %v1288_v27 = vadd.f32 %v1285_v47, %v4172_v41  ;;  %v4211_v59 = vadd.f32 %v3514_v54, %v1402_v57 }
 0xf7a   : > { %v1292_v43 = vsel %vm414_vm13, %v1288_v27, 0.0  ;;  %1505 = vrot.lane.b32.xlu1 %v4211_v59, %s3829_s23 }
 0xf7b   : > { %1293 = vadd.xlane.f32.xlu0 %v1292_v43 }
 0xf82   : > { %1407 = vrot.lane.b32.xlu1 %v4207_v56, %s3830_s24 }
 0xfce   : > { %v1291_v53 = vpop.xlane.xlu2 %1290 }
 0xfcf   : > { %v1295_v48 = vmul.f32 0.125, %v1291_v53 }
 0xfd1   : > { %v1297_v49 = vsub.f32 %v1287_v40, %v1295_v48 }
 0xfd3   : > { %v1299_v50 = vmul.f32 %v1297_v49, %v1297_v49 }
 0xfd5   : > { %v1301_v52 = vsel %vm414_vm13, %v1299_v50, 0.0 }
 0xfd6   : > { %1302 = vadd.xlane.f32.xlu2 %v1301_v52 }
 0xfe4   : > { %v1504_v26 = vpop.permute.xlu1 %1503 }
 0xfec   : > { %v1506_v35 = vpop.permute.xlu1 %1505 }
 0xfee   : > { %v1294_v41 = vpop.xlane.xlu0 %1293  ;;  %1509 = vrot.lane.b32.xlu2 %v4211_v59, %s3828_s16 }
 0xfef   : > { %v1296_v61 = vmul.f32 0.125, %v1294_v41 }
 0xff1   : > { %v1298_v62 = vsub.f32 %v1288_v27, %v1296_v61 }
 0xff3   : > { %v1300_v0 = vmul.f32 %v1298_v62, %v1298_v62 }
 0xff4   : > { %v1408_v58 = vpop.permute.xlu1 %1407 }
 0xff5   : > { %v1304_v15 = vsel %vm414_vm13, %v1300_v0, 0.0  ;;  %v3447_v0 = vpack.i.bf16 %v4207_v56, %v4211_v59 }
 0xff6   : > { %1305 = vadd.xlane.f32.xlu0 %v1304_v15 }
0x100a   : > { %1507 = vrot.lane.b32.xlu0 %v4207_v56, %s3828_s16 }
0x1012   : > { %1409 = vrot.lane.b32.xlu0 %v4211_v59, %s3830_s24 }
0x1049   : > { %v1303_v1 = vpop.xlane.xlu2 %1302 }
0x104a   : > { %v1307_v2 = vmul.f32 0.125, %v1303_v1 }
0x104c   : > { %v1309_v20 = vadd.f32 1e-05, %v1307_v2 }
0x104e   : > { %3593 = vrsqrt.f32 %v1309_v20  ;;  %vm1317_vm10 = vweird.f32 %v1309_v20 }
0x1051   : > { %v1510_v3 = vpop.permute.xlu2 %1509 }
0x1052   : > { %3279 = vmatpush.xpose.msk.msrb.mxu2 %vm248_vm1, %v1510_v3 }
0x1054   : > { %v3594_v4 = vpop.eup %3593 }
0x1055   : > { %v1312_v6 = vmul.f32 %v3594_v4, %v1309_v20  ;;  %vm1318_vm9 = vweird.f32 %v3594_v4 }
0x1056   : > { %vm1319_vm11 = vmor %vm1317_vm10, %vm1318_vm9 }
0x1057   : > { %v1313_v7 = vmul.f32 %v3594_v4, %v1312_v6 }
0x1059   : > { %v1314_v8 = vmul.f32 0.5, %v1313_v7 }
0x105b   : > { %v1315_v10 = vsub.f32 1.5, %v1314_v8 }
0x105d   : > { %v1316_v13 = vmul.f32 %v3594_v4, %v1315_v10 }
0x105f   : > { %v1320_v16 = vsel %vm1319_vm11, %v3594_v4, %v1316_v13 }
0x1060   : > { %v1331_v18 = vmul.f32 %v1320_v16, %v1297_v49 }
0x1062   : > { %v1335_v17 = vmul.f32 %v3515_v14, %v1331_v18 }
0x1064   : > { %v1339_v21 = vadd.f32 %v3516_v19, %v1335_v17 }
0x1066   : > { %3269 = vmatmul.msk.f32.vlgmr.msra.gmra.mxu2 %vm414_vm13, %v1339_v21 }
0x1069   : > { %v1306_v22 = vpop.xlane.xlu0 %1305 }
0x106a   : > { %v1308_v23 = vmul.f32 0.125, %v1306_v22 }
0x106c   : > { %v1310_v24 = vadd.f32 1e-05, %v1308_v23 }
0x106e   : > { %3595 = vrsqrt.f32 %v1310_v24  ;;  %vm1327_vm7 = vweird.f32 %v1310_v24 }
0x1074   : > { %v3596_v25 = vpop.eup %3595 }
0x1075   : > { %v1322_v28 = vmul.f32 %v3596_v25, %v1310_v24  ;;  %vm1328_vm12 = vweird.f32 %v3596_v25 }
0x1076   : > { %vm1329_vm0 = vmor %vm1327_vm7, %vm1328_vm12 }
0x1077   : > { %v1323_v29 = vmul.f32 %v3596_v25, %v1322_v28 }
0x1079   : > { %v1324_v30 = vmul.f32 0.5, %v1323_v29 }
0x107b   : > { %v1325_v31 = vsub.f32 1.5, %v1324_v30 }
0x107c   : > { %v1508_v32 = vpop.permute.xlu0 %1507 }
0x107d   : > { %v1326_v33 = vmul.f32 %v3596_v25, %v1325_v31  ;;  %3280 = vmatpush.xpose.msk.msrb.mxu2 %vm248_vm1, %v1508_v32 }
0x107f   : > { %v1330_v36 = vsel %vm1329_vm0, %v3596_v25, %v1326_v33 }
0x1080   : > { %v1332_v38 = vmul.f32 %v1330_v36, %v1298_v62 }
0x1082   : > { %v1336_v39 = vmul.f32 %v3515_v14, %v1332_v38 }
0x1084   : > { %v1410_v40 = vpop.permute.xlu0 %1409  ;;  %v1340_v51 = vadd.f32 %v3516_v19, %v1336_v39 }
0x1085   : > { %3273 = vmatpush.xpose.msk.msrb.mxu0 %vm248_vm1, %v1410_v40 }
0x1086   : > { %3270 = vmatmul.msk.f32.gmra.mxu2 %vm414_vm13, %v1340_v51 }
0x1089   : > { %3274 = vmatpush.xpose.msk.msrb.mxu0 %vm248_vm1, %v1408_v58 }
0x108c   : > { %3275 = vmatmul.msk.f32.vlgmr.msrb.gmra.mxu0 %vm248_vm1, %v4207_v56 }
0x108e   : > { %3281 = vmatmul.msk.f32.vlgmr.msrb.gmra.mxu2 %vm248_vm1, %v1504_v26 }
0x1094   : > { %3276 = vmatmul.msk.f32.gmra.mxu0 %vm248_vm1, %v4211_v59 }
0x1096   : > { %3282 = vmatmul.msk.f32.gmra.mxu2 %vm248_vm1, %v1506_v35 }
0x10e9   : > { %v1367_v42 = vpop.f32.mrf.mxu2 }
0x10ea   : > { %v4243_v49 = vadd.f32 %v3517_v45, %v1367_v42 }
0x1109   : > { %v1370_v46 = vpop.f32.mrf.mxu2  ;;  %v1436_v47 = vpop.f32.mrf.mxu0 }
0x110a   : > { %v4236_v27 = vadd.f32 %v3517_v45, %v1370_v46  ;;  %v1442_v43 = vmul.f32 0.5, %v1436_v47 }
0x110c   : > { %3289 = vmatpush.xpose.msk.msra.mxu2 %vm248_vm1, %v4236_v27  ;;  %v1444_v53 = vsel %vm4059_vm14, %v1442_v43, -1e+30 }
0x110d   : > { %v1446_v48 = vsel %vm514_vm15, %v1444_v53, -inf }
0x110e   : > { %1447 = vmax.xlane.f32.xlu1 %v1446_v48  ;;  %v1613_v48 = vld [vmem:[#allocation9 + $0x50] sm:$0xff] }
0x110f   : > { %1637 = vmatpush.msra.mxu0 %v1613_v48 }
0x1110   : > { %3290 = vmatpush.xpose.msk.msra.mxu2 %vm248_vm1, %v4243_v49 }
0x1111   : > { %v1536_v50 = vpop.f32.mrf.mxu2  ;;  %v1439_v4 = vpop.f32.mrf.mxu0 }
0x1112   : > { %v1542_v52 = vmul.f32 0.5, %v1536_v50  ;;  %v1443_v13 = vmul.f32 0.5, %v1439_v4 }
0x1114   : > { %v1544_v54 = vsel %vm4059_vm14, %v1542_v52, -1e+30  ;;  %v1445_v56 = vsel %vm4059_vm14, %v1443_v13, -1e+30 }
0x1115   : > { %v1546_v55 = vsel %vm514_vm15, %v1544_v54, -inf  ;;  %v1449_v16 = vsel %vm514_vm15, %v1445_v56, -inf }
0x1116   : > { %1547 = vmax.xlane.f32.xlu2 %v1546_v55 }
0x1119   : > { %v1539_v57 = vpop.f32.mrf.mxu2 }
0x111a   : > { %v1543_v41 = vmul.f32 0.5, %v1539_v57 }
0x111c   : > { %v1545_v61 = vsel %vm4059_vm14, %v1543_v41, -1e+30 }
0x111d   : > { %v1549_v62 = vsel %vm514_vm15, %v1545_v61, -inf }
0x111e   : > { %1550 = vmax.xlane.f32.xlu0 %v1549_v62 }
0x1132   : > { %3448 = vrot.lane.b32.xlu0 %v3447_v0, %s3831_s25 }
0x1181   : > { %v1448_v2 = vpop.xlane.xlu1 %1447 }
0x1182   : > { %v1452_v7 = vsub.f32 %v1444_v53, %v1448_v2 }
0x1184   : > { %v1454_v14 = vmul.f32 1.442695, %v1452_v7 }
0x1189   : > { %v1548_v15 = vpop.xlane.xlu2 %1547 }
0x118a   : > { %v1552_v63 = vsub.f32 %v1544_v54, %v1548_v15 }
0x118c   : > { %v1554_v1 = vmul.f32 1.442695, %v1552_v63 }
0x118e   : > { %3597 = vpow2.f32 %v1554_v1 }
0x1191   : > { %v1551_v20 = vpop.xlane.xlu0 %1550 }
0x1192   : > { %v1553_v3 = vsub.f32 %v1545_v61, %v1551_v20  ;;  %v3518_v61 = vld [vmem:[#allocation9 + $0x58] ss:$0 sm:$0xff] }
0x1194   : > { %v3598_v6 = vpop.eup %3597  ;;  %v1556_v8 = vmul.f32 1.442695, %v1553_v3 }
0x1195   : > { %v1558_v10 = vsel %vm514_vm15, %v3598_v6, 0.0 }
0x1196   : > { %3599 = vpow2.f32 %v1556_v8  ;;  %1559 = vadd.xlane.f32.xlu2 %v1558_v10 }
0x1197   : > { %3601 = vpow2.f32 %v1454_v14 }
0x119c   : > { %v3600_v59 = vpop.eup %3599 }
0x119d   : > { %v1561_v18 = vsel %vm514_vm15, %v3600_v59, 0.0  ;;  %v3602_v19 = vpop.eup %3601 }
0x119e   : > { %1450 = vmax.xlane.f32.xlu2 %v1449_v16  ;;  %1562 = vadd.xlane.f32.xlu1 %v1561_v18  ;;  %v1458_v22 = vsel %vm514_vm15, %v3602_v19, 0.0  ;;  %v1699_v16 = vld [vmem:[#allocation9 + $0x80] sm:$0xff] }
0x11a4   : > { %v3449_v17 = vpop.permute.xlu0 %3448 }
0x11a5   : > { %v3450_v21 = vunpack.i.l.bf16 %v3449_v17  ;;  %v3451_v23 = vunpack.i.h.bf16 %v3449_v17 }
0x11a6   : > { %1459 = vadd.xlane.f32.xlu2 %v1458_v22 }
0x11a7   : > { %1594 = vmatpush.msrb.mxu3 %v3450_v21 }
0x11a9   : > { %1595 = vmatpush.msrb.mxu3 %v3451_v23 }
0x11b7   : > { %3453 = vrot.lane.b32.xlu1 %v3447_v0, %s3832_s26 }
0x1209   : > { %v1560_v24 = vpop.xlane.xlu2 %1559 }
0x120a   : > { %3603 = vrcp.f32 %v1560_v24 }
0x1210   : > { %v3604_v25 = vpop.eup %3603 }
0x1211   : > { %v1566_v26 = vmul.f32 %v3604_v25, %v3598_v6  ;;  %v1451_v28 = vpop.xlane.xlu2 %1450  ;;  %v1563_v29 = vpop.xlane.xlu1 %1562 }
0x1212   : > { %v1453_v30 = vsub.f32 %v1445_v56, %v1451_v28  ;;  %3605 = vrcp.f32 %v1563_v29 }
0x1213   : > { %3283 = vmatmul.msk.f32.vlgmr.msrb.gmra.mxu3 %vm514_vm15, %v1566_v26 }
0x1214   : > { %v1456_v31 = vmul.f32 1.442695, %v1453_v30 }
0x1216   : > { %3607 = vpow2.f32 %v1456_v31  ;;  %v3519_v31 = vld [vmem:[#allocation9 + $0x139] ss:$0 sm:$0xff] }
0x1218   : > { %v3606_v32 = vpop.eup %3605 }
0x1219   : > { %v1567_v33 = vmul.f32 %v3606_v32, %v3600_v59  ;;  %v1460_v38 = vpop.xlane.xlu2 %1459 }
0x121a   : > { %3609 = vrcp.f32 %v1460_v38 }
0x121b   : > { %3284 = vmatmul.msk.f32.gmra.mxu3 %vm514_vm15, %v1567_v33 }
0x121c   : > { %v3608_v35 = vpop.eup %3607 }
0x121d   : > { %v1461_v36 = vsel %vm514_vm15, %v3608_v35, 0.0 }
0x121e   : > { %1462 = vadd.xlane.f32.xlu2 %v1461_v36 }
0x1220   : > { %v3610_v40 = vpop.eup %3609 }
0x1221   : > { %v1466_v42 = vmul.f32 %v3610_v40, %v3602_v19 }
0x1229   : > { %v3454_v39 = vpop.permute.xlu1 %3453 }
0x122a   : > { %v3455_v51 = vunpack.i.l.bf16 %v3454_v39  ;;  %v3456_v58 = vunpack.i.h.bf16 %v3454_v39 }
0x122c   : > { %1494 = vmatpush.msrb.mxu1 %v3455_v51 }
0x122e   : > { %1495 = vmatpush.msrb.mxu1 %v3456_v58 }
0x122f   : > { %3277 = vmatmul.msk.f32.vlgmr.msrb.gmra.mxu1 %vm514_vm15, %v1466_v42 }
0x1230   : > { %1723 = vmatpush.msra.mxu1 %v1699_v16 }
0x1291   : > { %v1463_v45 = vpop.xlane.xlu2 %1462 }
0x1292   : > { %3611 = vrcp.f32 %v1463_v45 }
0x1296   : > { %v1597_v46 = vpop.f32.mrf.mxu3 }
0x1297   : > { %1605 = vrot.lane.b32.xlu0 %v1597_v46, %s3827_s17 }
0x1298   : > { %v3612_v47 = vpop.eup %3611 }
0x1299   : > { %v1467_v43 = vmul.f32 %v3612_v47, %v3608_v35  ;;  %v3520_v35 = vld [vmem:[#allocation9 + $0x13a] ss:$0 sm:$0xff] }
0x129b   : > { %3278 = vmatmul.msk.f32.gmra.mxu1 %vm514_vm15, %v1467_v43 }
0x129e   : > { %v1600_v53 = vpop.f32.mrf.mxu3 }
0x129f   : > { %1607 = vrot.lane.b32.xlu2 %v1600_v53, %s3827_s17 }
0x12ac   : > { %v1497_v50 = vpop.f32.mrf.mxu1 }
0x12f9   : > { %v1608_v55 = vpop.permute.xlu2 %1607 }
0x1309   : > { %v1606_v52 = vpop.permute.xlu0 %1605 }
0x130a   : > { %v1611_v54 = vsel %vm248_vm1, %v1497_v50, %v1606_v52  ;;  %v3521_v50 = vld [vmem:[#allocation9 + $0x88] ss:$0 sm:$0xff] }
0x130b   : > { %3285 = vmatmul.msk.f32.vlgmr.msra.gmra.mxu0 %vm414_vm13, %v1611_v54 }
0x1318   : > { %v1500_v57 = vpop.f32.mrf.mxu1 }
0x1319   : > { %v1612_v41 = vsel %vm248_vm1, %v1500_v57, %v1608_v55 }
0x131a   : > { %3286 = vmatmul.msk.f32.gmra.mxu0 %vm414_vm13, %v1612_v41 }
0x1388   : > { %v1639_v62 = vpop.f32.mrf.mxu0 }
0x1389   : > { %v1640_v0 = vadd.f32 %v3518_v61, %v1639_v62 }
0x138b   : > { %v1645_v15 = vadd.f32 %v1640_v0, %v4188_v34 }
0x138d   : > { %v1647_v63 = vsel %vm414_vm13, %v1645_v15, 0.0 }
0x138e   : > { %1648 = vadd.xlane.f32.xlu0 %v1647_v63 }
0x1397   : > { %v1642_v1 = vpop.f32.mrf.mxu0 }
0x1398   : > { %v1643_v2 = vadd.f32 %v3518_v61, %v1642_v1 }
0x139a   : > { %v1646_v20 = vadd.f32 %v1643_v2, %v4200_v60 }
0x139c   : > { %v1650_v3 = vsel %vm414_vm13, %v1646_v20, 0.0 }
0x139d   : > { %1651 = vadd.xlane.f32.xlu1 %v1650_v3 }
0x13b6   : > { %1833 = vrot.lane.b32.xlu1 %v4236_v27, %s3829_s23 }
0x1401   : > { %v1649_v4 = vpop.xlane.xlu0 %1648 }
0x1402   : > { %v1653_v6 = vmul.f32 0.125, %v1649_v4 }
0x1404   : > { %v1655_v7 = vsub.f32 %v1645_v15, %v1653_v6 }
0x1406   : > { %v1657_v8 = vmul.f32 %v1655_v7, %v1655_v7 }
0x1408   : > { %v1659_v10 = vsel %vm414_vm13, %v1657_v8, 0.0 }
0x1409   : > { %1660 = vadd.xlane.f32.xlu2 %v1659_v10  ;;  %v4311_v10 = vpack.i.bf16 %v4243_v49, %v4236_v27 }
0x1410   : > { %v1652_v34 = vpop.xlane.xlu1 %1651 }
0x1411   : > { %v1654_v13 = vmul.f32 0.125, %v1652_v34 }
0x1413   : > { %v1656_v14 = vsub.f32 %v1646_v20, %v1654_v13 }
0x1415   : > { %v1658_v56 = vmul.f32 %v1656_v14, %v1656_v14 }
0x1417   : > { %v1662_v59 = vsel %vm414_vm13, %v1658_v56, 0.0 }
0x1418   : > { %1663 = vadd.xlane.f32.xlu0 %v1662_v59 }
0x1428   : > { %v1834_v60 = vpop.permute.xlu1 %1833 }
0x1429   : > { %3295 = vmatpush.xpose.msk.msrb.mxu0 %vm248_vm1, %v1834_v60 }
0x142c   : > { %1831 = vrot.lane.b32.xlu0 %v4243_v49, %s3829_s23 }
0x147c   : > { %v1661_v18 = vpop.xlane.xlu2 %1660 }
0x147d   : > { %v1665_v19 = vmul.f32 0.125, %v1661_v18 }
0x147f   : > { %v1667_v17 = vadd.f32 1e-05, %v1665_v19 }
0x1481   : > { %3613 = vrsqrt.f32 %v1667_v17  ;;  %vm1675_vm4 = vweird.f32 %v1667_v17 }
0x1487   : > { %v3614_v21 = vpop.eup %3613 }
0x1488   : > { %v1670_v22 = vmul.f32 %v3614_v21, %v1667_v17  ;;  %vm1676_vm3 = vweird.f32 %v3614_v21 }
0x1489   : > { %vm1677_vm2 = vmor %vm1675_vm4, %vm1676_vm3 }
0x148a   : > { %v1671_v23 = vmul.f32 %v3614_v21, %v1670_v22 }
0x148b   : > { %v1664_v24 = vpop.xlane.xlu0 %1663 }
0x148c   : > { %v1672_v25 = vmul.f32 0.5, %v1671_v23  ;;  %v1666_v26 = vmul.f32 0.125, %v1664_v24 }
0x148e   : > { %v1673_v28 = vsub.f32 1.5, %v1672_v25  ;;  %v1668_v29 = vadd.f32 1e-05, %v1666_v26 }
0x1490   : > { %v1674_v30 = vmul.f32 %v3614_v21, %v1673_v28  ;;  %3615 = vrsqrt.f32 %v1668_v29  ;;  %vm1685_vm6 = vweird.f32 %v1668_v29 }
0x1492   : > { %v1678_v32 = vsel %vm1677_vm2, %v3614_v21, %v1674_v30 }
0x1493   : > { %v1689_v33 = vmul.f32 %v1678_v32, %v1655_v7 }
0x1495   : > { %v1693_v36 = vmul.f32 %v3519_v31, %v1689_v33 }
0x1496   : > { %v3616_v38 = vpop.eup %3615 }
0x1497   : > { %v1680_v39 = vmul.f32 %v3616_v38, %v1668_v29  ;;  %v4285_v40 = vadd.f32 %v3520_v35, %v1693_v36  ;;  %vm1686_vm5 = vweird.f32 %v3616_v38 }
0x1498   : > { %vm1687_vm9 = vmor %vm1685_vm6, %vm1686_vm5 }
0x1499   : > { %v1681_v51 = vmul.f32 %v3616_v38, %v1680_v39  ;;  %3287 = vmatmul.msk.f32.vlgmr.msra.gmra.mxu1 %vm414_vm13, %v4285_v40 }
0x149b   : > { %v1682_v58 = vmul.f32 0.5, %v1681_v51 }
0x149d   : > { %v1683_v42 = vsub.f32 1.5, %v1682_v58 }
0x149e   : > { %v1832_v45 = vpop.permute.xlu0 %1831 }
0x149f   : > { %v1684_v46 = vmul.f32 %v3616_v38, %v1683_v42  ;;  %3296 = vmatpush.xpose.msk.msrb.mxu0 %vm248_vm1, %v1832_v45 }
0x14a1   : > { %v1688_v47 = vsel %vm1687_vm9, %v3616_v38, %v1684_v46 }
0x14a2   : > { %v1690_v43 = vmul.f32 %v1688_v47, %v1656_v14 }
0x14a4   : > { %v1694_v53 = vmul.f32 %v3519_v31, %v1690_v43 }
0x14a6   : > { %v4290_v48 = vadd.f32 %v3520_v35, %v1694_v53 }
0x14a8   : > { %3288 = vmatmul.msk.f32.gmra.mxu1 %vm414_vm13, %v4290_v48 }
0x1516   : > { %v1725_v52 = vpop.f32.mrf.mxu1 }
0x1517   : > { %v1726_v54 = vadd.f32 %v3521_v50, %v1725_v52 }
0x1519   : > { %1827 = vrot.lane.b32.xlu2 %v1726_v54, %s3829_s23  ;;  %3291 = vmatmul.msk.f32.vlgmr.msra.gmra.mxu2 %vm248_vm1, %v1726_v54 }
0x1525   : > { %v1728_v55 = vpop.f32.mrf.mxu1 }
0x1526   : > { %v1729_v57 = vadd.f32 %v3521_v50, %v1728_v55 }
0x1528   : > { %1829 = vrot.lane.b32.xlu0 %v1729_v57, %s3829_s23  ;;  %3292 = vmatmul.msk.f32.gmra.mxu2 %vm248_vm1, %v1729_v57 }
0x1573   : > { %v1828_v41 = vpop.permute.xlu2 %1827 }
0x1574   : > { %3297 = vmatmul.msk.f32.vlgmr.msrb.gmra.mxu0 %vm248_vm1, %v1828_v41 }
0x159a   : > { %v1830_v61 = vpop.permute.xlu0 %1829 }
0x159b   : > { %3298 = vmatmul.msk.f32.gmra.mxu0 %vm248_vm1, %v1830_v61 }
0x159c   : > { %v1760_v62 = vpop.f32.mrf.mxu2 }
0x159d   : > { %v1766_v0 = vmul.f32 0.5, %v1760_v62 }
0x159f   : > { %v1768_v15 = vsel %vm4059_vm14, %v1766_v0, -1e+30 }
0x15a0   : > { %v1770_v63 = vsel %vm514_vm15, %v1768_v15, -inf }
0x15a1   : > { %1771 = vmax.xlane.f32.xlu2 %v1770_v63  ;;  %v1937_v63 = vld [vmem:[#allocation9 + $0x90] sm:$0xff] }
0x15a2   : > { %1961 = vmatpush.msrb.mxu2 %v1937_v63 }
0x15ab   : > { %v1763_v20 = vpop.f32.mrf.mxu2 }
0x15ac   : > { %v1767_v6 = vmul.f32 0.5, %v1763_v20 }
0x15ae   : > { %v1769_v7 = vsel %vm4059_vm14, %v1767_v6, -1e+30 }
0x15af   : > { %v1773_v8 = vsel %vm514_vm15, %v1769_v7, -inf }
0x15f1   : > { %v1860_v1 = vpop.f32.mrf.mxu0 }
0x15f2   : > { %v1866_v2 = vmul.f32 0.5, %v1860_v1 }
0x15f4   : > { %v1868_v3 = vsel %vm4059_vm14, %v1866_v2, -1e+30 }
0x15f5   : > { %v1870_v4 = vsel %vm514_vm15, %v1868_v3, -inf }
0x15f6   : > { %1871 = vmax.xlane.f32.xlu1 %v1870_v4 }
0x15fe   : > { %1774 = vmax.xlane.f32.xlu1 %v1773_v8 }
0x1614   : > { %v1772_v59 = vpop.xlane.xlu2 %1771 }
0x1615   : > { %v1776_v18 = vsub.f32 %v1768_v15, %v1772_v59 }
0x1617   : > { %3458 = vrot.lane.b32.xlu1 %v4311_v10, %s3828_s16  ;;  %v1778_v17 = vmul.f32 1.442695, %v1776_v18 }
0x1618   : > { %v1863_v34 = vpop.f32.mrf.mxu0 }
0x1619   : > { %v1867_v13 = vmul.f32 0.5, %v1863_v34 }
0x161b   : > { %v1869_v14 = vsel %vm4059_vm14, %v1867_v13, -1e+30 }
0x161c   : > { %v1873_v56 = vsel %vm514_vm15, %v1869_v14, -inf }
0x161d   : > { %1874 = vmax.xlane.f32.xlu0 %v1873_v56 }
0x1669   : > { %v1872_v60 = vpop.xlane.xlu1 %1871 }
0x166a   : > { %v1876_v16 = vsub.f32 %v1868_v3, %v1872_v60 }
0x166c   : > { %v1878_v19 = vmul.f32 1.442695, %v1876_v16 }
0x166e   : > { %3617 = vpow2.f32 %v1878_v19 }
0x166f   : > { %3619 = vpow2.f32 %v1778_v17 }
0x1671   : > { %v1775_v21 = vpop.xlane.xlu1 %1774 }
0x1672   : > { %v1777_v23 = vsub.f32 %v1769_v7, %v1775_v21  ;;  %v3522_v7 = vld [vmem:[#allocation9 + $0x98] ss:$0 sm:$0xff] }
0x1674   : > { %v3618_v22 = vpop.eup %3617  ;;  %v1780_v25 = vmul.f32 1.442695, %v1777_v23 }
0x1675   : > { %v1882_v24 = vsel %vm514_vm15, %v3618_v22, 0.0  ;;  %v3620_v26 = vpop.eup %3619 }
0x1676   : > { %1883 = vadd.xlane.f32.xlu0 %v1882_v24  ;;  %3621 = vpow2.f32 %v1780_v25  ;;  %v1782_v28 = vsel %vm514_vm15, %v3620_v26, 0.0 }
0x167c   : > { %v3622_v29 = vpop.eup %3621 }
0x167d   : > { %v1785_v30 = vsel %vm514_vm15, %v3622_v29, 0.0 }
0x167e   : > { %1783 = vadd.xlane.f32.xlu0 %v1782_v28  ;;  %v2023_v28 = vld [vmem:[#allocation9 + $0x140] sm:$0xff] }
0x1686   : > { %1786 = vadd.xlane.f32.xlu0 %v1785_v30 }
0x1689   : > { %v3459_v31 = vpop.permute.xlu1 %3458 }
0x168a   : > { %v3460_v32 = vunpack.i.l.bf16 %v3459_v31  ;;  %v3461_v33 = vunpack.i.h.bf16 %v3459_v31 }
0x168c   : > { %1918 = vmatpush.msrb.mxu1 %v3460_v32 }
0x168e   : > { %1919 = vmatpush.msrb.mxu1 %v3461_v33 }
0x1690   : > { %v1875_v35 = vpop.xlane.xlu0 %1874 }
0x1691   : > { %v1877_v36 = vsub.f32 %v1869_v14, %v1875_v35 }
0x1693   : > { %v1880_v38 = vmul.f32 1.442695, %v1877_v36 }
0x1695   : > { %3623 = vpow2.f32 %v1880_v38 }
0x169b   : > { %v3624_v39 = vpop.eup %3623 }
0x169c   : > { %v1885_v51 = vsel %vm514_vm15, %v3624_v39, 0.0 }
0x169d   : > { %1886 = vadd.xlane.f32.xlu2 %v1885_v51 }
0x16b5   : > { %3463 = vrot.lane.b32.xlu2 %v4311_v10, %s3830_s24 }
0x16e9   : > { %v1884_v58 = vpop.xlane.xlu0 %1883 }
0x16ea   : > { %3625 = vrcp.f32 %v1884_v58 }
0x16f0   : > { %v3626_v42 = vpop.eup %3625 }
0x16f1   : > { %v1890_v45 = vmul.f32 %v3626_v42, %v3618_v22  ;;  %v1784_v46 = vpop.xlane.xlu0 %1783  ;;  %v3524_v42 = vld [vmem:[#allocation9 + $0x13c] ss:$0 sm:$0xff] }
0x16f3   : > { %3299 = vmatmul.msk.f32.vlgmr.msrb.gmra.mxu1 %vm514_vm15, %v1890_v45 }
0x16f9   : > { %v1787_v53 = vpop.xlane.xlu0 %1786 }
0x1710   : > { %v1887_v47 = vpop.xlane.xlu2 %1886 }
0x1711   : > { %3627 = vrcp.f32 %v1887_v47  ;;  %v2060_v47 = vld [vmem:[#allocation9 + $0x168] sm:$0xff] }
0x1712   : > { %3629 = vrcp.f32 %v1784_v46  ;;  %2081 = vmatpush.msra.mxu0 %v2060_v47 }
0x1713   : > { %3631 = vrcp.f32 %v1787_v53 }
0x1717   : > { %v3628_v43 = vpop.eup %3627 }
0x1718   : > { %v3464_v50 = vpop.permute.xlu2 %3463  ;;  %v1891_v52 = vmul.f32 %v3628_v43, %v3624_v39  ;;  %v3630_v54 = vpop.eup %3629  ;;  %v3523_v39 = vld [vmem:[#allocation9 + $0x13b] ss:$0 sm:$0xff] }
0x1719   : > { %v3465_v55 = vunpack.i.l.bf16 %v3464_v50  ;;  %v3466_v57 = vunpack.i.h.bf16 %v3464_v50  ;;  %v1790_v41 = vmul.f32 %v3630_v54, %v3620_v26  ;;  %v3632_v61 = vpop.eup %3631 }
0x171a   : > { %3300 = vmatmul.msk.f32.gmra.mxu1 %vm514_vm15, %v1891_v52  ;;  %v1791_v62 = vmul.f32 %v3632_v61, %v3622_v29 }
0x171b   : > { %1818 = vmatpush.msra.mxu3 %v3465_v55 }
0x171d   : > { %1819 = vmatpush.msra.mxu3 %v3466_v57 }
0x171e   : > { %3293 = vmatmul.msk.f32.vlgmr.msra.gmra.mxu3 %vm514_vm15, %v1790_v41 }
0x171f   : > { %2047 = vmatpush.msrb.mxu3 %v2023_v28 }
0x1726   : > { %3294 = vmatmul.msk.f32.gmra.mxu3 %vm514_vm15, %v1791_v62 }
0x1770   : > { %v1921_v0 = vpop.f32.mrf.mxu1 }
0x1771   : > { %1929 = vrot.lane.b32.xlu0 %v1921_v0, %s3827_s17 }
0x1797   : > { %v1924_v15 = vpop.f32.mrf.mxu1 }
0x1798   : > { %1931 = vrot.lane.b32.xlu1 %v1924_v15, %s3827_s17 }
0x17a1   : > { %v1821_v1 = vpop.f32.mrf.mxu3 }
0x17a9   : > { %v1824_v3 = vpop.f32.mrf.mxu3 }
0x17e3   : > { %v1930_v2 = vpop.permute.xlu0 %1929 }
0x17e4   : > { %v1935_v20 = vsel %vm248_vm1, %v1821_v1, %v1930_v2  ;;  %v2059_v1 = vld [vmem:[#allocation9 + $0x160] sm:$0xff]  ;;  %v2058_v2 = vld [vmem:[#allocation9 + $0x158] sm:$0xff] }
0x17e5   : > { %3301 = vmatmul.msk.f32.vlgmr.msrb.gmra.mxu2 %vm414_vm13, %v1935_v20  ;;  %2082 = vmatpush.msra.mxu0 %v2059_v1  ;;  %v2057_v20 = vld [vmem:[#allocation9 + $0x150] sm:$0xff] }
0x17e7   : > { %2083 = vmatpush.msra.mxu0 %v2058_v2 }
0x17e9   : > { %2084 = vmatpush.msra.mxu0 %v2057_v20 }
0x180a   : > { %v1932_v4 = vpop.permute.xlu1 %1931 }
0x180b   : > { %v1936_v6 = vsel %vm248_vm1, %v1824_v3, %v1932_v4  ;;  %v3525_v3 = vld [vmem:[#allocation9 + $0x148] ss:$0 sm:$0xff] }
0x180c   : > { %3302 = vmatmul.msk.f32.gmra.mxu2 %vm414_vm13, %v1936_v6 }
0x1868   : > { %v1963_v8 = vpop.f32.mrf.mxu2 }
0x1869   : > { %v1964_v34 = vadd.f32 %v3522_v7, %v1963_v8 }
0x186b   : > { %v1969_v13 = vadd.f32 %v1964_v34, %v4285_v40 }
0x186d   : > { %v1971_v14 = vsel %vm414_vm13, %v1969_v13, 0.0 }
0x186e   : > { %1972 = vadd.xlane.f32.xlu1 %v1971_v14  ;;  %v3526_v14 = vld [vmem:[#allocation9 + $0x170] ss:$0 sm:$0xff] }
0x188f   : > { %v1966_v56 = vpop.f32.mrf.mxu2 }
0x1890   : > { %v1967_v59 = vadd.f32 %v3522_v7, %v1966_v56 }
0x1892   : > { %v1970_v60 = vadd.f32 %v1967_v59, %v4290_v48 }
0x1894   : > { %v1974_v16 = vsel %vm414_vm13, %v1970_v60, 0.0 }
0x1895   : > { %1975 = vadd.xlane.f32.xlu2 %v1974_v16 }
0x18e1   : > { %v1973_v18 = vpop.xlane.xlu1 %1972 }
0x18e2   : > { %v1977_v19 = vmul.f32 0.125, %v1973_v18 }
0x18e4   : > { %v1979_v17 = vsub.f32 %v1969_v13, %v1977_v19 }
0x18e6   : > { %v1981_v21 = vmul.f32 %v1979_v17, %v1979_v17 }
0x18e8   : > { %v1983_v22 = vsel %vm414_vm13, %v1981_v21, 0.0 }
0x18e9   : > { %1984 = vadd.xlane.f32.xlu0 %v1983_v22 }
0x1908   : > { %v1976_v23 = vpop.xlane.xlu2 %1975 }
0x1909   : > { %v1978_v24 = vmul.f32 0.125, %v1976_v23 }
0x190b   : > { %v1980_v40 = vsub.f32 %v1970_v60, %v1978_v24 }
0x190d   : > { %v1982_v25 = vmul.f32 %v1980_v40, %v1980_v40 }
0x190f   : > { %v1986_v26 = vsel %vm414_vm13, %v1982_v25, 0.0 }
0x1910   : > { %1987 = vadd.xlane.f32.xlu1 %v1986_v26 }
0x195c   : > { %v1985_v48 = vpop.xlane.xlu0 %1984 }
0x195d   : > { %v1989_v29 = vmul.f32 0.125, %v1985_v48 }
0x195f   : > { %v1991_v30 = vadd.f32 1e-05, %v1989_v29 }
0x1961   : > { %3633 = vrsqrt.f32 %v1991_v30  ;;  %vm1999_vm11 = vweird.f32 %v1991_v30 }
0x1967   : > { %v3634_v31 = vpop.eup %3633 }
0x1968   : > { %v1994_v32 = vmul.f32 %v3634_v31, %v1991_v30  ;;  %vm2000_vm10 = vweird.f32 %v3634_v31 }
0x1969   : > { %vm2001_vm12 = vmor %vm1999_vm11, %vm2000_vm10 }
0x196a   : > { %v1995_v33 = vmul.f32 %v3634_v31, %v1994_v32 }
0x196c   : > { %v1996_v35 = vmul.f32 0.5, %v1995_v33 }
0x196e   : > { %v1997_v36 = vsub.f32 1.5, %v1996_v35 }
0x1970   : > { %v1998_v38 = vmul.f32 %v3634_v31, %v1997_v36 }
0x1972   : > { %v2002_v51 = vsel %vm2001_vm12, %v3634_v31, %v1998_v38  ;;  %v2146_v31 = vld [vmem:[#allocation9 + $0x60] sm:$0xff] }
0x1973   : > { %v2013_v58 = vmul.f32 %v2002_v51, %v1979_v17  ;;  %2170 = vmatpush.msra.mxu1 %v2146_v31 }
0x1975   : > { %v2017_v45 = vmul.f32 %v3523_v39, %v2013_v58 }
0x1977   : > { %v2021_v46 = vadd.f32 %v3524_v42, %v2017_v45  ;;  %v3527_v45 = vld [vmem:[#allocation9 + $0x13d] ss:$0 sm:$0xff] }
0x1979   : > { %3303 = vmatmul.msk.f32.vlgmr.msrb.gmra.mxu3 %vm414_vm13, %v2021_v46 }
0x1983   : > { %v1988_v43 = vpop.xlane.xlu1 %1987 }
0x1984   : > { %v1990_v53 = vmul.f32 0.125, %v1988_v43  ;;  %v3528_v43 = vld [vmem:[#allocation9 + $0x13e] ss:$0 sm:$0xff] }
0x1986   : > { %v1992_v50 = vadd.f32 1e-05, %v1990_v53 }
0x1988   : > { %3635 = vrsqrt.f32 %v1992_v50  ;;  %vm2009_vm0 = vweird.f32 %v1992_v50 }
0x198e   : > { %v3636_v52 = vpop.eup %3635 }
0x198f   : > { %v2004_v54 = vmul.f32 %v3636_v52, %v1992_v50  ;;  %vm2010_vm7 = vweird.f32 %v3636_v52 }
0x1990   : > { %vm2011_vm3 = vmor %vm2009_vm0, %vm2010_vm7 }
0x1991   : > { %v2005_v55 = vmul.f32 %v3636_v52, %v2004_v54 }
0x1993   : > { %v2006_v57 = vmul.f32 0.5, %v2005_v55 }
0x1995   : > { %v2007_v41 = vsub.f32 1.5, %v2006_v57 }
0x1997   : > { %v2008_v61 = vmul.f32 %v3636_v52, %v2007_v41 }
0x1999   : > { %v2012_v62 = vsel %vm2011_vm3, %v3636_v52, %v2008_v61 }
0x199a   : > { %v2014_v0 = vmul.f32 %v2012_v62, %v1980_v40 }
0x199c   : > { %v2018_v15 = vmul.f32 %v3523_v39, %v2014_v0 }
0x199e   : > { %v2022_v63 = vadd.f32 %v3524_v42, %v2018_v15 }
0x19a0   : > { %3304 = vmatmul.msk.f32.gmra.mxu3 %vm414_vm13, %v2022_v63 }
0x19fc   : > { %v2049_v4 = vpop.f32.mrf.mxu3 }
0x19fd   : > { %v2050_v6 = vadd.f32 %v3525_v3, %v2049_v4 }
0x19ff   : > { %v2055_v7 = vmax.f32 %v2050_v6, 0.0 }
0x1a01   : > { %3305 = vmatmul.msk.f32.vlgmr.msra.gmra.mxu0 %vm808_vm8, %v2055_v7 }
0x1a23   : > { %v2052_v8 = vpop.f32.mrf.mxu3 }
0x1a24   : > { %v2053_v34 = vadd.f32 %v3525_v3, %v2052_v8  ;;  %v3529_v3 = vld [vmem:[#allocation9 + $0x68] ss:$0 sm:$0xff] }
0x1a26   : > { %v2056_v13 = vmax.f32 %v2053_v34, 0.0 }
0x1a28   : > { %3306 = vmatmul.msk.f32.gmra.mxu0 %vm808_vm8, %v2056_v13 }
0x1a7e   : > { %v2086_v56 = vpop.f32.mrf.mxu0 }
0x1a7f   : > { %v2087_v59 = vadd.f32 %v3526_v14, %v2086_v56 }
0x1a81   : > { %v2092_v60 = vadd.f32 %v2087_v59, %v2021_v46 }
0x1a83   : > { %v2094_v16 = vsel %vm414_vm13, %v2092_v60, 0.0 }
0x1a84   : > { %2095 = vadd.xlane.f32.xlu2 %v2094_v16 }
0x1aa5   : > { %v2089_v18 = vpop.f32.mrf.mxu0 }
0x1aa6   : > { %v2090_v19 = vadd.f32 %v3526_v14, %v2089_v18 }
0x1aa8   : > { %v2093_v17 = vadd.f32 %v2090_v19, %v2022_v63 }
0x1aaa   : > { %v2097_v21 = vsel %vm414_vm13, %v2093_v17, 0.0 }
0x1aab   : > { %2098 = vadd.xlane.f32.xlu1 %v2097_v21 }
0x1af7   : > { %v2096_v22 = vpop.xlane.xlu2 %2095 }
0x1af8   : > { %v2100_v23 = vmul.f32 0.125, %v2096_v22 }
0x1afa   : > { %v2102_v24 = vsub.f32 %v2092_v60, %v2100_v23 }
0x1afc   : > { %v2104_v40 = vmul.f32 %v2102_v24, %v2102_v24 }
0x1afe   : > { %v2106_v25 = vsel %vm414_vm13, %v2104_v40, 0.0 }
0x1aff   : > { %2107 = vadd.xlane.f32.xlu0 %v2106_v25 }
0x1b1e   : > { %v2099_v26 = vpop.xlane.xlu1 %2098 }
0x1b1f   : > { %v2101_v28 = vmul.f32 0.125, %v2099_v26 }
0x1b21   : > { %v2103_v48 = vsub.f32 %v2093_v17, %v2101_v28 }
0x1b23   : > { %v2105_v29 = vmul.f32 %v2103_v48, %v2103_v48 }
0x1b25   : > { %v2109_v30 = vsel %vm414_vm13, %v2105_v29, 0.0 }
0x1b26   : > { %2110 = vadd.xlane.f32.xlu2 %v2109_v30 }
0x1b72   : > { %v2108_v32 = vpop.xlane.xlu0 %2107 }
0x1b73   : > { %v2112_v33 = vmul.f32 0.125, %v2108_v32 }
0x1b75   : > { %v2114_v35 = vadd.f32 1e-05, %v2112_v33 }
0x1b77   : > { %3637 = vrsqrt.f32 %v2114_v35  ;;  %vm2122_vm2 = vweird.f32 %v2114_v35 }
0x1b7d   : > { %v3638_v36 = vpop.eup %3637 }
0x1b7e   : > { %v2117_v38 = vmul.f32 %v3638_v36, %v2114_v35  ;;  %vm2123_vm4 = vweird.f32 %v3638_v36 }
0x1b7f   : > { %vm2124_vm5 = vmor %vm2122_vm2, %vm2123_vm4 }
0x1b80   : > { %v2118_v39 = vmul.f32 %v3638_v36, %v2117_v38 }
0x1b82   : > { %v2119_v51 = vmul.f32 0.5, %v2118_v39 }
0x1b84   : > { %v2120_v58 = vsub.f32 1.5, %v2119_v51 }
0x1b86   : > { %v2121_v42 = vmul.f32 %v3638_v36, %v2120_v58 }
0x1b88   : > { %v2125_v46 = vsel %vm2124_vm5, %v3638_v36, %v2121_v42 }
0x1b89   : > { %v2136_v47 = vmul.f32 %v2125_v46, %v2102_v24 }
0x1b8b   : > { %v2140_v53 = vmul.f32 %v3527_v45, %v2136_v47 }
0x1b8d   : > { %v4348_v50 = vadd.f32 %v3528_v43, %v2140_v53 }
0x1b8f   : > { %3307 = vmatmul.msk.f32.vlgmr.msra.gmra.mxu1 %vm414_vm13, %v4348_v50 }
0x1b99   : > { %v2111_v52 = vpop.xlane.xlu2 %2110 }
0x1b9a   : > { %v2113_v54 = vmul.f32 0.125, %v2111_v52 }
0x1b9c   : > { %v2115_v55 = vadd.f32 1e-05, %v2113_v54 }
0x1b9e   : > { %3639 = vrsqrt.f32 %v2115_v55  ;;  %vm2132_vm9 = vweird.f32 %v2115_v55 }
0x1ba4   : > { %v3640_v57 = vpop.eup %3639 }
0x1ba5   : > { %v2127_v41 = vmul.f32 %v3640_v57, %v2115_v55  ;;  %vm2133_vm6 = vweird.f32 %v3640_v57 }
0x1ba6   : > { %vm2134_vm10 = vmor %vm2132_vm9, %vm2133_vm6 }
0x1ba7   : > { %v2128_v61 = vmul.f32 %v3640_v57, %v2127_v41 }
0x1ba9   : > { %v2129_v62 = vmul.f32 0.5, %v2128_v61 }
0x1bab   : > { %v2130_v0 = vsub.f32 1.5, %v2129_v62 }
0x1bad   : > { %v2131_v15 = vmul.f32 %v3640_v57, %v2130_v0 }
0x1baf   : > { %v2135_v63 = vsel %vm2134_vm10, %v3640_v57, %v2131_v15 }
0x1bb0   : > { %v2137_v1 = vmul.f32 %v2135_v63, %v2103_v48 }
0x1bb2   : > { %v2141_v2 = vmul.f32 %v3527_v45, %v2137_v1 }
0x1bb4   : > { %v4352_v20 = vadd.f32 %v3528_v43, %v2141_v2 }
0x1bb6   : > { %3308 = vmatmul.msk.f32.gmra.mxu1 %vm414_vm13, %v4352_v20 }
0x1c0c   : > { %v2172_v4 = vpop.f32.mrf.mxu1 }
0x1c0d   : > { %v2173_v6 = vadd.f32 %v3529_v3, %v2172_v4 }
0x1c0f   : > { %2280 = vrot.lane.b32.xlu0 %v2173_v6, %s3828_s16  ;;  %2276 = vrot.lane.b32.xlu2 %v2173_v6, %s3829_s23 }
0x1c17   : > { %2180 = vrot.lane.b32.xlu2 %v2173_v6, %s3830_s24 }
0x1c33   : > { %v2175_v7 = vpop.f32.mrf.mxu1 }
0x1c34   : > { %v2176_v8 = vadd.f32 %v3529_v3, %v2175_v7 }
0x1c36   : > { %2278 = vrot.lane.b32.xlu0 %v2176_v8, %s3829_s23  ;;  %2282 = vrot.lane.b32.xlu1 %v2176_v8, %s3828_s16  ;;  %v3467_v32 = vpack.i.bf16 %v2173_v6, %v2176_v8 }
0x1c3e   : > { %2182 = vrot.lane.b32.xlu1 %v2176_v8, %s3830_s24 }
0x1c69   : > { %v2277_v13 = vpop.permute.xlu2 %2276 }
0x1c71   : > { %v2181_v59 = vpop.permute.xlu2 %2180 }
0x1c81   : > { %v2281_v14 = vpop.permute.xlu0 %2280 }
0x1ca8   : > { %v2283_v34 = vpop.permute.xlu1 %2282  ;;  %v2279_v60 = vpop.permute.xlu0 %2278 }
0x1ca9   : > { %3315 = vmatpush.xpose.msk.msrb.mxu0 %vm248_vm1, %v2283_v34 }
0x1cad   : > { %3316 = vmatpush.xpose.msk.msrb.mxu0 %vm248_vm1, %v2281_v14 }
0x1cb0   : > { %v2183_v56 = vpop.permute.xlu1 %2182  ;;  %3317 = vmatmul.msk.f32.vlgmr.msrb.gmra.mxu0 %vm248_vm1, %v2277_v13 }
0x1cb1   : > { %3309 = vmatpush.xpose.msk.msra.mxu2 %vm248_vm1, %v2183_v56 }
0x1cb5   : > { %3310 = vmatpush.xpose.msk.msra.mxu2 %vm248_vm1, %v2181_v59 }
0x1cb8   : > { %3311 = vmatmul.msk.f32.vlgmr.msra.gmra.mxu2 %vm248_vm1, %v2173_v6  ;;  %3318 = vmatmul.msk.f32.gmra.mxu0 %vm248_vm1, %v2279_v60 }
0x1cc0   : > { %3312 = vmatmul.msk.f32.gmra.mxu2 %vm248_vm1, %v2176_v8 }
0x1d2d   : > { %v2309_v16 = vpop.f32.mrf.mxu0 }
0x1d2e   : > { %v2315_v18 = vmul.f32 0.5, %v2309_v16 }
0x1d30   : > { %v2317_v19 = vsel %vm4059_vm14, %v2315_v18, -1e+30 }
0x1d31   : > { %v2319_v17 = vsel %vm514_vm15, %v2317_v19, -inf }
0x1d32   : > { %2320 = vmax.xlane.f32.xlu0 %v2319_v17 }
0x1d35   : > { %v2312_v21 = vpop.f32.mrf.mxu0 }
0x1d36   : > { %v2316_v22 = vmul.f32 0.5, %v2312_v21  ;;  %v2386_v21 = vld [vmem:[#allocation9 + $0x70] sm:$0xff] }
0x1d37   : > { %2410 = vmatpush.msrb.mxu2 %v2386_v21 }
0x1d38   : > { %v2318_v23 = vsel %vm4059_vm14, %v2316_v22, -1e+30 }
0x1d39   : > { %v2322_v24 = vsel %vm514_vm15, %v2318_v23, -inf }
0x1d3a   : > { %2323 = vmax.xlane.f32.xlu1 %v2322_v24 }
0x1d3b   : > { %v2209_v40 = vpop.f32.mrf.mxu2 }
0x1d3c   : > { %v2215_v25 = vmul.f32 0.5, %v2209_v40 }
0x1d3e   : > { %v2217_v26 = vsel %vm4059_vm14, %v2215_v25, -1e+30 }
0x1d3f   : > { %v2219_v28 = vsel %vm514_vm15, %v2217_v26, -inf }
0x1d40   : > { %2220 = vmax.xlane.f32.xlu2 %v2219_v28  ;;  %v3530_v28 = vld [vmem:[#allocation9 + $0x78] ss:$0 sm:$0xff] }
0x1d43   : > { %v2212_v48 = vpop.f32.mrf.mxu2 }
0x1d44   : > { %v2216_v29 = vmul.f32 0.5, %v2212_v48 }
0x1d46   : > { %v2218_v30 = vsel %vm4059_vm14, %v2216_v29, -1e+30 }
0x1d47   : > { %v2222_v31 = vsel %vm514_vm15, %v2218_v30, -inf }
0x1d48   : > { %2223 = vmax.xlane.f32.xlu0 %v2222_v31 }
0x1d53   : > { %3468 = vrot.lane.b32.xlu1 %v3467_v32, %s3831_s25 }
0x1da5   : > { %v2321_v33 = vpop.xlane.xlu0 %2320 }
0x1da6   : > { %v2325_v35 = vsub.f32 %v2317_v19, %v2321_v33 }
0x1da8   : > { %v2327_v36 = vmul.f32 1.442695, %v2325_v35 }
0x1daa   : > { %3641 = vpow2.f32 %v2327_v36 }
0x1dad   : > { %v2324_v38 = vpop.xlane.xlu1 %2323 }
0x1dae   : > { %v2326_v39 = vsub.f32 %v2318_v23, %v2324_v38 }
0x1db0   : > { %v3642_v51 = vpop.eup %3641  ;;  %v2329_v58 = vmul.f32 1.442695, %v2326_v39 }
0x1db1   : > { %v2331_v42 = vsel %vm514_vm15, %v3642_v51, 0.0 }
0x1db2   : > { %3643 = vpow2.f32 %v2329_v58  ;;  %2332 = vadd.xlane.f32.xlu2 %v2331_v42 }
0x1db3   : > { %v2221_v45 = vpop.xlane.xlu2 %2220 }
0x1db4   : > { %v2225_v46 = vsub.f32 %v2217_v26, %v2221_v45 }
0x1db6   : > { %v2227_v47 = vmul.f32 1.442695, %v2225_v46 }
0x1db8   : > { %v3644_v43 = vpop.eup %3643  ;;  %3645 = vpow2.f32 %v2227_v47 }
0x1db9   : > { %v2334_v53 = vsel %vm514_vm15, %v3644_v43, 0.0 }
0x1dba   : > { %2335 = vadd.xlane.f32.xlu0 %v2334_v53  ;;  %v2472_v53 = vld [vmem:[#allocation9 + $0xa0] sm:$0xff] }
0x1dbb   : > { %v2224_v52 = vpop.xlane.xlu0 %2223 }
0x1dbc   : > { %v2226_v54 = vsub.f32 %v2218_v30, %v2224_v52 }
0x1dbe   : > { %v3646_v55 = vpop.eup %3645  ;;  %v2229_v57 = vmul.f32 1.442695, %v2226_v54 }
0x1dbf   : > { %v2231_v41 = vsel %vm514_vm15, %v3646_v55, 0.0 }
0x1dc0   : > { %3647 = vpow2.f32 %v2229_v57  ;;  %2232 = vadd.xlane.f32.xlu2 %v2231_v41 }
0x1dc5   : > { %v3469_v61 = vpop.permute.xlu1 %3468 }
0x1dc6   : > { %v3648_v62 = vpop.eup %3647  ;;  %v3470_v0 = vunpack.i.l.bf16 %v3469_v61  ;;  %v3471_v63 = vunpack.i.h.bf16 %v3469_v61 }
0x1dc7   : > { %v2234_v15 = vsel %vm514_vm15, %v3648_v62, 0.0 }
0x1dc8   : > { %2367 = vmatpush.msrb.mxu1 %v3470_v0  ;;  %2235 = vadd.xlane.f32.xlu2 %v2234_v15 }
0x1dca   : > { %2368 = vmatpush.msrb.mxu1 %v3471_v63  ;;  %v3531_v63 = vld [vmem:[#allocation9 + $0x171] ss:$0 sm:$0xff] }
0x1dce   : > { %3473 = vrot.lane.b32.xlu0 %v3467_v32, %s3832_s26 }
0x1e25   : > { %v2333_v1 = vpop.xlane.xlu2 %2332 }
0x1e26   : > { %3649 = vrcp.f32 %v2333_v1 }
0x1e2c   : > { %v3650_v2 = vpop.eup %3649 }
0x1e2d   : > { %v2339_v3 = vmul.f32 %v3650_v2, %v3642_v51  ;;  %v2336_v4 = vpop.xlane.xlu0 %2335 }
0x1e2e   : > { %3651 = vrcp.f32 %v2336_v4 }
0x1e2f   : > { %3319 = vmatmul.msk.f32.vlgmr.msrb.gmra.mxu1 %vm514_vm15, %v2339_v3  ;;  %v3532_v3 = vld [vmem:[#allocation9 + $0x172] ss:$0 sm:$0xff] }
0x1e33   : > { %v2233_v8 = vpop.xlane.xlu2 %2232 }
0x1e34   : > { %v3652_v6 = vpop.eup %3651  ;;  %3653 = vrcp.f32 %v2233_v8 }
0x1e35   : > { %v2340_v7 = vmul.f32 %v3652_v6, %v3644_v43 }
0x1e37   : > { %3320 = vmatmul.msk.f32.gmra.mxu1 %vm514_vm15, %v2340_v7 }
0x1e3a   : > { %v3654_v14 = vpop.eup %3653 }
0x1e3b   : > { %v2236_v34 = vpop.xlane.xlu2 %2235  ;;  %v2239_v60 = vmul.f32 %v3654_v14, %v3646_v55 }
0x1e3c   : > { %3655 = vrcp.f32 %v2236_v34 }
0x1e40   : > { %v3474_v13 = vpop.permute.xlu0 %3473 }
0x1e41   : > { %v3475_v56 = vunpack.i.l.bf16 %v3474_v13  ;;  %v3476_v59 = vunpack.i.h.bf16 %v3474_v13 }
0x1e42   : > { %v3656_v16 = vpop.eup %3655 }
0x1e43   : > { %2267 = vmatpush.msra.mxu3 %v3475_v56  ;;  %v2240_v18 = vmul.f32 %v3656_v16, %v3648_v62 }
0x1e45   : > { %2268 = vmatpush.msra.mxu3 %v3476_v59 }
0x1e46   : > { %3313 = vmatmul.msk.f32.vlgmr.msra.gmra.mxu3 %vm514_vm15, %v2239_v60 }
0x1e47   : > { %2496 = vmatpush.msrb.mxu3 %v2472_v53 }
0x1e4e   : > { %3314 = vmatmul.msk.f32.gmra.mxu3 %vm514_vm15, %v2240_v18 }
0x1eac   : > { %v2370_v19 = vpop.f32.mrf.mxu1 }
0x1ead   : > { %2378 = vrot.lane.b32.xlu2 %v2370_v19, %s3827_s17 }
0x1eb4   : > { %v2373_v17 = vpop.f32.mrf.mxu1 }
0x1eb5   : > { %2380 = vrot.lane.b32.xlu1 %v2373_v17, %s3827_s17 }
0x1ec9   : > { %v2270_v22 = vpop.f32.mrf.mxu3 }
0x1ed1   : > { %v2273_v40 = vpop.f32.mrf.mxu3 }
0x1f07   : > { %v2379_v23 = vpop.permute.xlu2 %2378 }
0x1f08   : > { %v2384_v24 = vsel %vm248_vm1, %v2270_v22, %v2379_v23  ;;  %v3533_v23 = vld [vmem:[#allocation9 + $0xa8] ss:$0 sm:$0xff] }
0x1f09   : > { %3321 = vmatmul.msk.f32.vlgmr.msrb.gmra.mxu2 %vm414_vm13, %v2384_v24 }
0x1f27   : > { %v2381_v25 = vpop.permute.xlu1 %2380 }
0x1f28   : > { %v2385_v26 = vsel %vm248_vm1, %v2273_v40, %v2381_v25 }
0x1f29   : > { %3322 = vmatmul.msk.f32.gmra.mxu2 %vm414_vm13, %v2385_v26 }
0x1f8c   : > { %v2412_v48 = vpop.f32.mrf.mxu2 }
0x1f8d   : > { %v2413_v29 = vadd.f32 %v3530_v28, %v2412_v48 }
0x1f8f   : > { %v2418_v30 = vadd.f32 %v2413_v29, %v4348_v50 }
0x1f91   : > { %v2420_v31 = vsel %vm414_vm13, %v2418_v30, 0.0 }
0x1f92   : > { %2421 = vadd.xlane.f32.xlu0 %v2420_v31 }
0x1fac   : > { %v2415_v32 = vpop.f32.mrf.mxu2 }
0x1fad   : > { %v2416_v33 = vadd.f32 %v3530_v28, %v2415_v32 }
0x1faf   : > { %v2419_v35 = vadd.f32 %v2416_v33, %v4352_v20 }
0x1fb1   : > { %v2423_v36 = vsel %vm414_vm13, %v2419_v35, 0.0 }
0x1fb2   : > { %2424 = vadd.xlane.f32.xlu1 %v2423_v36 }
0x1fcb   : > { %2608 = vrot.lane.b32.xlu1 %v4236_v27, %s3831_s25 }
0x2005   : > { %v2422_v38 = vpop.xlane.xlu0 %2421 }
0x2006   : > { %v2426_v39 = vmul.f32 0.125, %v2422_v38 }
0x2008   : > { %v2428_v51 = vsub.f32 %v2418_v30, %v2426_v39 }
0x200a   : > { %v2430_v58 = vmul.f32 %v2428_v51, %v2428_v51 }
0x200c   : > { %v2432_v42 = vsel %vm414_vm13, %v2430_v58, 0.0 }
0x200d   : > { %2433 = vadd.xlane.f32.xlu2 %v2432_v42 }
0x2025   : > { %v2425_v50 = vpop.xlane.xlu1 %2424 }
0x2026   : > { %v2427_v45 = vmul.f32 0.125, %v2425_v50 }
0x2028   : > { %v2429_v46 = vsub.f32 %v2419_v35, %v2427_v45 }
0x202a   : > { %v2431_v47 = vmul.f32 %v2429_v46, %v2429_v46 }
0x202c   : > { %v2435_v43 = vsel %vm414_vm13, %v2431_v47, 0.0 }
0x202d   : > { %2436 = vadd.xlane.f32.xlu0 %v2435_v43 }
0x203d   : > { %v2609_v20 = vpop.permute.xlu1 %2608 }
0x203e   : > { %3331 = vmatpush.xpose.msk.msra.mxu2 %vm248_vm1, %v2609_v20 }
0x2041   : > { %2606 = vrot.lane.b32.xlu0 %v4243_v49, %s3831_s25 }
0x2049   : > { %2506 = vrot.lane.b32.xlu0 %v4236_v27, %s3832_s26 }
0x2080   : > { %v2434_v52 = vpop.xlane.xlu2 %2433 }
0x2081   : > { %v2438_v54 = vmul.f32 0.125, %v2434_v52 }
0x2083   : > { %v2440_v55 = vadd.f32 1e-05, %v2438_v54 }
0x2085   : > { %3657 = vrsqrt.f32 %v2440_v55  ;;  %vm2448_vm12 = vweird.f32 %v2440_v55 }
0x208b   : > { %v3658_v57 = vpop.eup %3657 }
0x208c   : > { %v2443_v41 = vmul.f32 %v3658_v57, %v2440_v55  ;;  %vm2449_vm11 = vweird.f32 %v3658_v57 }
0x208d   : > { %vm2450_vm7 = vmor %vm2448_vm12, %vm2449_vm11 }
0x208e   : > { %v2444_v61 = vmul.f32 %v3658_v57, %v2443_v41 }
0x2090   : > { %v2445_v62 = vmul.f32 0.5, %v2444_v61 }
0x2092   : > { %v2446_v0 = vsub.f32 1.5, %v2445_v62 }
0x2094   : > { %v2447_v15 = vmul.f32 %v3658_v57, %v2446_v0 }
0x2096   : > { %v2451_v1 = vsel %vm2450_vm7, %v3658_v57, %v2447_v15 }
0x2097   : > { %v2462_v2 = vmul.f32 %v2451_v1, %v2428_v51 }
0x2099   : > { %v2466_v27 = vmul.f32 %v3531_v63, %v2462_v2 }
0x209b   : > { %v4411_v4 = vadd.f32 %v3532_v3, %v2466_v27 }
0x209d   : > { %3323 = vmatmul.msk.f32.vlgmr.msrb.gmra.mxu3 %vm414_vm13, %v4411_v4 }
0x20a0   : > { %v2437_v6 = vpop.xlane.xlu0 %2436 }
0x20a1   : > { %v2439_v7 = vmul.f32 0.125, %v2437_v6 }
0x20a3   : > { %v2441_v8 = vadd.f32 1e-05, %v2439_v7 }
0x20a5   : > { %3659 = vrsqrt.f32 %v2441_v8  ;;  %vm2458_vm3 = vweird.f32 %v2441_v8 }
0x20ab   : > { %v3660_v34 = vpop.eup %3659 }
0x20ac   : > { %v2453_v13 = vmul.f32 %v3660_v34, %v2441_v8  ;;  %vm2459_vm0 = vweird.f32 %v3660_v34 }
0x20ad   : > { %vm2460_vm4 = vmor %vm2458_vm3, %vm2459_vm0  ;;  %vm240_vm0 = vcmp.lt.s32.totalorder %v3987_v37, %v4056_v11 }
0x20ae   : > { %v2454_v14 = vmul.f32 %v3660_v34, %v2453_v13 }
0x20b0   : > { %v2455_v56 = vmul.f32 0.5, %v2454_v14 }
0x20b2   : > { %v2456_v59 = vsub.f32 1.5, %v2455_v56 }
0x20b3   : > { %v2607_v60 = vpop.permute.xlu0 %2606 }
0x20b4   : > { %v2457_v16 = vmul.f32 %v3660_v34, %v2456_v59  ;;  %3332 = vmatpush.xpose.msk.msra.mxu2 %vm248_vm1, %v2607_v60 }
0x20b6   : > { %v2461_v18 = vsel %vm2460_vm4, %v3660_v34, %v2457_v16 }
0x20b7   : > { %v2463_v19 = vmul.f32 %v2461_v18, %v2429_v46 }
0x20b9   : > { %v2467_v17 = vmul.f32 %v3531_v63, %v2463_v19 }
0x20bb   : > { %v2507_v21 = vpop.permute.xlu0 %2506  ;;  %v4416_v22 = vadd.f32 %v3532_v3, %v2467_v17 }
0x20bc   : > { %3325 = vmatpush.xpose.msk.msra.mxu0 %vm248_vm1, %v2507_v21 }
0x20bd   : > { %3324 = vmatmul.msk.f32.gmra.mxu3 %vm414_vm13, %v4416_v22 }
0x2120   : > { %v2498_v24 = vpop.f32.mrf.mxu3 }
0x2121   : > { %v2499_v40 = vadd.f32 %v3533_v23, %v2498_v24 }
0x2123   : > { %2602 = vrot.lane.b32.xlu2 %v2499_v40, %s3829_s23 }
0x2140   : > { %v2501_v25 = vpop.f32.mrf.mxu3 }
0x2141   : > { %v2502_v26 = vadd.f32 %v3533_v23, %v2501_v25 }
0x2143   : > { %2604 = vrot.lane.b32.xlu1 %v2502_v26, %s3829_s23 }
0x214b   : > { %2504 = vrot.lane.b32.xlu1 %v4243_v49, %s3832_s26 }
0x217d   : > { %v2603_v28 = vpop.permute.xlu2 %2602 }
0x217e   : > { %3333 = vmatmul.msk.f32.vlgmr.msra.gmra.mxu2 %vm248_vm1, %v2603_v28 }
0x21b5   : > { %v2605_v48 = vpop.permute.xlu1 %2604 }
0x21b6   : > { %3334 = vmatmul.msk.f32.gmra.mxu2 %vm248_vm1, %v2605_v48 }
0x21bd   : > { %v2505_v29 = vpop.permute.xlu1 %2504 }
0x21be   : > { %3326 = vmatpush.xpose.msk.msra.mxu0 %vm248_vm1, %v2505_v29  ;;  %v2712_v29 = vld [vmem:[#allocation9 + $0xb0] sm:$0xff] }
0x21c1   : > { %3327 = vmatmul.msk.f32.vlgmr.msra.gmra.mxu0 %vm248_vm1, %v2499_v40 }
0x21c2   : > { %2736 = vmatpush.msrb.mxu0 %v2712_v29  ;;  %v3537_v29 = vld [vmem:[#allocation9 + $0x180] ss:$0 sm:$0xff] }
0x21c9   : > { %3328 = vmatmul.msk.f32.gmra.mxu0 %vm248_vm1, %v2502_v26 }
0x2201   : > { %v2635_v30 = vpop.f32.mrf.mxu2 }
0x2202   : > { %v2641_v31 = vmul.f32 0.5, %v2635_v30 }
0x2204   : > { %v2643_v32 = vsel %vm4059_vm14, %v2641_v31, -1e+30 }
0x2205   : > { %v2645_v49 = vsel %vm514_vm15, %v2643_v32, -inf }
0x2206   : > { %2646 = vmax.xlane.f32.xlu0 %v2645_v49 }
0x2239   : > { %v2638_v33 = vpop.f32.mrf.mxu2 }
0x223a   : > { %v2642_v35 = vmul.f32 0.5, %v2638_v33 }
0x223c   : > { %v2644_v36 = vsel %vm4059_vm14, %v2642_v35, -1e+30 }
0x223d   : > { %v2648_v38 = vsel %vm514_vm15, %v2644_v36, -inf }
0x223e   : > { %2649 = vmax.xlane.f32.xlu2 %v2648_v38  ;;  %v2535_v39 = vpop.f32.mrf.mxu0 }
0x223f   : > { %v2541_v51 = vmul.f32 0.5, %v2535_v39 }
0x2241   : > { %v2543_v58 = vsel %vm4059_vm14, %v2541_v51, -1e+30 }
0x2242   : > { %v2545_v42 = vsel %vm514_vm15, %v2543_v58, -inf }
0x2243   : > { %2546 = vmax.xlane.f32.xlu1 %v2545_v42 }
0x2246   : > { %v2538_v50 = vpop.f32.mrf.mxu0 }
0x2247   : > { %v2542_v45 = vmul.f32 0.5, %v2538_v50 }
0x2249   : > { %v2544_v46 = vsel %vm4059_vm14, %v2542_v45, -1e+30 }
0x224a   : > { %v2548_v47 = vsel %vm514_vm15, %v2544_v46, -inf }
0x224b   : > { %2549 = vmax.xlane.f32.xlu2 %v2548_v47 }
0x225c   : > { %3478 = vrot.lane.b32.xlu1 %v4311_v10, %s3833_s15 }
0x2279   : > { %v2647_v43 = vpop.xlane.xlu0 %2646 }
0x227a   : > { %v2651_v20 = vsub.f32 %v2643_v32, %v2647_v43 }
0x227c   : > { %v2653_v53 = vmul.f32 1.442695, %v2651_v20 }
0x227e   : > { %3661 = vpow2.f32 %v2653_v53 }
0x2284   : > { %v3662_v52 = vpop.eup %3661 }
0x2285   : > { %v2657_v54 = vsel %vm514_vm15, %v3662_v52, 0.0 }
0x2286   : > { %2658 = vadd.xlane.f32.xlu0 %v2657_v54 }
0x22b1   : > { %v2650_v55 = vpop.xlane.xlu2 %2649 }
0x22b2   : > { %v2652_v57 = vsub.f32 %v2644_v36, %v2650_v55  ;;  %v3534_v36 = vld [vmem:[#allocation9 + $0xb8] ss:$0 sm:$0xff] }
0x22b4   : > { %v2655_v41 = vmul.f32 1.442695, %v2652_v57 }
0x22b6   : > { %3663 = vpow2.f32 %v2655_v41  ;;  %v2547_v12 = vpop.xlane.xlu1 %2546 }
0x22b7   : > { %v2551_v61 = vsub.f32 %v2543_v58, %v2547_v12  ;;  %v2798_v12 = vld [vmem:[#allocation9 + $0x178] sm:$0xff] }
0x22b9   : > { %v2553_v62 = vmul.f32 1.442695, %v2551_v61 }
0x22bb   : > { %3665 = vpow2.f32 %v2553_v62 }
0x22bc   : > { %v3664_v0 = vpop.eup %3663 }
0x22bd   : > { %v2660_v15 = vsel %vm514_vm15, %v3664_v0, 0.0 }
0x22be   : > { %2661 = vadd.xlane.f32.xlu0 %v2660_v15  ;;  %v2550_v63 = vpop.xlane.xlu2 %2549 }
0x22bf   : > { %v2552_v1 = vsub.f32 %v2544_v46, %v2550_v63 }
0x22c1   : > { %v3666_v2 = vpop.eup %3665  ;;  %v2555_v3 = vmul.f32 1.442695, %v2552_v1 }
0x22c2   : > { %v2557_v27 = vsel %vm514_vm15, %v3666_v2, 0.0 }
0x22c3   : > { %3667 = vpow2.f32 %v2555_v3  ;;  %2558 = vadd.xlane.f32.xlu2 %v2557_v27  ;;  %v3535_v27 = vld [vmem:[#allocation9 + $0x173] ss:$0 sm:$0xff] }
0x22c9   : > { %v3668_v6 = vpop.eup %3667 }
0x22ca   : > { %v2560_v7 = vsel %vm514_vm15, %v3668_v6, 0.0 }
0x22cb   : > { %2561 = vadd.xlane.f32.xlu2 %v2560_v7 }
0x22ce   : > { %v3479_v8 = vpop.permute.xlu1 %3478 }
0x22cf   : > { %v3480_v34 = vunpack.i.l.bf16 %v3479_v8  ;;  %v3481_v13 = vunpack.i.h.bf16 %v3479_v8  ;;  %v3536_v8 = vld [vmem:[#allocation9 + $0x174] ss:$0 sm:$0xff] }
0x22d1   : > { %2693 = vmatpush.msra.mxu3 %v3480_v34 }
0x22d2   : > { %3483 = vrot.lane.b32.xlu0 %v4311_v10, %s3834_s27 }
0x22d3   : > { %2694 = vmatpush.msra.mxu3 %v3481_v13 }
0x22f9   : > { %v2659_v14 = vpop.xlane.xlu0 %2658 }
0x22fa   : > { %3669 = vrcp.f32 %v2659_v14  ;;  %v2835_v14 = vld [vmem:[#allocation9 + $0x1a0] sm:$0xff] }
0x22fb   : > { %2856 = vmatpush.msrb.mxu2 %v2835_v14 }
0x2300   : > { %v3670_v56 = vpop.eup %3669 }
0x2301   : > { %v2665_v59 = vmul.f32 %v3670_v56, %v3662_v52 }
0x2303   : > { %3335 = vmatmul.msk.f32.vlgmr.msra.gmra.mxu3 %vm514_vm15, %v2665_v59 }
0x2331   : > { %v2662_v60 = vpop.xlane.xlu0 %2661 }
0x2332   : > { %3671 = vrcp.f32 %v2662_v60 }
0x2336   : > { %v2559_v19 = vpop.xlane.xlu2 %2558 }
0x2337   : > { %3673 = vrcp.f32 %v2559_v19 }
0x2338   : > { %v3672_v16 = vpop.eup %3671 }
0x2339   : > { %v2666_v18 = vmul.f32 %v3672_v16, %v3664_v0 }
0x233b   : > { %3336 = vmatmul.msk.f32.gmra.mxu3 %vm514_vm15, %v2666_v18 }
0x233d   : > { %v3674_v23 = vpop.eup %3673 }
0x233e   : > { %v2562_v17 = vpop.xlane.xlu2 %2561  ;;  %v2565_v40 = vmul.f32 %v3674_v23, %v3666_v2 }
0x233f   : > { %3675 = vrcp.f32 %v2562_v17 }
0x2344   : > { %v3484_v21 = vpop.permute.xlu0 %3483 }
0x2345   : > { %v3485_v24 = vunpack.i.l.bf16 %v3484_v21  ;;  %v3486_v10 = vunpack.i.h.bf16 %v3484_v21  ;;  %v3676_v25 = vpop.eup %3675 }
0x2346   : > { %v2566_v26 = vmul.f32 %v3676_v25, %v3668_v6 }
0x2347   : > { %2593 = vmatpush.msra.mxu1 %v3485_v24 }
0x2349   : > { %2594 = vmatpush.msra.mxu1 %v3486_v10 }
0x234a   : > { %3329 = vmatmul.msk.f32.vlgmr.msra.gmra.mxu1 %vm514_vm15, %v2565_v40 }
0x234b   : > { %2822 = vmatpush.msrb.mxu1 %v2798_v12  ;;  %v3835_v12 = vmov 3  }
0x234c   : > { %3488 = vset.pattern.permute.xlu2 %v3835_v12 }
0x2352   : > { %3330 = vmatmul.msk.f32.gmra.mxu1 %vm514_vm15, %v2566_v26  ;;  %v2834_v26 = vld [vmem:[#allocation9 + $0x198] sm:$0xff] }
0x2353   : > { %2857 = vmatpush.msrb.mxu2 %v2834_v26 }
0x2386   : > { %v2696_v28 = vpop.f32.mrf.mxu3 }
0x2387   : > { %2704 = vrot.lane.b32.xlu2 %v2696_v28, %s3827_s17  ;;  %v2833_v28 = vld [vmem:[#allocation9 + $0x190] sm:$0xff] }
0x2388   : > { %2858 = vmatpush.msrb.mxu2 %v2833_v28 }
0x23be   : > { %v2699_v48 = vpop.f32.mrf.mxu3 }
0x23bf   : > { %2706 = vrot.lane.b32.xlu1 %v2699_v48, %s3827_s17  ;;  %v2832_v48 = vld [vmem:[#allocation9 + $0x188] sm:$0xff] }
0x23c0   : > { %2859 = vmatpush.msrb.mxu2 %v2832_v48 }
0x23c7   : > { %v2596_v30 = vpop.f32.mrf.mxu1 }
0x23cf   : > { %v2599_v49 = vpop.f32.mrf.mxu1 }
0x23e1   : > { %v2705_v31 = vpop.permute.xlu2 %2704 }
0x23e2   : > { %v2710_v32 = vsel %vm248_vm1, %v2596_v30, %v2705_v31 }
0x23e3   : > { %3337 = vmatmul.msk.f32.vlgmr.msrb.gmra.mxu0 %vm414_vm13, %v2710_v32 }
0x2431   : > { %v2707_v33 = vpop.permute.xlu1 %2706 }
0x2432   : > { %v2711_v35 = vsel %vm248_vm1, %v2599_v49, %v2707_v33 }
0x2433   : > { %3338 = vmatmul.msk.f32.gmra.mxu0 %vm414_vm13, %v2711_v35 }
0x2460   : > { %v2738_v38 = vpop.f32.mrf.mxu0 }
0x2461   : > { %v2739_v39 = vadd.f32 %v3534_v36, %v2738_v38 }
0x2463   : > { %v2744_v51 = vadd.f32 %v2739_v39, %v4411_v4 }
0x2465   : > { %v2746_v58 = vsel %vm414_vm13, %v2744_v51, 0.0 }
0x2466   : > { %2747 = vadd.xlane.f32.xlu0 %v2746_v58 }
0x24b0   : > { %v2741_v42 = vpop.f32.mrf.mxu0 }
0x24b1   : > { %v2742_v50 = vadd.f32 %v3534_v36, %v2741_v42  ;;  %v3538_v36 = vld [vmem:[#allocation9 + $0x1a8] ss:$0 sm:$0xff] }
0x24b3   : > { %v2745_v45 = vadd.f32 %v2742_v50, %v4416_v22 }
0x24b5   : > { %v2749_v46 = vsel %vm414_vm13, %v2745_v45, 0.0 }
0x24b6   : > { %2750 = vadd.xlane.f32.xlu1 %v2749_v46 }
0x24d9   : > { %v2748_v47 = vpop.xlane.xlu0 %2747 }
0x24da   : > { %v2752_v43 = vmul.f32 0.125, %v2748_v47 }
0x24dc   : > { %v2754_v20 = vsub.f32 %v2744_v51, %v2752_v43 }
0x24de   : > { %v2756_v53 = vmul.f32 %v2754_v20, %v2754_v20 }
0x24e0   : > { %v2758_v52 = vsel %vm414_vm13, %v2756_v53, 0.0 }
0x24e1   : > { %2759 = vadd.xlane.f32.xlu2 %v2758_v52 }
0x2529   : > { %v2751_v54 = vpop.xlane.xlu1 %2750 }
0x252a   : > { %v2753_v55 = vmul.f32 0.125, %v2751_v54 }
0x252c   : > { %v2755_v4 = vsub.f32 %v2745_v45, %v2753_v55 }
0x252e   : > { %v2757_v57 = vmul.f32 %v2755_v4, %v2755_v4 }
0x2530   : > { %v2761_v41 = vsel %vm414_vm13, %v2757_v57, 0.0 }
0x2531   : > { %2762 = vadd.xlane.f32.xlu0 %v2761_v41 }
0x2554   : > { %v2760_v22 = vpop.xlane.xlu2 %2759 }
0x2555   : > { %v2764_v61 = vmul.f32 0.125, %v2760_v22  ;;  %v3836_v22 = vmov 2  }
0x2556   : > { %3487 = vset.pattern.permute.xlu0 %v3836_v22  ;;  %3491 = vset.pattern.permute.xlu1 %v3836_v22 }
0x2557   : > { %v2766_v62 = vadd.f32 1e-05, %v2764_v61 }
0x2559   : > { %3677 = vrsqrt.f32 %v2766_v62  ;;  %vm2774_vm2 = vweird.f32 %v2766_v62 }
0x255f   : > { %v3678_v0 = vpop.eup %3677 }
0x2560   : > { %v2769_v15 = vmul.f32 %v3678_v0, %v2766_v62  ;;  %vm2775_vm14 = vweird.f32 %v3678_v0 }
0x2561   : > { %vm2776_vm5 = vmor %vm2774_vm2, %vm2775_vm14  ;;  %vm241_vm2 = vcmp.lt.s32.totalorder %v3995_v44, %v4056_v11 }
0x2562   : > { %v2770_v63 = vmul.f32 %v3678_v0, %v2769_v15 }
0x2564   : > { %v2771_v1 = vmul.f32 0.5, %v2770_v63 }
0x2566   : > { %v2772_v2 = vsub.f32 1.5, %v2771_v1 }
0x2568   : > { %v2773_v3 = vmul.f32 %v3678_v0, %v2772_v2 }
0x256a   : > { %v2777_v6 = vsel %vm2776_vm5, %v3678_v0, %v2773_v3 }
0x256b   : > { %v2788_v7 = vmul.f32 %v2777_v6, %v2754_v20  ;;  %v3539_v6 = vld [vmem:[#allocation9 + $0x175] ss:$0 sm:$0xff] }
0x256d   : > { %v2792_v34 = vmul.f32 %v3535_v27, %v2788_v7 }
0x256f   : > { %v2796_v13 = vadd.f32 %v3536_v8, %v2792_v34  ;;  %v3540_v34 = vld [vmem:[#allocation9 + $0x176] ss:$0 sm:$0xff] }
0x2571   : > { %3339 = vmatmul.msk.f32.vlgmr.msrb.gmra.mxu1 %vm414_vm13, %v2796_v13 }
0x25a4   : > { %v2763_v56 = vpop.xlane.xlu0 %2762 }
0x25a5   : > { %v2765_v59 = vmul.f32 0.125, %v2763_v56 }
0x25a7   : > { %v2767_v60 = vadd.f32 1e-05, %v2765_v59  ;;  %v3837_v59 = vmov 4  }
0x25a9   : > { %3679 = vrsqrt.f32 %v2767_v60  ;;  %vm2784_vm9 = vweird.f32 %v2767_v60 }
0x25af   : > { %v3680_v16 = vpop.eup %3679 }
0x25b0   : > { %v2779_v18 = vmul.f32 %v3680_v16, %v2767_v60  ;;  %vm2785_vm6 = vweird.f32 %v3680_v16  ;;  %v3838_v60 = vmov 5  }
0x25b1   : > { %vm2786_vm10 = vmor %vm2784_vm9, %vm2785_vm6  ;;  %vm3070_vm6 = vcmask 97280   ;;  %vm3116_vm9 = vcmask 1042432  }
0x25b2   : > { %v2780_v19 = vmul.f32 %v3680_v16, %v2779_v18 }
0x25b4   : > { %v2781_v17 = vmul.f32 0.5, %v2780_v19 }
0x25b6   : > { %v2782_v21 = vsub.f32 1.5, %v2781_v17 }
0x25b8   : > { %v2783_v23 = vmul.f32 %v3680_v16, %v2782_v21 }
0x25ba   : > { %v2787_v24 = vsel %vm2786_vm10, %v3680_v16, %v2783_v23  ;;  %v3839_v16 = vmov 6   ;;  %vm3118_vm10 = vcmask 1043456  }
0x25bb   : > { %v2789_v10 = vmul.f32 %v2787_v24, %v2755_v4 }
0x25bd   : > { %v2793_v40 = vmul.f32 %v3535_v27, %v2789_v10 }
0x25bf   : > { %v2797_v25 = vadd.f32 %v3536_v8, %v2793_v40 }
0x25c1   : > { %3340 = vmatmul.msk.f32.gmra.mxu1 %vm414_vm13, %v2797_v25 }
0x25ee   : > { %v2824_v30 = vpop.f32.mrf.mxu1 }
0x25ef   : > { %v2825_v31 = vadd.f32 %v3537_v29, %v2824_v30  ;;  %v3840_v30 = vmov 7  }
0x25f1   : > { %v2830_v32 = vmax.f32 %v2825_v31, 0.0 }
0x25f3   : > { %3341 = vmatmul.msk.f32.vlgmr.msrb.gmra.mxu2 %vm808_vm8, %v2830_v32 }
0x263e   : > { %v2827_v49 = vpop.f32.mrf.mxu1 }
0x263f   : > { %v2828_v33 = vadd.f32 %v3537_v29, %v2827_v49 }
0x2641   : > { %v2831_v35 = vmax.f32 %v2828_v33, 0.0 }
0x2643   : > { %3342 = vmatmul.msk.f32.gmra.mxu2 %vm808_vm8, %v2831_v35  ;;  %v2944_v35 = vld [vmem:[#allocation9 + $0x1c8] sm:$0xff] }
0x2676   : > { %v2861_v38 = vpop.f32.mrf.mxu2 }
0x2677   : > { %v2862_v39 = vadd.f32 %v3538_v36, %v2861_v38  ;;  %v2958_v38 = vld [vmem:[#allocation9 + $0x1d8] sm:$0xff] }
0x2679   : > { %v2867_v51 = vadd.f32 %v2862_v39, %v2796_v13 }
0x267b   : > { %v2869_v58 = vsel %vm414_vm13, %v2867_v51, 0.0 }
0x267c   : > { %2870 = vadd.xlane.f32.xlu1 %v2869_v58  ;;  %v2927_v58 = vld [vmem:[#allocation9 + $0x1b0] sm:$0xff] }
0x26c6   : > { %v2864_v42 = vpop.f32.mrf.mxu2 }
0x26c7   : > { %v2865_v50 = vadd.f32 %v3538_v36, %v2864_v42  ;;  %v2928_v36 = vld [vmem:[#allocation9 + $0x1b8] sm:$0xff] }
0x26c9   : > { %v2868_v45 = vadd.f32 %v2865_v50, %v2797_v25 }
0x26cb   : > { %v2872_v46 = vsel %vm414_vm13, %v2868_v45, 0.0 }
0x26cc   : > { %2873 = vadd.xlane.f32.xlu0 %v2872_v46 }
0x26ef   : > { %v2871_v47 = vpop.xlane.xlu1 %2870 }
0x26f0   : > { %v2875_v43 = vmul.f32 0.125, %v2871_v47  ;;  %v3033_v47 = vld [vmem:[#allocation9 + $0x230] sm:$0xff] }
0x26f1   : > { %3050 = vmatpush.msrb.mxu3 %v3033_v47  ;;  %v3690_v47 = vld [vmem:[#allocation2] sm:$0x1] }
0x26f2   : > { %v2877_v20 = vsub.f32 %v2867_v51, %v2875_v43  ;;  %v3032_v43 = vld [vmem:[#allocation9 + $0x228] sm:$0xff] }
0x26f3   : > { %3051 = vmatpush.msrb.mxu3 %v3032_v43  ;;  %v3100_v43 = vsel %vm248_vm1, %v3690_v47, 0.0 }
0x26f4   : > { %v2879_v53 = vmul.f32 %v2877_v20, %v2877_v20 }
0x26f6   : > { %v2881_v52 = vsel %vm414_vm13, %v2879_v53, 0.0 }
0x26f7   : > { %2882 = vadd.xlane.f32.xlu1 %v2881_v52  ;;  %v2972_v52 = vld [vmem:[#allocation9 + $0x1e8] sm:$0xff] }
0x273f   : > { %v2874_v54 = vpop.xlane.xlu0 %2873 }
0x2740   : > { %v2876_v55 = vmul.f32 0.125, %v2874_v54 }
0x2742   : > { %v2878_v4 = vsub.f32 %v2868_v45, %v2876_v55  ;;  %v2943_v45 = vld [vmem:[#allocation9 + $0x1c0] sm:$0xff] }
0x2743   : > { %v3031_v55 = vld [vmem:[#allocation9 + $0x220] sm:$0xff] }
0x2744   : > { %v2880_v57 = vmul.f32 %v2878_v4, %v2878_v4  ;;  %3052 = vmatpush.msrb.mxu3 %v3031_v55  ;;  %v3104_v55 = vrot.slane %v3100_v43, 7 }
0x2746   : > { %v2884_v41 = vsel %vm414_vm13, %v2880_v57, 0.0 }
0x2747   : > { %2885 = vadd.xlane.f32.xlu2 %v2884_v41  ;;  %v2957_v41 = vld [vmem:[#allocation9 + $0x1d0] sm:$0xff] }
0x276a   : > { %v2883_v61 = vpop.xlane.xlu1 %2882 }
0x276b   : > { %v2887_v62 = vmul.f32 0.125, %v2883_v61 }
0x276d   : > { %v2889_v0 = vadd.f32 1e-05, %v2887_v62 }
0x276f   : > { %3681 = vrsqrt.f32 %v2889_v0  ;;  %vm2897_vm12 = vweird.f32 %v2889_v0 }
0x2775   : > { %v3682_v15 = vpop.eup %3681 }
0x2776   : > { %v2892_v63 = vmul.f32 %v3682_v15, %v2889_v0  ;;  %vm2898_vm11 = vweird.f32 %v3682_v15  ;;  %v2986_v0 = vld [vmem:[#allocation9 + $0x1f8] sm:$0xff] }
0x2777   : > { %vm2899_vm7 = vmor %vm2897_vm12, %vm2898_vm11 }
0x2778   : > { %v2893_v1 = vmul.f32 %v3682_v15, %v2892_v63 }
0x277a   : > { %v2894_v2 = vmul.f32 0.5, %v2893_v1  ;;  %v2971_v1 = vld [vmem:[#allocation9 + $0x1e0] sm:$0xff] }
0x277c   : > { %v2895_v3 = vsub.f32 1.5, %v2894_v2  ;;  %v2985_v2 = vld [vmem:[#allocation9 + $0x1f0] sm:$0xff] }
0x277e   : > { %v2896_v27 = vmul.f32 %v3682_v15, %v2895_v3 }
0x2780   : > { %v2900_v7 = vsel %vm2899_vm7, %v3682_v15, %v2896_v27 }
0x2781   : > { %v2911_v8 = vmul.f32 %v2900_v7, %v2877_v20 }
0x2783   : > { %v2915_v13 = vmul.f32 %v3539_v6, %v2911_v8 }
0x2785   : > { %v2919_v14 = vadd.f32 %v3540_v34, %v2915_v13 }
0x2787   : > { %v2925_v56 = vsel %vm240_vm0, %v2919_v14, 0.0  ;;  %v2999_v14 = vld [vmem:[#allocation9 + $0x200] sm:$0xff] }
0x2788   : > { %2931 = vperm.xlu0 %3487, %v2925_v56   ;;  %2946 = vperm.xlu2 %3488, %v2925_v56  }
0x2790   : > { %3489 = vset.pattern.permute.xlu2 %v3837_v59  ;;  %3494 = vset.pattern.permute.xlu0 %v3838_v60 }
0x2791   : > { %2960 = vperm.xlu2 %3489, %v2925_v56  }
0x2799   : > { %3490 = vset.pattern.permute.xlu2 %v3838_v60 }
0x279a   : > { %2974 = vperm.xlu2 %3490, %v2925_v56  }
0x27a2   : > { %3497 = vset.pattern.permute.xlu2 %v3839_v16 }
0x27ba   : > { %v2886_v18 = vpop.xlane.xlu2 %2885 }
0x27bb   : > { %v2888_v19 = vmul.f32 0.125, %v2886_v18 }
0x27bd   : > { %v2890_v17 = vadd.f32 1e-05, %v2888_v19 }
0x27bf   : > { %3683 = vrsqrt.f32 %v2890_v17  ;;  %vm2907_vm4 = vweird.f32 %v2890_v17 }
0x27c5   : > { %v3684_v21 = vpop.eup %3683 }
0x27c6   : > { %v2902_v23 = vmul.f32 %v3684_v21, %v2890_v17  ;;  %vm2908_vm3 = vweird.f32 %v3684_v21 }
0x27c7   : > { %vm2909_vm14 = vmor %vm2907_vm4, %vm2908_vm3 }
0x27c8   : > { %v2903_v37 = vmul.f32 %v3684_v21, %v2902_v23 }
0x27ca   : > { %v2904_v24 = vmul.f32 0.5, %v2903_v37 }
0x27cc   : > { %v2905_v10 = vsub.f32 1.5, %v2904_v24 }
0x27ce   : > { %v2906_v40 = vmul.f32 %v3684_v21, %v2905_v10 }
0x27d0   : > { %v2910_v25 = vsel %vm2909_vm14, %v3684_v21, %v2906_v40 }
0x27d1   : > { %v2912_v26 = vmul.f32 %v2910_v25, %v2878_v4 }
0x27d3   : > { %v2916_v28 = vmul.f32 %v3539_v6, %v2912_v26  ;;  %v3000_v6 = vld [vmem:[#allocation9 + $0x208] sm:$0xff] }
0x27d5   : > { %v2920_v48 = vadd.f32 %v3540_v34, %v2916_v28  ;;  %v3022_v28 = vld [vmem:[#allocation9 + $0x210] sm:$0x1] }
0x27d7   : > { %v2926_v29 = vsel %vm241_vm2, %v2920_v48, 0.0 }
0x27d8   : > { %2992 = vperm.xlu2 %3497, %v2926_v29   ;;  %2978 = vperm.xlu0 %3494, %v2926_v29  }
0x27d9   : > { %2936 = vperm.xlu1 %3491, %v2926_v29  }
0x27e0   : > { %3498 = vset.pattern.permute.xlu2 %v3840_v30  ;;  %3059 = vrot.lane.b32.xlu0 %v3973_v9, %s3827_s17 }
0x27e1   : > { %3492 = vset.pattern.permute.xlu1 %v3835_v12  ;;  %3006 = vperm.xlu2 %3498, %v2926_v29   ;;  %v3030_v12 = vld [vmem:[#allocation9 + $0x218] sm:$0xff] }
0x27e2   : > { %2950 = vperm.xlu1 %3492, %v2926_v29   ;;  %3499 = vset.pattern.permute.xlu0 %v3840_v30  ;;  %v2947_v44 = vpop.permute.xlu2 %2946 }
0x27e3   : > { %v2953_v4 = vmul.f32 %v2947_v44, %v2943_v45  ;;  %3053 = vmatpush.msrb.mxu3 %v3030_v12 }
0x27e9   : > { %3065 = vrot.lane.b32.xlu2 %v3973_v9, %s3841_s28 }
0x27ea   : > { %3493 = vset.pattern.permute.xlu1 %v3837_v59 }
0x27eb   : > { %2964 = vperm.xlu1 %3493, %v2926_v29   ;;  %v2961_v31 = vpop.permute.xlu2 %2960 }
0x27ec   : > { %v2967_v15 = vmul.f32 %v2961_v31, %v2957_v41 }
0x27f3   : > { %3495 = vset.pattern.permute.xlu1 %v3839_v16 }
0x27f4   : > { %2988 = vperm.xlu1 %3495, %v2925_v56   ;;  %v2975_v49 = vpop.permute.xlu2 %2974 }
0x27f5   : > { %v2981_v8 = vmul.f32 %v2975_v49, %v2971_v1  ;;  %v3074_v49 = vld [vmem:[#allocation9 + $0x248] sm:$0xff] }
0x27f6   : > { %3092 = vmatpush.msra.mxu0 %v3074_v49 }
0x27fa   : > { %v2932_v33 = vpop.permute.xlu0 %2931 }
0x27fb   : > { %v2939_v20 = vmul.f32 %v2932_v33, %v2927_v58  ;;  %v3073_v33 = vld [vmem:[#allocation9 + $0x240] sm:$0xff] }
0x27fc   : > { %3496 = vset.pattern.permute.xlu1 %v3840_v30  ;;  %3093 = vmatpush.msra.mxu0 %v3073_v33 }
0x27fd   : > { %3002 = vperm.xlu1 %3496, %v2925_v56   ;;  %v2955_v22 = vadd.f32 %v2953_v4, %v2939_v20  ;;  %v3691_v20 = vld [vmem:[%s182_s9] sm:$0x1] }
0x27ff   : > { %v2969_v3 = vadd.f32 %v2967_v15, %v2955_v22 }
0x2801   : > { %v2983_v59 = vadd.f32 %v2981_v8, %v2969_v3 }
0x2805   : > { %3062 = vrot.lane.b32.xlu1 %v3973_v9, %s3842_s29 }
0x2832   : > { %v2993_v46 = vpop.permute.xlu2 %2992 }
0x2833   : > { %v2996_v27 = vmul.f32 %v2993_v46, %v2986_v0 }
0x283b   : > { %v3007_v7 = vpop.permute.xlu2 %3006 }
0x283c   : > { %v3010_v56 = vmul.f32 %v3007_v7, %v3000_v6 }
0x284a   : > { %v2979_v54 = vpop.permute.xlu0 %2978 }
0x284b   : > { %v2937_v11 = vpop.permute.xlu1 %2936  ;;  %v2982_v61 = vmul.f32 %v2979_v54, %v2972_v52  ;;  %v3101_v52 = vsel %vm248_vm1, %v3967_v5, 0.0 }
0x284c   : > { %v2940_v42 = vmul.f32 %v2937_v11, %v2928_v36  ;;  %v3107_v12 = vrot.slane %v3101_v52, 6 }
0x2854   : > { %v2951_v32 = vpop.permute.xlu1 %2950 }
0x2855   : > { %v2954_v51 = vmul.f32 %v2951_v32, %v2944_v35  ;;  %v3060_v35 = vpop.permute.xlu0 %3059 }
0x2857   : > { %v2956_v53 = vadd.f32 %v2954_v51, %v2940_v42  ;;  %v3066_v42 = vpop.permute.xlu2 %3065 }
0x285d   : > { %v2965_v39 = vpop.permute.xlu1 %2964 }
0x285e   : > { %v2968_v50 = vmul.f32 %v2965_v39, %v2958_v38  ;;  %v3068_v38 = vsel %vm248_vm1, %v3973_v9, %v3060_v35  ;;  %v3034_v39 = vld [vmem:[#allocation9 + $0x238] sm:$0x1] }
0x2860   : > { %v2970_v57 = vadd.f32 %v2968_v50, %v2956_v53  ;;  %v3102_v53 = vsel %vm248_vm1, %v3691_v20, 0.0 }
0x2862   : > { %v2984_v63 = vadd.f32 %v2982_v61, %v2970_v57  ;;  %v3110_v57 = vrot.slane %v3102_v53, 5 }
0x2864   : > { %v2998_v34 = vadd.f32 %v2996_v27, %v2984_v63 }
0x2866   : > { %v2989_v62 = vpop.permute.xlu1 %2988  ;;  %v3012_v19 = vadd.f32 %v3010_v56, %v2998_v34 }
0x2867   : > { %v2995_v13 = vmul.f32 %v2989_v62, %v2985_v2 }
0x2868   : > { %v3014_v23 = vsel %vm808_vm8, %v3012_v19, 0.0 }
0x2869   : > { %v2997_v16 = vadd.f32 %v2995_v13, %v2983_v59 }
0x286f   : > { %v3003_v60 = vpop.permute.xlu1 %3002 }
0x2870   : > { %v3009_v18 = vmul.f32 %v3003_v60, %v2999_v14 }
0x2872   : > { %v3011_v17 = vadd.f32 %v3009_v18, %v2997_v16 }
0x2874   : > { %v3013_v21 = vsel %vm808_vm8, %v3011_v17, 0.0 }
0x2875   : > { %v3015_v37 = vadd.f32 %v3014_v23, %v3013_v21 }
0x2877   : > { %v3016_v24 = vrot.slane %v3015_v37, 4  ;;  %v3063_v36 = vpop.permute.xlu1 %3062 }
0x2878   : > { %v3069_v51 = vsel %vm414_vm13, %v3068_v38, %v3063_v36  ;;  %vm3112_vm13 = vcmask 1040384  }
0x2879   : > { %v3017_v10 = vadd.f32 %v3016_v24, %v3015_v37  ;;  %v3071_v45 = vsel %vm3070_vm6, %v3069_v51, %v3066_v42 }
0x287b   : > { %v3018_v40 = vrot.slane %v3017_v10, 2 }
0x287d   : > { %v3019_v25 = vadd.f32 %v3018_v40, %v3017_v10 }
0x287f   : > { %v3020_v26 = vrot.slane %v3019_v25, 1 }
0x2881   : > { %v3021_v48 = vadd.f32 %v3020_v26, %v3019_v25 }
0x2883   : > { %v3023_v29 = vadd.f32 %v3022_v28, %v3021_v48 }
0x2885   : > { %v3025_v30 = vmin.f32 %v3023_v29, 0.0  ;;  %vm3024_vm5 = vcmp.gt.f32.partialorder %v3023_v29, 0.0 }
0x2887   : > { %v3026_v44 = vmul.f32 1.442695, %v3025_v30 }
0x2889   : > { %3685 = vpow2.f32 %v3026_v44 }
0x288f   : > { %v3686_v11 = vpop.eup %3685 }
0x2890   : > { %v3343_v31 = vadd.f32 -1.0, %v3686_v11 }
0x2892   : > { %v3029_v32 = vsel %vm3024_vm5, %v3023_v29, %v3343_v31 }
0x2893   : > { %3344 = vmatmul.msk.f32.vlgmr.msrb.gmra.mxu3 %vm808_vm8, %v3029_v32  ;;  %vm3114_vm8 = vcmask 1041408  }
0x2916   : > { %v3055_v58 = vpop.f32.mrf.mxu3 }
0x2917   : > { %v3056_v50 = vadd.f32 %v3055_v58, %v3034_v39 }
0x2919   : > { %v3072_v46 = vmul.f32 %v3071_v45, %v3056_v50  ;;  %v3121_v9 = vsel %vm514_vm15, %v3056_v50, 0.0 }
0x291a   : > { %v3123_v41 = vrot.slane %v3121_v9, 7 }
0x291b   : > { %3345 = vmatmul.msk.f32.vlgmr.msra.gmra.mxu0 %vm514_vm15, %v3072_v46 }
0x2998   : > { %v3095_v54 = vpop.f32.mrf.mxu0 }
0x2999   : > { %v3098_v4 = vadd.f32 %v3095_v54, %v3967_v5 }
0x299b   : > { %v3099_v22 = vsel %vm248_vm1, %v3098_v4, 0.0 }
0x299c   : > { %v3113_v61 = vsel %vm3112_vm13, %v3099_v22, %v3104_v55  ;;  %v3125_v62 = vsel %vm3112_vm13, %v3099_v22, %v3123_v41 }
0x299d   : > { %v3115_v0 = vsel %vm3114_vm8, %v3113_v61, %v3107_v12  ;;  %v3126_v15 = vsel %vm3114_vm8, %v3125_v62, 0.0 }
0x299e   : > { %v3117_v63 = vsel %vm3116_vm9, %v3115_v0, %v3110_v57  ;;  %3127 = vst [vmem:[%s3960_s18] sm:$0xff] %v3126_v15 }
0x299f   : > { %v3119_v1 = vsel %vm3118_vm10, %v3117_v63, 0.0 }
0x29a0   : > { %3120 = vst [vmem:[#allocation2] sm:$0xff] %v3119_v1 }
0x29a1 PF: > { %p14_p13 = scmp.ge.s32.totalorder %s3910_s4, 18   ;;  %s4525_s12 = smov %s3812_s13 }
0x29a2   : > { %s4526_s13 = smov %s3816_s14  ;;  %s4527_s14 = smov %s3919_s7 }
0x29a3   : > { %s4528_s15 = smov %s3910_s4  ;;  %16 = sbr.rel (!%p14_p13) target bundleno = 4 (0x4), region = 84 }
0x29a8   :  { %3147 = vsyncpa [#allocation6], 1 }
0x29a9   :  { %3149 = vsyncpa [#allocation6 + $0x1], 1 }
0x29aa   :  { %3150 = vsyncpa [#allocation8], 1 }

</bundles_post_ra>
